<compile_context>
chip_gen: v7x
topology: tpu7x:2x2x1
jax: 0.10.0
libtpu: 0.0.40
codegen_flags: <defaults>
</compile_context>

<pallas_src>
import functools

import numpy as np
import jax
import jax.numpy as jnp
from jax.experimental import pallas as pl
from jax.experimental.pallas import tpu as pltpu

CHANNELS = 3
IMAGE_SIZE = 32
NEG_SLOPE = 0.2
BN_EPS = 0.8

# block(3,16,bn=False), block(16,32), block(32,64), block(64,128)
LAYERS = [(CHANNELS, 16, False), (16, 32, True), (32, 64, True), (64, 128, True)]
DS_SIZE = IMAGE_SIZE // 2 ** 4          # 2
FC_IN = 128 * DS_SIZE ** 2              # 512
K0_PAD = 32                             # layer-0 im2col K (27) padded to 32


# ----------------------------- Pallas kernel --------------------------------
def _discriminator_kernel(
        p0_ref, w0_ref, b0_ref,
        g1_ref, w1_ref, b1_ref, s1_ref, t1_ref,
        g2_ref, w2_ref, b2_ref, s2_ref, t2_ref,
        g3_ref, w3_ref, b3_ref, s3_ref, t3_ref,
        fcw_ref, fcb_ref,
        out_ref):
    """Full Discriminator forward for one batch element; activations stay in VMEM."""

    def leaky(x):
        return jnp.where(x >= 0, x, NEG_SLOPE * x)          # LeakyReLU(0.2)

    # ---- layer 0: conv(3->16); patches im2col'ed in the wrapper (K padded to 32)
    a = jnp.dot(p0_ref[0], w0_ref[...], preferred_element_type=jnp.float32)
    a = leaky(a + b0_ref[...])                               # (256, 16) f32
    # Dropout2d(0.25): identity in eval mode; layer 0 has no BatchNorm.

    # ---- layers 1..3: stride-2 3x3 conv as 9 gather-matmul taps, accumulated
    for g_ref, w_ref, b_ref, s_ref, t_ref in (
            (g1_ref, w1_ref, b1_ref, s1_ref, t1_ref),
            (g2_ref, w2_ref, b2_ref, s2_ref, t2_ref),
            (g3_ref, w3_ref, b3_ref, s3_ref, t3_ref)):
        a_bf = a.astype(jnp.bfloat16)                        # (S_in^2, C_in)
        acc = None
        for k in range(9):                                   # static unroll over taps
            tap = jnp.dot(g_ref[k], a_bf,                    # 0/1 row selection
                          preferred_element_type=jnp.float32)  # (S_out^2, C_in)
            part = jnp.dot(tap.astype(jnp.bfloat16), w_ref[k],
                           preferred_element_type=jnp.float32)  # (S_out^2, C_out)
            acc = part if acc is None else acc + part
        # bias -> LeakyReLU -> Dropout(identity) -> BatchNorm affine (eval)
        a = leaky(acc + b_ref[...]) * s_ref[...] + t_ref[...]

    # ---- FC head: a is (4, 128) = (2x2 spatial, channels); lane-dense output row.
    logit = fcb_ref[...]                                     # (1, 128) f32
    for p in range(4):                                       # contract 4 spatial rows
        logit = logit + jnp.dot(a[p:p + 1, :].astype(jnp.bfloat16), fcw_ref[p],
                                preferred_element_type=jnp.float32)
    validity = pl.reciprocal(1.0 + jnp.exp(-logit), approx=True)   # sigmoid (EUP)
    out_ref[...] = validity[None]                            # (1, 1, 128)


# ------------------------------- JAX glue ------------------------------------
def _im2col_s2(x_nhwc, k=3, stride=2, pad=1):
    """3x3 / stride-2 / pad-1 patches: (B, Ho*Wo, 9*C), taps ordered (kh, kw)-major."""
    B, H, W, C = x_nhwc.shape
    xp = jnp.pad(x_nhwc, ((0, 0), (pad, pad), (pad, pad), (0, 0)))
    Ho = (H + 2 * pad - k) // stride + 1
    Wo = (W + 2 * pad - k) // stride + 1
    cols = [xp[:, kh:kh + stride * Ho:stride, kw:kw + stride * Wo:stride, :]
            for kh in range(k) for kw in range(k)]
    patches = jnp.concatenate(cols, axis=-1)                 # (B, Ho, Wo, 9C)
    return patches.reshape(B, Ho * Wo, k * k * C)


@functools.lru_cache(maxsize=None)
def _gather_mats(s_in):
    """G[k, ho*So+wo, r*S+c] = 1 where (r,c) = (2ho+kh-1, 2wo+kw-1) is in bounds.
    All-zero rows reproduce the conv's zero padding."""
    so = s_in // 2
    g = np.zeros((9, so * so, s_in * s_in), np.float32)
    for kh in range(3):
        for kw in range(3):
            k = kh * 3 + kw
            for ho in range(so):
                r = 2 * ho + kh - 1
                if not (0 <= r < s_in):
                    continue
                for wo in range(so):
                    c = 2 * wo + kw - 1
                    if 0 <= c < s_in:
                        g[k, ho * so + wo, r * s_in + c] = 1.0
    return jnp.asarray(g, jnp.bfloat16)


def init_params(key):
    params = {}
    for idx, (cin, cout, bn) in enumerate(LAYERS):
        key, kw, kb = jax.random.split(key, 3)
        # PyTorch conv weight layout: (Cout, Cin, KH, KW)
        params[f"conv{idx}_w"] = 0.05 * jax.random.normal(kw, (cout, cin, 3, 3), jnp.float32)
        params[f"conv{idx}_b"] = 0.05 * jax.random.normal(kb, (cout,), jnp.float32)
        if bn:
            key, k1, k2, k3, k4 = jax.random.split(key, 5)
            params[f"bn{idx}_gamma"] = 1.0 + 0.1 * jax.random.normal(k1, (cout,), jnp.float32)
            params[f"bn{idx}_beta"] = 0.1 * jax.random.normal(k2, (cout,), jnp.float32)
            params[f"bn{idx}_mean"] = 0.1 * jax.random.normal(k3, (cout,), jnp.float32)
            params[f"bn{idx}_var"] = jax.random.uniform(k4, (cout,), jnp.float32, 0.5, 1.5)
    key, kw, kb = jax.random.split(key, 3)
    # PyTorch Linear weight layout: (out_features, in_features) = (1, 512)
    params["fc_w"] = 0.05 * jax.random.normal(kw, (1, FC_IN), jnp.float32)
    params["fc_b"] = 0.05 * jax.random.normal(kb, (1,), jnp.float32)
    return params


def discriminator_forward(params, img_nchw):
    B = img_nchw.shape[0]
    x = jnp.transpose(img_nchw, (0, 2, 3, 1)).astype(jnp.float32)   # NCHW -> NHWC

    # --- layer 0 operands: wrapper-side im2col on the tiny input, K padded 27->32
    p0 = _im2col_s2(x)                                              # (B, 256, 27)
    p0 = jnp.pad(p0, ((0, 0), (0, 0), (0, K0_PAD - 9 * CHANNELS))).astype(jnp.bfloat16)
    w0 = jnp.transpose(params["conv0_w"], (2, 3, 1, 0)).reshape(9 * CHANNELS, 16)
    w0 = jnp.pad(w0, ((0, K0_PAD - 9 * CHANNELS), (0, 0))).astype(jnp.bfloat16)
    b0 = params["conv0_b"].reshape(1, 16)

    # --- layers 1..3 operands: gather matrices + per-tap weights + folded BN affine
    ops = []
    spatial_in = 16
    for idx in (1, 2, 3):
        cin, cout, _ = LAYERS[idx]
        g = _gather_mats(spatial_in)                                # (9, So^2, Si^2) bf16
        w = jnp.transpose(params[f"conv{idx}_w"], (2, 3, 1, 0)).reshape(9, cin, cout)
        w = w.astype(jnp.bfloat16)
        b = params[f"conv{idx}_b"].reshape(1, cout)
        scale = (params[f"bn{idx}_gamma"]
                 / jnp.sqrt(params[f"bn{idx}_var"] + BN_EPS)).reshape(1, cout)
        shift = (params[f"bn{idx}_beta"].reshape(1, cout)
                 - params[f"bn{idx}_mean"].reshape(1, cout) * scale)
        ops.extend([g, w, b, scale, shift])
        spatial_in //= 2

    # --- FC head: permute weight to the kernel's (spatial-major, channel) flattening
    #     (PyTorch view(B,-1) on NCHW -> index c*4 + (h*2+w)) and pad out to 128 lanes.
    fcw = params["fc_w"].reshape(128, DS_SIZE * DS_SIZE)            # [c, p]
    fcw_k = jnp.zeros((DS_SIZE * DS_SIZE, 128, 128), jnp.float32)
    fcw_k = fcw_k.at[:, :, 0].set(fcw.T).astype(jnp.bfloat16)       # [p, c, out]
    fcb_k = jnp.zeros((1, 128), jnp.float32).at[0, 0].set(params["fc_b"][0])

    args = [p0, w0, b0, *ops, fcw_k, fcb_k]

    def bcast_spec(a):
        if a.ndim == 2:
            return pl.BlockSpec(a.shape, lambda b: (0, 0))
        return pl.BlockSpec(a.shape, lambda b: (0, 0, 0))

    in_specs = [pl.BlockSpec((1, 256, K0_PAD), lambda b: (b, 0, 0))]
    in_specs += [bcast_spec(a) for a in args[1:]]

    out = pl.pallas_call(
        _discriminator_kernel,
        out_shape=jax.ShapeDtypeStruct((B, 1, 128), jnp.float32),
        grid=(B,),
        in_specs=in_specs,
        out_specs=pl.BlockSpec((1, 1, 128), lambda b: (b, 0, 0)),
        compiler_params=pltpu.CompilerParams(
            dimension_semantics=("parallel",)),
    )(*args)
    return out[:, 0, :1]                                            # (B, 1)


# --------------------------- pure-JAX reference -------------------------------
def reference_forward(params, img_nchw):
    x = jnp.transpose(img_nchw, (0, 2, 3, 1)).astype(jnp.float32)
    for idx, (cin, cout, bn) in enumerate(LAYERS):
        w = jnp.transpose(params[f"conv{idx}_w"], (2, 3, 1, 0))     # HWIO
        x = jax.lax.conv_general_dilated(
            x, w, window_strides=(2, 2), padding=((1, 1), (1, 1)),
            dimension_numbers=("NHWC", "HWIO", "NHWC"),
            precision=jax.lax.Precision.HIGHEST)
        x = x + params[f"conv{idx}_b"]
        x = jnp.where(x >= 0, x, NEG_SLOPE * x)
        if bn:
            x = ((x - params[f"bn{idx}_mean"])
                 / jnp.sqrt(params[f"bn{idx}_var"] + BN_EPS)
                 * params[f"bn{idx}_gamma"] + params[f"bn{idx}_beta"])
    flat = jnp.transpose(x, (0, 3, 1, 2)).reshape(x.shape[0], -1)
    logit = jnp.dot(flat, params["fc_w"].T,
                    precision=jax.lax.Precision.HIGHEST) + params["fc_b"]
    return jax.nn.sigmoid(logit)


if __name__ == "__main__":
    key = jax.random.PRNGKey(0)
    key, pkey, xkey = jax.random.split(key, 3)
    params = init_params(pkey)
    img = jax.random.normal(xkey, (2, CHANNELS, IMAGE_SIZE, IMAGE_SIZE), jnp.float32)

    validity = jax.jit(discriminator_forward)(params, img)
    validity = jax.block_until_ready(validity)

    assert validity.shape == (2, 1), validity.shape
    assert bool(jnp.all(jnp.isfinite(validity)))
    assert bool(jnp.all((validity >= 0.0) & (validity <= 1.0)))

    ref = reference_forward(params, img)
    max_err = float(jnp.max(jnp.abs(validity - ref)))
    assert max_err < 3e-2, f"max |kernel - reference| = {max_err}"
    print("KERNEL_OK")
</pallas_src>

<mosaic_0001>
module attributes {stable_mosaic.version = 11 : i64} {
  func.func @_discriminator_kernel(%arg0: i32, %arg1: memref<1x256x32xbf16, #tpu.memory_space<vmem>>, %arg2: memref<32x16xbf16, #tpu.memory_space<vmem>>, %arg3: memref<1x16xf32, #tpu.memory_space<vmem>>, %arg4: memref<9x64x256xbf16, #tpu.memory_space<vmem>>, %arg5: memref<9x16x32xbf16, #tpu.memory_space<vmem>>, %arg6: memref<1x32xf32, #tpu.memory_space<vmem>>, %arg7: memref<1x32xf32, #tpu.memory_space<vmem>>, %arg8: memref<1x32xf32, #tpu.memory_space<vmem>>, %arg9: memref<9x16x64xbf16, #tpu.memory_space<vmem>>, %arg10: memref<9x32x64xbf16, #tpu.memory_space<vmem>>, %arg11: memref<1x64xf32, #tpu.memory_space<vmem>>, %arg12: memref<1x64xf32, #tpu.memory_space<vmem>>, %arg13: memref<1x64xf32, #tpu.memory_space<vmem>>, %arg14: memref<9x4x16xbf16, #tpu.memory_space<vmem>>, %arg15: memref<9x64x128xbf16, #tpu.memory_space<vmem>>, %arg16: memref<1x128xf32, #tpu.memory_space<vmem>>, %arg17: memref<1x128xf32, #tpu.memory_space<vmem>>, %arg18: memref<1x128xf32, #tpu.memory_space<vmem>>, %arg19: memref<4x128x128xbf16, #tpu.memory_space<vmem>>, %arg20: memref<1x128xf32, #tpu.memory_space<vmem>>, %arg21: memref<1x1x128xf32, #tpu.memory_space<vmem>>) attributes {dimension_semantics = [#tpu.dimension_semantics<parallel>], iteration_bounds = array<i64: 2>, scalar_prefetch = 0 : i64, scratch_operands = 0 : i64, tpu.core_type = #tpu.core_type<tc>, window_params = [{transform_indices = @transform_0, window_bounds = array<i64: 1, 256, 32>}, {pipeline_mode = #tpu.pipeline_mode<synchronous>, transform_indices = @transform_1, window_bounds = array<i64: 32, 16>}, {pipeline_mode = #tpu.pipeline_mode<synchronous>, transform_indices = @transform_2, window_bounds = array<i64: 1, 16>}, {pipeline_mode = #tpu.pipeline_mode<synchronous>, transform_indices = @transform_3, window_bounds = array<i64: 9, 64, 256>}, {pipeline_mode = #tpu.pipeline_mode<synchronous>, transform_indices = @transform_4, window_bounds = array<i64: 9, 16, 32>}, {pipeline_mode = #tpu.pipeline_mode<synchronous>, transform_indices = @transform_5, window_bounds = array<i64: 1, 32>}, {pipeline_mode = #tpu.pipeline_mode<synchronous>, transform_indices = @transform_6, window_bounds = array<i64: 1, 32>}, {pipeline_mode = #tpu.pipeline_mode<synchronous>, transform_indices = @transform_7, window_bounds = array<i64: 1, 32>}, {pipeline_mode = #tpu.pipeline_mode<synchronous>, transform_indices = @transform_8, window_bounds = array<i64: 9, 16, 64>}, {pipeline_mode = #tpu.pipeline_mode<synchronous>, transform_indices = @transform_9, window_bounds = array<i64: 9, 32, 64>}, {pipeline_mode = #tpu.pipeline_mode<synchronous>, transform_indices = @transform_10, window_bounds = array<i64: 1, 64>}, {pipeline_mode = #tpu.pipeline_mode<synchronous>, transform_indices = @transform_11, window_bounds = array<i64: 1, 64>}, {pipeline_mode = #tpu.pipeline_mode<synchronous>, transform_indices = @transform_12, window_bounds = array<i64: 1, 64>}, {pipeline_mode = #tpu.pipeline_mode<synchronous>, transform_indices = @transform_13, window_bounds = array<i64: 9, 4, 16>}, {pipeline_mode = #tpu.pipeline_mode<synchronous>, transform_indices = @transform_14, window_bounds = array<i64: 9, 64, 128>}, {pipeline_mode = #tpu.pipeline_mode<synchronous>, transform_indices = @transform_15, window_bounds = array<i64: 1, 128>}, {pipeline_mode = #tpu.pipeline_mode<synchronous>, transform_indices = @transform_16, window_bounds = array<i64: 1, 128>}, {pipeline_mode = #tpu.pipeline_mode<synchronous>, transform_indices = @transform_17, window_bounds = array<i64: 1, 128>}, {pipeline_mode = #tpu.pipeline_mode<synchronous>, transform_indices = @transform_18, window_bounds = array<i64: 4, 128, 128>}, {pipeline_mode = #tpu.pipeline_mode<synchronous>, transform_indices = @transform_19, window_bounds = array<i64: 1, 128>}, {transform_indices = @transform_20, window_bounds = array<i64: 1, 1, 128>}]} {
    %c0 = arith.constant 0 : index
    %c0_0 = arith.constant 0 : index
    %c0_1 = arith.constant 0 : index
    %0 = vector.load %arg1[%c0, %c0_0, %c0_1] : memref<1x256x32xbf16, #tpu.memory_space<vmem>>, vector<1x256x32xbf16>
    %1 = vector.shape_cast %0 : vector<1x256x32xbf16> to vector<256x32xbf16>
    %c0_2 = arith.constant 0 : index
    %c0_3 = arith.constant 0 : index
    %2 = vector.load %arg2[%c0_2, %c0_3] : memref<32x16xbf16, #tpu.memory_space<vmem>>, vector<32x16xbf16>
    %cst = arith.constant dense<0.000000e+00> : vector<256x16xf32>
    %3 = tpu.matmul %1, %2, %cst {dimension_numbers = #tpu.dot_dimension_numbers<[1], [0], [0], [1], [0, 0, 1, 1], [], []>} : vector<256x32xbf16>, vector<32x16xbf16>, vector<256x16xf32> -> vector<256x16xf32>
    %c0_4 = arith.constant 0 : index
    %c0_5 = arith.constant 0 : index
    %4 = vector.load %arg3[%c0_4, %c0_5] : memref<1x16xf32, #tpu.memory_space<vmem>>, vector<1x16xf32>
    %5 = vector.broadcast %4 : vector<1x16xf32> to vector<256x16xf32>
    %6 = arith.addf %3, %5 : vector<256x16xf32>
    %cst_6 = arith.constant 0.000000e+00 : f32
    %7 = vector.broadcast %cst_6 : f32 to vector<256x16xf32>
    %8 = arith.cmpf oge, %6, %7 : vector<256x16xf32>
    %cst_7 = arith.constant 2.000000e-01 : f32
    %9 = vector.broadcast %cst_7 : f32 to vector<256x16xf32>
    %10 = arith.mulf %9, %6 : vector<256x16xf32>
    %11 = arith.select %8, %6, %10 : vector<256x16xi1>, vector<256x16xf32>
    %12 = arith.truncf %11 : vector<256x16xf32> to vector<256x16xbf16>
    %c0_8 = arith.constant 0 : index
    %c0_9 = arith.constant 0 : index
    %c0_10 = arith.constant 0 : index
    %13 = vector.load %arg4[%c0_8, %c0_9, %c0_10] : memref<9x64x256xbf16, #tpu.memory_space<vmem>>, vector<1x64x256xbf16>
    %14 = vector.shape_cast %13 : vector<1x64x256xbf16> to vector<64x256xbf16>
    %cst_11 = arith.constant dense<0.000000e+00> : vector<64x16xf32>
    %15 = tpu.matmul %14, %12, %cst_11 {dimension_numbers = #tpu.dot_dimension_numbers<[1], [0], [0], [1], [0, 0, 1, 1], [], []>} : vector<64x256xbf16>, vector<256x16xbf16>, vector<64x16xf32> -> vector<64x16xf32>
    %16 = arith.truncf %15 : vector<64x16xf32> to vector<64x16xbf16>
    %c0_12 = arith.constant 0 : index
    %c0_13 = arith.constant 0 : index
    %c0_14 = arith.constant 0 : index
    %17 = vector.load %arg5[%c0_12, %c0_13, %c0_14] : memref<9x16x32xbf16, #tpu.memory_space<vmem>>, vector<1x16x32xbf16>
    %18 = vector.shape_cast %17 : vector<1x16x32xbf16> to vector<16x32xbf16>
    %cst_15 = arith.constant dense<0.000000e+00> : vector<64x32xf32>
    %19 = tpu.matmul %16, %18, %cst_15 {dimension_numbers = #tpu.dot_dimension_numbers<[1], [0], [0], [1], [0, 0, 1, 1], [], []>} : vector<64x16xbf16>, vector<16x32xbf16>, vector<64x32xf32> -> vector<64x32xf32>
    %c1 = arith.constant 1 : index
    %c0_16 = arith.constant 0 : index
    %c0_17 = arith.constant 0 : index
    %20 = vector.load %arg4[%c1, %c0_16, %c0_17] : memref<9x64x256xbf16, #tpu.memory_space<vmem>>, vector<1x64x256xbf16>
    %21 = vector.shape_cast %20 : vector<1x64x256xbf16> to vector<64x256xbf16>
    %cst_18 = arith.constant dense<0.000000e+00> : vector<64x16xf32>
    %22 = tpu.matmul %21, %12, %cst_18 {dimension_numbers = #tpu.dot_dimension_numbers<[1], [0], [0], [1], [0, 0, 1, 1], [], []>} : vector<64x256xbf16>, vector<256x16xbf16>, vector<64x16xf32> -> vector<64x16xf32>
    %23 = arith.truncf %22 : vector<64x16xf32> to vector<64x16xbf16>
    %c1_19 = arith.constant 1 : index
    %c0_20 = arith.constant 0 : index
    %c0_21 = arith.constant 0 : index
    %24 = vector.load %arg5[%c1_19, %c0_20, %c0_21] : memref<9x16x32xbf16, #tpu.memory_space<vmem>>, vector<1x16x32xbf16>
    %25 = vector.shape_cast %24 : vector<1x16x32xbf16> to vector<16x32xbf16>
    %cst_22 = arith.constant dense<0.000000e+00> : vector<64x32xf32>
    %26 = tpu.matmul %23, %25, %cst_22 {dimension_numbers = #tpu.dot_dimension_numbers<[1], [0], [0], [1], [0, 0, 1, 1], [], []>} : vector<64x16xbf16>, vector<16x32xbf16>, vector<64x32xf32> -> vector<64x32xf32>
    %27 = arith.addf %19, %26 : vector<64x32xf32>
    %c2 = arith.constant 2 : index
    %c0_23 = arith.constant 0 : index
    %c0_24 = arith.constant 0 : index
    %28 = vector.load %arg4[%c2, %c0_23, %c0_24] : memref<9x64x256xbf16, #tpu.memory_space<vmem>>, vector<1x64x256xbf16>
    %29 = vector.shape_cast %28 : vector<1x64x256xbf16> to vector<64x256xbf16>
    %cst_25 = arith.constant dense<0.000000e+00> : vector<64x16xf32>
    %30 = tpu.matmul %29, %12, %cst_25 {dimension_numbers = #tpu.dot_dimension_numbers<[1], [0], [0], [1], [0, 0, 1, 1], [], []>} : vector<64x256xbf16>, vector<256x16xbf16>, vector<64x16xf32> -> vector<64x16xf32>
    %31 = arith.truncf %30 : vector<64x16xf32> to vector<64x16xbf16>
    %c2_26 = arith.constant 2 : index
    %c0_27 = arith.constant 0 : index
    %c0_28 = arith.constant 0 : index
    %32 = vector.load %arg5[%c2_26, %c0_27, %c0_28] : memref<9x16x32xbf16, #tpu.memory_space<vmem>>, vector<1x16x32xbf16>
    %33 = vector.shape_cast %32 : vector<1x16x32xbf16> to vector<16x32xbf16>
    %cst_29 = arith.constant dense<0.000000e+00> : vector<64x32xf32>
    %34 = tpu.matmul %31, %33, %cst_29 {dimension_numbers = #tpu.dot_dimension_numbers<[1], [0], [0], [1], [0, 0, 1, 1], [], []>} : vector<64x16xbf16>, vector<16x32xbf16>, vector<64x32xf32> -> vector<64x32xf32>
    %35 = arith.addf %27, %34 : vector<64x32xf32>
    %c3 = arith.constant 3 : index
    %c0_30 = arith.constant 0 : index
    %c0_31 = arith.constant 0 : index
    %36 = vector.load %arg4[%c3, %c0_30, %c0_31] : memref<9x64x256xbf16, #tpu.memory_space<vmem>>, vector<1x64x256xbf16>
    %37 = vector.shape_cast %36 : vector<1x64x256xbf16> to vector<64x256xbf16>
    %cst_32 = arith.constant dense<0.000000e+00> : vector<64x16xf32>
    %38 = tpu.matmul %37, %12, %cst_32 {dimension_numbers = #tpu.dot_dimension_numbers<[1], [0], [0], [1], [0, 0, 1, 1], [], []>} : vector<64x256xbf16>, vector<256x16xbf16>, vector<64x16xf32> -> vector<64x16xf32>
    %39 = arith.truncf %38 : vector<64x16xf32> to vector<64x16xbf16>
    %c3_33 = arith.constant 3 : index
    %c0_34 = arith.constant 0 : index
    %c0_35 = arith.constant 0 : index
    %40 = vector.load %arg5[%c3_33, %c0_34, %c0_35] : memref<9x16x32xbf16, #tpu.memory_space<vmem>>, vector<1x16x32xbf16>
    %41 = vector.shape_cast %40 : vector<1x16x32xbf16> to vector<16x32xbf16>
    %cst_36 = arith.constant dense<0.000000e+00> : vector<64x32xf32>
    %42 = tpu.matmul %39, %41, %cst_36 {dimension_numbers = #tpu.dot_dimension_numbers<[1], [0], [0], [1], [0, 0, 1, 1], [], []>} : vector<64x16xbf16>, vector<16x32xbf16>, vector<64x32xf32> -> vector<64x32xf32>
    %43 = arith.addf %35, %42 : vector<64x32xf32>
    %c4 = arith.constant 4 : index
    %c0_37 = arith.constant 0 : index
    %c0_38 = arith.constant 0 : index
    %44 = vector.load %arg4[%c4, %c0_37, %c0_38] : memref<9x64x256xbf16, #tpu.memory_space<vmem>>, vector<1x64x256xbf16>
    %45 = vector.shape_cast %44 : vector<1x64x256xbf16> to vector<64x256xbf16>
    %cst_39 = arith.constant dense<0.000000e+00> : vector<64x16xf32>
    %46 = tpu.matmul %45, %12, %cst_39 {dimension_numbers = #tpu.dot_dimension_numbers<[1], [0], [0], [1], [0, 0, 1, 1], [], []>} : vector<64x256xbf16>, vector<256x16xbf16>, vector<64x16xf32> -> vector<64x16xf32>
    %47 = arith.truncf %46 : vector<64x16xf32> to vector<64x16xbf16>
    %c4_40 = arith.constant 4 : index
    %c0_41 = arith.constant 0 : index
    %c0_42 = arith.constant 0 : index
    %48 = vector.load %arg5[%c4_40, %c0_41, %c0_42] : memref<9x16x32xbf16, #tpu.memory_space<vmem>>, vector<1x16x32xbf16>
    %49 = vector.shape_cast %48 : vector<1x16x32xbf16> to vector<16x32xbf16>
    %cst_43 = arith.constant dense<0.000000e+00> : vector<64x32xf32>
    %50 = tpu.matmul %47, %49, %cst_43 {dimension_numbers = #tpu.dot_dimension_numbers<[1], [0], [0], [1], [0, 0, 1, 1], [], []>} : vector<64x16xbf16>, vector<16x32xbf16>, vector<64x32xf32> -> vector<64x32xf32>
    %51 = arith.addf %43, %50 : vector<64x32xf32>
    %c5 = arith.constant 5 : index
    %c0_44 = arith.constant 0 : index
    %c0_45 = arith.constant 0 : index
    %52 = vector.load %arg4[%c5, %c0_44, %c0_45] : memref<9x64x256xbf16, #tpu.memory_space<vmem>>, vector<1x64x256xbf16>
    %53 = vector.shape_cast %52 : vector<1x64x256xbf16> to vector<64x256xbf16>
    %cst_46 = arith.constant dense<0.000000e+00> : vector<64x16xf32>
    %54 = tpu.matmul %53, %12, %cst_46 {dimension_numbers = #tpu.dot_dimension_numbers<[1], [0], [0], [1], [0, 0, 1, 1], [], []>} : vector<64x256xbf16>, vector<256x16xbf16>, vector<64x16xf32> -> vector<64x16xf32>
    %55 = arith.truncf %54 : vector<64x16xf32> to vector<64x16xbf16>
    %c5_47 = arith.constant 5 : index
    %c0_48 = arith.constant 0 : index
    %c0_49 = arith.constant 0 : index
    %56 = vector.load %arg5[%c5_47, %c0_48, %c0_49] : memref<9x16x32xbf16, #tpu.memory_space<vmem>>, vector<1x16x32xbf16>
    %57 = vector.shape_cast %56 : vector<1x16x32xbf16> to vector<16x32xbf16>
    %cst_50 = arith.constant dense<0.000000e+00> : vector<64x32xf32>
    %58 = tpu.matmul %55, %57, %cst_50 {dimension_numbers = #tpu.dot_dimension_numbers<[1], [0], [0], [1], [0, 0, 1, 1], [], []>} : vector<64x16xbf16>, vector<16x32xbf16>, vector<64x32xf32> -> vector<64x32xf32>
    %59 = arith.addf %51, %58 : vector<64x32xf32>
    %c6 = arith.constant 6 : index
    %c0_51 = arith.constant 0 : index
    %c0_52 = arith.constant 0 : index
    %60 = vector.load %arg4[%c6, %c0_51, %c0_52] : memref<9x64x256xbf16, #tpu.memory_space<vmem>>, vector<1x64x256xbf16>
    %61 = vector.shape_cast %60 : vector<1x64x256xbf16> to vector<64x256xbf16>
    %cst_53 = arith.constant dense<0.000000e+00> : vector<64x16xf32>
    %62 = tpu.matmul %61, %12, %cst_53 {dimension_numbers = #tpu.dot_dimension_numbers<[1], [0], [0], [1], [0, 0, 1, 1], [], []>} : vector<64x256xbf16>, vector<256x16xbf16>, vector<64x16xf32> -> vector<64x16xf32>
    %63 = arith.truncf %62 : vector<64x16xf32> to vector<64x16xbf16>
    %c6_54 = arith.constant 6 : index
    %c0_55 = arith.constant 0 : index
    %c0_56 = arith.constant 0 : index
    %64 = vector.load %arg5[%c6_54, %c0_55, %c0_56] : memref<9x16x32xbf16, #tpu.memory_space<vmem>>, vector<1x16x32xbf16>
    %65 = vector.shape_cast %64 : vector<1x16x32xbf16> to vector<16x32xbf16>
    %cst_57 = arith.constant dense<0.000000e+00> : vector<64x32xf32>
    %66 = tpu.matmul %63, %65, %cst_57 {dimension_numbers = #tpu.dot_dimension_numbers<[1], [0], [0], [1], [0, 0, 1, 1], [], []>} : vector<64x16xbf16>, vector<16x32xbf16>, vector<64x32xf32> -> vector<64x32xf32>
    %67 = arith.addf %59, %66 : vector<64x32xf32>
    %c7 = arith.constant 7 : index
    %c0_58 = arith.constant 0 : index
    %c0_59 = arith.constant 0 : index
    %68 = vector.load %arg4[%c7, %c0_58, %c0_59] : memref<9x64x256xbf16, #tpu.memory_space<vmem>>, vector<1x64x256xbf16>
    %69 = vector.shape_cast %68 : vector<1x64x256xbf16> to vector<64x256xbf16>
    %cst_60 = arith.constant dense<0.000000e+00> : vector<64x16xf32>
    %70 = tpu.matmul %69, %12, %cst_60 {dimension_numbers = #tpu.dot_dimension_numbers<[1], [0], [0], [1], [0, 0, 1, 1], [], []>} : vector<64x256xbf16>, vector<256x16xbf16>, vector<64x16xf32> -> vector<64x16xf32>
    %71 = arith.truncf %70 : vector<64x16xf32> to vector<64x16xbf16>
    %c7_61 = arith.constant 7 : index
    %c0_62 = arith.constant 0 : index
    %c0_63 = arith.constant 0 : index
    %72 = vector.load %arg5[%c7_61, %c0_62, %c0_63] : memref<9x16x32xbf16, #tpu.memory_space<vmem>>, vector<1x16x32xbf16>
    %73 = vector.shape_cast %72 : vector<1x16x32xbf16> to vector<16x32xbf16>
    %cst_64 = arith.constant dense<0.000000e+00> : vector<64x32xf32>
    %74 = tpu.matmul %71, %73, %cst_64 {dimension_numbers = #tpu.dot_dimension_numbers<[1], [0], [0], [1], [0, 0, 1, 1], [], []>} : vector<64x16xbf16>, vector<16x32xbf16>, vector<64x32xf32> -> vector<64x32xf32>
    %75 = arith.addf %67, %74 : vector<64x32xf32>
    %c8 = arith.constant 8 : index
    %c0_65 = arith.constant 0 : index
    %c0_66 = arith.constant 0 : index
    %76 = vector.load %arg4[%c8, %c0_65, %c0_66] : memref<9x64x256xbf16, #tpu.memory_space<vmem>>, vector<1x64x256xbf16>
    %77 = vector.shape_cast %76 : vector<1x64x256xbf16> to vector<64x256xbf16>
    %cst_67 = arith.constant dense<0.000000e+00> : vector<64x16xf32>
    %78 = tpu.matmul %77, %12, %cst_67 {dimension_numbers = #tpu.dot_dimension_numbers<[1], [0], [0], [1], [0, 0, 1, 1], [], []>} : vector<64x256xbf16>, vector<256x16xbf16>, vector<64x16xf32> -> vector<64x16xf32>
    %79 = arith.truncf %78 : vector<64x16xf32> to vector<64x16xbf16>
    %c8_68 = arith.constant 8 : index
    %c0_69 = arith.constant 0 : index
    %c0_70 = arith.constant 0 : index
    %80 = vector.load %arg5[%c8_68, %c0_69, %c0_70] : memref<9x16x32xbf16, #tpu.memory_space<vmem>>, vector<1x16x32xbf16>
    %81 = vector.shape_cast %80 : vector<1x16x32xbf16> to vector<16x32xbf16>
    %cst_71 = arith.constant dense<0.000000e+00> : vector<64x32xf32>
    %82 = tpu.matmul %79, %81, %cst_71 {dimension_numbers = #tpu.dot_dimension_numbers<[1], [0], [0], [1], [0, 0, 1, 1], [], []>} : vector<64x16xbf16>, vector<16x32xbf16>, vector<64x32xf32> -> vector<64x32xf32>
    %83 = arith.addf %75, %82 : vector<64x32xf32>
    %c0_72 = arith.constant 0 : index
    %c0_73 = arith.constant 0 : index
    %84 = vector.load %arg6[%c0_72, %c0_73] : memref<1x32xf32, #tpu.memory_space<vmem>>, vector<1x32xf32>
    %85 = vector.broadcast %84 : vector<1x32xf32> to vector<64x32xf32>
    %86 = arith.addf %83, %85 : vector<64x32xf32>
    %cst_74 = arith.constant 0.000000e+00 : f32
    %87 = vector.broadcast %cst_74 : f32 to vector<64x32xf32>
    %88 = arith.cmpf oge, %86, %87 : vector<64x32xf32>
    %cst_75 = arith.constant 2.000000e-01 : f32
    %89 = vector.broadcast %cst_75 : f32 to vector<64x32xf32>
    %90 = arith.mulf %89, %86 : vector<64x32xf32>
    %91 = arith.select %88, %86, %90 : vector<64x32xi1>, vector<64x32xf32>
    %c0_76 = arith.constant 0 : index
    %c0_77 = arith.constant 0 : index
    %92 = vector.load %arg7[%c0_76, %c0_77] : memref<1x32xf32, #tpu.memory_space<vmem>>, vector<1x32xf32>
    %93 = vector.broadcast %92 : vector<1x32xf32> to vector<64x32xf32>
    %94 = arith.mulf %91, %93 : vector<64x32xf32>
    %c0_78 = arith.constant 0 : index
    %c0_79 = arith.constant 0 : index
    %95 = vector.load %arg8[%c0_78, %c0_79] : memref<1x32xf32, #tpu.memory_space<vmem>>, vector<1x32xf32>
    %96 = vector.broadcast %95 : vector<1x32xf32> to vector<64x32xf32>
    %97 = arith.addf %94, %96 : vector<64x32xf32>
    %98 = arith.truncf %97 : vector<64x32xf32> to vector<64x32xbf16>
    %c0_80 = arith.constant 0 : index
    %c0_81 = arith.constant 0 : index
    %c0_82 = arith.constant 0 : index
    %99 = vector.load %arg9[%c0_80, %c0_81, %c0_82] : memref<9x16x64xbf16, #tpu.memory_space<vmem>>, vector<1x16x64xbf16>
    %100 = vector.shape_cast %99 : vector<1x16x64xbf16> to vector<16x64xbf16>
    %cst_83 = arith.constant dense<0.000000e+00> : vector<16x32xf32>
    %101 = tpu.matmul %100, %98, %cst_83 {dimension_numbers = #tpu.dot_dimension_numbers<[1], [0], [0], [1], [0, 0, 1, 1], [], []>} : vector<16x64xbf16>, vector<64x32xbf16>, vector<16x32xf32> -> vector<16x32xf32>
    %102 = arith.truncf %101 : vector<16x32xf32> to vector<16x32xbf16>
    %c0_84 = arith.constant 0 : index
    %c0_85 = arith.constant 0 : index
    %c0_86 = arith.constant 0 : index
    %103 = vector.load %arg10[%c0_84, %c0_85, %c0_86] : memref<9x32x64xbf16, #tpu.memory_space<vmem>>, vector<1x32x64xbf16>
    %104 = vector.shape_cast %103 : vector<1x32x64xbf16> to vector<32x64xbf16>
    %cst_87 = arith.constant dense<0.000000e+00> : vector<16x64xf32>
    %105 = tpu.matmul %102, %104, %cst_87 {dimension_numbers = #tpu.dot_dimension_numbers<[1], [0], [0], [1], [0, 0, 1, 1], [], []>} : vector<16x32xbf16>, vector<32x64xbf16>, vector<16x64xf32> -> vector<16x64xf32>
    %c1_88 = arith.constant 1 : index
    %c0_89 = arith.constant 0 : index
    %c0_90 = arith.constant 0 : index
    %106 = vector.load %arg9[%c1_88, %c0_89, %c0_90] : memref<9x16x64xbf16, #tpu.memory_space<vmem>>, vector<1x16x64xbf16>
    %107 = vector.shape_cast %106 : vector<1x16x64xbf16> to vector<16x64xbf16>
    %cst_91 = arith.constant dense<0.000000e+00> : vector<16x32xf32>
    %108 = tpu.matmul %107, %98, %cst_91 {dimension_numbers = #tpu.dot_dimension_numbers<[1], [0], [0], [1], [0, 0, 1, 1], [], []>} : vector<16x64xbf16>, vector<64x32xbf16>, vector<16x32xf32> -> vector<16x32xf32>
    %109 = arith.truncf %108 : vector<16x32xf32> to vector<16x32xbf16>
    %c1_92 = arith.constant 1 : index
    %c0_93 = arith.constant 0 : index
    %c0_94 = arith.constant 0 : index
    %110 = vector.load %arg10[%c1_92, %c0_93, %c0_94] : memref<9x32x64xbf16, #tpu.memory_space<vmem>>, vector<1x32x64xbf16>
    %111 = vector.shape_cast %110 : vector<1x32x64xbf16> to vector<32x64xbf16>
    %cst_95 = arith.constant dense<0.000000e+00> : vector<16x64xf32>
    %112 = tpu.matmul %109, %111, %cst_95 {dimension_numbers = #tpu.dot_dimension_numbers<[1], [0], [0], [1], [0, 0, 1, 1], [], []>} : vector<16x32xbf16>, vector<32x64xbf16>, vector<16x64xf32> -> vector<16x64xf32>
    %113 = arith.addf %105, %112 : vector<16x64xf32>
    %c2_96 = arith.constant 2 : index
    %c0_97 = arith.constant 0 : index
    %c0_98 = arith.constant 0 : index
    %114 = vector.load %arg9[%c2_96, %c0_97, %c0_98] : memref<9x16x64xbf16, #tpu.memory_space<vmem>>, vector<1x16x64xbf16>
    %115 = vector.shape_cast %114 : vector<1x16x64xbf16> to vector<16x64xbf16>
    %cst_99 = arith.constant dense<0.000000e+00> : vector<16x32xf32>
    %116 = tpu.matmul %115, %98, %cst_99 {dimension_numbers = #tpu.dot_dimension_numbers<[1], [0], [0], [1], [0, 0, 1, 1], [], []>} : vector<16x64xbf16>, vector<64x32xbf16>, vector<16x32xf32> -> vector<16x32xf32>
    %117 = arith.truncf %116 : vector<16x32xf32> to vector<16x32xbf16>
    %c2_100 = arith.constant 2 : index
    %c0_101 = arith.constant 0 : index
    %c0_102 = arith.constant 0 : index
    %118 = vector.load %arg10[%c2_100, %c0_101, %c0_102] : memref<9x32x64xbf16, #tpu.memory_space<vmem>>, vector<1x32x64xbf16>
    %119 = vector.shape_cast %118 : vector<1x32x64xbf16> to vector<32x64xbf16>
    %cst_103 = arith.constant dense<0.000000e+00> : vector<16x64xf32>
    %120 = tpu.matmul %117, %119, %cst_103 {dimension_numbers = #tpu.dot_dimension_numbers<[1], [0], [0], [1], [0, 0, 1, 1], [], []>} : vector<16x32xbf16>, vector<32x64xbf16>, vector<16x64xf32> -> vector<16x64xf32>
    %121 = arith.addf %113, %120 : vector<16x64xf32>
    %c3_104 = arith.constant 3 : index
    %c0_105 = arith.constant 0 : index
    %c0_106 = arith.constant 0 : index
    %122 = vector.load %arg9[%c3_104, %c0_105, %c0_106] : memref<9x16x64xbf16, #tpu.memory_space<vmem>>, vector<1x16x64xbf16>
    %123 = vector.shape_cast %122 : vector<1x16x64xbf16> to vector<16x64xbf16>
    %cst_107 = arith.constant dense<0.000000e+00> : vector<16x32xf32>
    %124 = tpu.matmul %123, %98, %cst_107 {dimension_numbers = #tpu.dot_dimension_numbers<[1], [0], [0], [1], [0, 0, 1, 1], [], []>} : vector<16x64xbf16>, vector<64x32xbf16>, vector<16x32xf32> -> vector<16x32xf32>
    %125 = arith.truncf %124 : vector<16x32xf32> to vector<16x32xbf16>
    %c3_108 = arith.constant 3 : index
    %c0_109 = arith.constant 0 : index
    %c0_110 = arith.constant 0 : index
    %126 = vector.load %arg10[%c3_108, %c0_109, %c0_110] : memref<9x32x64xbf16, #tpu.memory_space<vmem>>, vector<1x32x64xbf16>
    %127 = vector.shape_cast %126 : vector<1x32x64xbf16> to vector<32x64xbf16>
    %cst_111 = arith.constant dense<0.000000e+00> : vector<16x64xf32>
    %128 = tpu.matmul %125, %127, %cst_111 {dimension_numbers = #tpu.dot_dimension_numbers<[1], [0], [0], [1], [0, 0, 1, 1], [], []>} : vector<16x32xbf16>, vector<32x64xbf16>, vector<16x64xf32> -> vector<16x64xf32>
    %129 = arith.addf %121, %128 : vector<16x64xf32>
    %c4_112 = arith.constant 4 : index
    %c0_113 = arith.constant 0 : index
    %c0_114 = arith.constant 0 : index
    %130 = vector.load %arg9[%c4_112, %c0_113, %c0_114] : memref<9x16x64xbf16, #tpu.memory_space<vmem>>, vector<1x16x64xbf16>
    %131 = vector.shape_cast %130 : vector<1x16x64xbf16> to vector<16x64xbf16>
    %cst_115 = arith.constant dense<0.000000e+00> : vector<16x32xf32>
    %132 = tpu.matmul %131, %98, %cst_115 {dimension_numbers = #tpu.dot_dimension_numbers<[1], [0], [0], [1], [0, 0, 1, 1], [], []>} : vector<16x64xbf16>, vector<64x32xbf16>, vector<16x32xf32> -> vector<16x32xf32>
    %133 = arith.truncf %132 : vector<16x32xf32> to vector<16x32xbf16>
    %c4_116 = arith.constant 4 : index
    %c0_117 = arith.constant 0 : index
    %c0_118 = arith.constant 0 : index
    %134 = vector.load %arg10[%c4_116, %c0_117, %c0_118] : memref<9x32x64xbf16, #tpu.memory_space<vmem>>, vector<1x32x64xbf16>
    %135 = vector.shape_cast %134 : vector<1x32x64xbf16> to vector<32x64xbf16>
    %cst_119 = arith.constant dense<0.000000e+00> : vector<16x64xf32>
    %136 = tpu.matmul %133, %135, %cst_119 {dimension_numbers = #tpu.dot_dimension_numbers<[1], [0], [0], [1], [0, 0, 1, 1], [], []>} : vector<16x32xbf16>, vector<32x64xbf16>, vector<16x64xf32> -> vector<16x64xf32>
    %137 = arith.addf %129, %136 : vector<16x64xf32>
    %c5_120 = arith.constant 5 : index
    %c0_121 = arith.constant 0 : index
    %c0_122 = arith.constant 0 : index
    %138 = vector.load %arg9[%c5_120, %c0_121, %c0_122] : memref<9x16x64xbf16, #tpu.memory_space<vmem>>, vector<1x16x64xbf16>
    %139 = vector.shape_cast %138 : vector<1x16x64xbf16> to vector<16x64xbf16>
    %cst_123 = arith.constant dense<0.000000e+00> : vector<16x32xf32>
    %140 = tpu.matmul %139, %98, %cst_123 {dimension_numbers = #tpu.dot_dimension_numbers<[1], [0], [0], [1], [0, 0, 1, 1], [], []>} : vector<16x64xbf16>, vector<64x32xbf16>, vector<16x32xf32> -> vector<16x32xf32>
    %141 = arith.truncf %140 : vector<16x32xf32> to vector<16x32xbf16>
    %c5_124 = arith.constant 5 : index
    %c0_125 = arith.constant 0 : index
    %c0_126 = arith.constant 0 : index
    %142 = vector.load %arg10[%c5_124, %c0_125, %c0_126] : memref<9x32x64xbf16, #tpu.memory_space<vmem>>, vector<1x32x64xbf16>
    %143 = vector.shape_cast %142 : vector<1x32x64xbf16> to vector<32x64xbf16>
    %cst_127 = arith.constant dense<0.000000e+00> : vector<16x64xf32>
    %144 = tpu.matmul %141, %143, %cst_127 {dimension_numbers = #tpu.dot_dimension_numbers<[1], [0], [0], [1], [0, 0, 1, 1], [], []>} : vector<16x32xbf16>, vector<32x64xbf16>, vector<16x64xf32> -> vector<16x64xf32>
    %145 = arith.addf %137, %144 : vector<16x64xf32>
    %c6_128 = arith.constant 6 : index
    %c0_129 = arith.constant 0 : index
    %c0_130 = arith.constant 0 : index
    %146 = vector.load %arg9[%c6_128, %c0_129, %c0_130] : memref<9x16x64xbf16, #tpu.memory_space<vmem>>, vector<1x16x64xbf16>
    %147 = vector.shape_cast %146 : vector<1x16x64xbf16> to vector<16x64xbf16>
    %cst_131 = arith.constant dense<0.000000e+00> : vector<16x32xf32>
    %148 = tpu.matmul %147, %98, %cst_131 {dimension_numbers = #tpu.dot_dimension_numbers<[1], [0], [0], [1], [0, 0, 1, 1], [], []>} : vector<16x64xbf16>, vector<64x32xbf16>, vector<16x32xf32> -> vector<16x32xf32>
    %149 = arith.truncf %148 : vector<16x32xf32> to vector<16x32xbf16>
    %c6_132 = arith.constant 6 : index
    %c0_133 = arith.constant 0 : index
    %c0_134 = arith.constant 0 : index
    %150 = vector.load %arg10[%c6_132, %c0_133, %c0_134] : memref<9x32x64xbf16, #tpu.memory_space<vmem>>, vector<1x32x64xbf16>
    %151 = vector.shape_cast %150 : vector<1x32x64xbf16> to vector<32x64xbf16>
    %cst_135 = arith.constant dense<0.000000e+00> : vector<16x64xf32>
    %152 = tpu.matmul %149, %151, %cst_135 {dimension_numbers = #tpu.dot_dimension_numbers<[1], [0], [0], [1], [0, 0, 1, 1], [], []>} : vector<16x32xbf16>, vector<32x64xbf16>, vector<16x64xf32> -> vector<16x64xf32>
    %153 = arith.addf %145, %152 : vector<16x64xf32>
    %c7_136 = arith.constant 7 : index
    %c0_137 = arith.constant 0 : index
    %c0_138 = arith.constant 0 : index
    %154 = vector.load %arg9[%c7_136, %c0_137, %c0_138] : memref<9x16x64xbf16, #tpu.memory_space<vmem>>, vector<1x16x64xbf16>
    %155 = vector.shape_cast %154 : vector<1x16x64xbf16> to vector<16x64xbf16>
    %cst_139 = arith.constant dense<0.000000e+00> : vector<16x32xf32>
    %156 = tpu.matmul %155, %98, %cst_139 {dimension_numbers = #tpu.dot_dimension_numbers<[1], [0], [0], [1], [0, 0, 1, 1], [], []>} : vector<16x64xbf16>, vector<64x32xbf16>, vector<16x32xf32> -> vector<16x32xf32>
    %157 = arith.truncf %156 : vector<16x32xf32> to vector<16x32xbf16>
    %c7_140 = arith.constant 7 : index
    %c0_141 = arith.constant 0 : index
    %c0_142 = arith.constant 0 : index
    %158 = vector.load %arg10[%c7_140, %c0_141, %c0_142] : memref<9x32x64xbf16, #tpu.memory_space<vmem>>, vector<1x32x64xbf16>
    %159 = vector.shape_cast %158 : vector<1x32x64xbf16> to vector<32x64xbf16>
    %cst_143 = arith.constant dense<0.000000e+00> : vector<16x64xf32>
    %160 = tpu.matmul %157, %159, %cst_143 {dimension_numbers = #tpu.dot_dimension_numbers<[1], [0], [0], [1], [0, 0, 1, 1], [], []>} : vector<16x32xbf16>, vector<32x64xbf16>, vector<16x64xf32> -> vector<16x64xf32>
    %161 = arith.addf %153, %160 : vector<16x64xf32>
    %c8_144 = arith.constant 8 : index
    %c0_145 = arith.constant 0 : index
    %c0_146 = arith.constant 0 : index
    %162 = vector.load %arg9[%c8_144, %c0_145, %c0_146] : memref<9x16x64xbf16, #tpu.memory_space<vmem>>, vector<1x16x64xbf16>
    %163 = vector.shape_cast %162 : vector<1x16x64xbf16> to vector<16x64xbf16>
    %cst_147 = arith.constant dense<0.000000e+00> : vector<16x32xf32>
    %164 = tpu.matmul %163, %98, %cst_147 {dimension_numbers = #tpu.dot_dimension_numbers<[1], [0], [0], [1], [0, 0, 1, 1], [], []>} : vector<16x64xbf16>, vector<64x32xbf16>, vector<16x32xf32> -> vector<16x32xf32>
    %165 = arith.truncf %164 : vector<16x32xf32> to vector<16x32xbf16>
    %c8_148 = arith.constant 8 : index
    %c0_149 = arith.constant 0 : index
    %c0_150 = arith.constant 0 : index
    %166 = vector.load %arg10[%c8_148, %c0_149, %c0_150] : memref<9x32x64xbf16, #tpu.memory_space<vmem>>, vector<1x32x64xbf16>
    %167 = vector.shape_cast %166 : vector<1x32x64xbf16> to vector<32x64xbf16>
    %cst_151 = arith.constant dense<0.000000e+00> : vector<16x64xf32>
    %168 = tpu.matmul %165, %167, %cst_151 {dimension_numbers = #tpu.dot_dimension_numbers<[1], [0], [0], [1], [0, 0, 1, 1], [], []>} : vector<16x32xbf16>, vector<32x64xbf16>, vector<16x64xf32> -> vector<16x64xf32>
    %169 = arith.addf %161, %168 : vector<16x64xf32>
    %c0_152 = arith.constant 0 : index
    %c0_153 = arith.constant 0 : index
    %170 = vector.load %arg11[%c0_152, %c0_153] : memref<1x64xf32, #tpu.memory_space<vmem>>, vector<1x64xf32>
    %171 = vector.broadcast %170 : vector<1x64xf32> to vector<16x64xf32>
    %172 = arith.addf %169, %171 : vector<16x64xf32>
    %cst_154 = arith.constant 0.000000e+00 : f32
    %173 = vector.broadcast %cst_154 : f32 to vector<16x64xf32>
    %174 = arith.cmpf oge, %172, %173 : vector<16x64xf32>
    %cst_155 = arith.constant 2.000000e-01 : f32
    %175 = vector.broadcast %cst_155 : f32 to vector<16x64xf32>
    %176 = arith.mulf %175, %172 : vector<16x64xf32>
    %177 = arith.select %174, %172, %176 : vector<16x64xi1>, vector<16x64xf32>
    %c0_156 = arith.constant 0 : index
    %c0_157 = arith.constant 0 : index
    %178 = vector.load %arg12[%c0_156, %c0_157] : memref<1x64xf32, #tpu.memory_space<vmem>>, vector<1x64xf32>
    %179 = vector.broadcast %178 : vector<1x64xf32> to vector<16x64xf32>
    %180 = arith.mulf %177, %179 : vector<16x64xf32>
    %c0_158 = arith.constant 0 : index
    %c0_159 = arith.constant 0 : index
    %181 = vector.load %arg13[%c0_158, %c0_159] : memref<1x64xf32, #tpu.memory_space<vmem>>, vector<1x64xf32>
    %182 = vector.broadcast %181 : vector<1x64xf32> to vector<16x64xf32>
    %183 = arith.addf %180, %182 : vector<16x64xf32>
    %184 = arith.truncf %183 : vector<16x64xf32> to vector<16x64xbf16>
    %c0_160 = arith.constant 0 : index
    %c0_161 = arith.constant 0 : index
    %c0_162 = arith.constant 0 : index
    %185 = vector.load %arg14[%c0_160, %c0_161, %c0_162] : memref<9x4x16xbf16, #tpu.memory_space<vmem>>, vector<1x4x16xbf16>
    %186 = vector.shape_cast %185 : vector<1x4x16xbf16> to vector<4x16xbf16>
    %cst_163 = arith.constant dense<0.000000e+00> : vector<4x64xf32>
    %187 = tpu.matmul %186, %184, %cst_163 {dimension_numbers = #tpu.dot_dimension_numbers<[1], [0], [0], [1], [0, 0, 1, 1], [], []>} : vector<4x16xbf16>, vector<16x64xbf16>, vector<4x64xf32> -> vector<4x64xf32>
    %188 = arith.truncf %187 : vector<4x64xf32> to vector<4x64xbf16>
    %c0_164 = arith.constant 0 : index
    %c0_165 = arith.constant 0 : index
    %c0_166 = arith.constant 0 : index
    %189 = vector.load %arg15[%c0_164, %c0_165, %c0_166] : memref<9x64x128xbf16, #tpu.memory_space<vmem>>, vector<1x64x128xbf16>
    %190 = vector.shape_cast %189 : vector<1x64x128xbf16> to vector<64x128xbf16>
    %cst_167 = arith.constant dense<0.000000e+00> : vector<4x128xf32>
    %191 = tpu.matmul %188, %190, %cst_167 {dimension_numbers = #tpu.dot_dimension_numbers<[1], [0], [0], [1], [0, 0, 1, 1], [], []>} : vector<4x64xbf16>, vector<64x128xbf16>, vector<4x128xf32> -> vector<4x128xf32>
    %c1_168 = arith.constant 1 : index
    %c0_169 = arith.constant 0 : index
    %c0_170 = arith.constant 0 : index
    %192 = vector.load %arg14[%c1_168, %c0_169, %c0_170] : memref<9x4x16xbf16, #tpu.memory_space<vmem>>, vector<1x4x16xbf16>
    %193 = vector.shape_cast %192 : vector<1x4x16xbf16> to vector<4x16xbf16>
    %cst_171 = arith.constant dense<0.000000e+00> : vector<4x64xf32>
    %194 = tpu.matmul %193, %184, %cst_171 {dimension_numbers = #tpu.dot_dimension_numbers<[1], [0], [0], [1], [0, 0, 1, 1], [], []>} : vector<4x16xbf16>, vector<16x64xbf16>, vector<4x64xf32> -> vector<4x64xf32>
    %195 = arith.truncf %194 : vector<4x64xf32> to vector<4x64xbf16>
    %c1_172 = arith.constant 1 : index
    %c0_173 = arith.constant 0 : index
    %c0_174 = arith.constant 0 : index
    %196 = vector.load %arg15[%c1_172, %c0_173, %c0_174] : memref<9x64x128xbf16, #tpu.memory_space<vmem>>, vector<1x64x128xbf16>
    %197 = vector.shape_cast %196 : vector<1x64x128xbf16> to vector<64x128xbf16>
    %cst_175 = arith.constant dense<0.000000e+00> : vector<4x128xf32>
    %198 = tpu.matmul %195, %197, %cst_175 {dimension_numbers = #tpu.dot_dimension_numbers<[1], [0], [0], [1], [0, 0, 1, 1], [], []>} : vector<4x64xbf16>, vector<64x128xbf16>, vector<4x128xf32> -> vector<4x128xf32>
    %199 = arith.addf %191, %198 : vector<4x128xf32>
    %c2_176 = arith.constant 2 : index
    %c0_177 = arith.constant 0 : index
    %c0_178 = arith.constant 0 : index
    %200 = vector.load %arg14[%c2_176, %c0_177, %c0_178] : memref<9x4x16xbf16, #tpu.memory_space<vmem>>, vector<1x4x16xbf16>
    %201 = vector.shape_cast %200 : vector<1x4x16xbf16> to vector<4x16xbf16>
    %cst_179 = arith.constant dense<0.000000e+00> : vector<4x64xf32>
    %202 = tpu.matmul %201, %184, %cst_179 {dimension_numbers = #tpu.dot_dimension_numbers<[1], [0], [0], [1], [0, 0, 1, 1], [], []>} : vector<4x16xbf16>, vector<16x64xbf16>, vector<4x64xf32> -> vector<4x64xf32>
    %203 = arith.truncf %202 : vector<4x64xf32> to vector<4x64xbf16>
    %c2_180 = arith.constant 2 : index
    %c0_181 = arith.constant 0 : index
    %c0_182 = arith.constant 0 : index
    %204 = vector.load %arg15[%c2_180, %c0_181, %c0_182] : memref<9x64x128xbf16, #tpu.memory_space<vmem>>, vector<1x64x128xbf16>
    %205 = vector.shape_cast %204 : vector<1x64x128xbf16> to vector<64x128xbf16>
    %cst_183 = arith.constant dense<0.000000e+00> : vector<4x128xf32>
    %206 = tpu.matmul %203, %205, %cst_183 {dimension_numbers = #tpu.dot_dimension_numbers<[1], [0], [0], [1], [0, 0, 1, 1], [], []>} : vector<4x64xbf16>, vector<64x128xbf16>, vector<4x128xf32> -> vector<4x128xf32>
    %207 = arith.addf %199, %206 : vector<4x128xf32>
    %c3_184 = arith.constant 3 : index
    %c0_185 = arith.constant 0 : index
    %c0_186 = arith.constant 0 : index
    %208 = vector.load %arg14[%c3_184, %c0_185, %c0_186] : memref<9x4x16xbf16, #tpu.memory_space<vmem>>, vector<1x4x16xbf16>
    %209 = vector.shape_cast %208 : vector<1x4x16xbf16> to vector<4x16xbf16>
    %cst_187 = arith.constant dense<0.000000e+00> : vector<4x64xf32>
    %210 = tpu.matmul %209, %184, %cst_187 {dimension_numbers = #tpu.dot_dimension_numbers<[1], [0], [0], [1], [0, 0, 1, 1], [], []>} : vector<4x16xbf16>, vector<16x64xbf16>, vector<4x64xf32> -> vector<4x64xf32>
    %211 = arith.truncf %210 : vector<4x64xf32> to vector<4x64xbf16>
    %c3_188 = arith.constant 3 : index
    %c0_189 = arith.constant 0 : index
    %c0_190 = arith.constant 0 : index
    %212 = vector.load %arg15[%c3_188, %c0_189, %c0_190] : memref<9x64x128xbf16, #tpu.memory_space<vmem>>, vector<1x64x128xbf16>
    %213 = vector.shape_cast %212 : vector<1x64x128xbf16> to vector<64x128xbf16>
    %cst_191 = arith.constant dense<0.000000e+00> : vector<4x128xf32>
    %214 = tpu.matmul %211, %213, %cst_191 {dimension_numbers = #tpu.dot_dimension_numbers<[1], [0], [0], [1], [0, 0, 1, 1], [], []>} : vector<4x64xbf16>, vector<64x128xbf16>, vector<4x128xf32> -> vector<4x128xf32>
    %215 = arith.addf %207, %214 : vector<4x128xf32>
    %c4_192 = arith.constant 4 : index
    %c0_193 = arith.constant 0 : index
    %c0_194 = arith.constant 0 : index
    %216 = vector.load %arg14[%c4_192, %c0_193, %c0_194] : memref<9x4x16xbf16, #tpu.memory_space<vmem>>, vector<1x4x16xbf16>
    %217 = vector.shape_cast %216 : vector<1x4x16xbf16> to vector<4x16xbf16>
    %cst_195 = arith.constant dense<0.000000e+00> : vector<4x64xf32>
    %218 = tpu.matmul %217, %184, %cst_195 {dimension_numbers = #tpu.dot_dimension_numbers<[1], [0], [0], [1], [0, 0, 1, 1], [], []>} : vector<4x16xbf16>, vector<16x64xbf16>, vector<4x64xf32> -> vector<4x64xf32>
    %219 = arith.truncf %218 : vector<4x64xf32> to vector<4x64xbf16>
    %c4_196 = arith.constant 4 : index
    %c0_197 = arith.constant 0 : index
    %c0_198 = arith.constant 0 : index
    %220 = vector.load %arg15[%c4_196, %c0_197, %c0_198] : memref<9x64x128xbf16, #tpu.memory_space<vmem>>, vector<1x64x128xbf16>
    %221 = vector.shape_cast %220 : vector<1x64x128xbf16> to vector<64x128xbf16>
    %cst_199 = arith.constant dense<0.000000e+00> : vector<4x128xf32>
    %222 = tpu.matmul %219, %221, %cst_199 {dimension_numbers = #tpu.dot_dimension_numbers<[1], [0], [0], [1], [0, 0, 1, 1], [], []>} : vector<4x64xbf16>, vector<64x128xbf16>, vector<4x128xf32> -> vector<4x128xf32>
    %223 = arith.addf %215, %222 : vector<4x128xf32>
    %c5_200 = arith.constant 5 : index
    %c0_201 = arith.constant 0 : index
    %c0_202 = arith.constant 0 : index
    %224 = vector.load %arg14[%c5_200, %c0_201, %c0_202] : memref<9x4x16xbf16, #tpu.memory_space<vmem>>, vector<1x4x16xbf16>
    %225 = vector.shape_cast %224 : vector<1x4x16xbf16> to vector<4x16xbf16>
    %cst_203 = arith.constant dense<0.000000e+00> : vector<4x64xf32>
    %226 = tpu.matmul %225, %184, %cst_203 {dimension_numbers = #tpu.dot_dimension_numbers<[1], [0], [0], [1], [0, 0, 1, 1], [], []>} : vector<4x16xbf16>, vector<16x64xbf16>, vector<4x64xf32> -> vector<4x64xf32>
    %227 = arith.truncf %226 : vector<4x64xf32> to vector<4x64xbf16>
    %c5_204 = arith.constant 5 : index
    %c0_205 = arith.constant 0 : index
    %c0_206 = arith.constant 0 : index
    %228 = vector.load %arg15[%c5_204, %c0_205, %c0_206] : memref<9x64x128xbf16, #tpu.memory_space<vmem>>, vector<1x64x128xbf16>
    %229 = vector.shape_cast %228 : vector<1x64x128xbf16> to vector<64x128xbf16>
    %cst_207 = arith.constant dense<0.000000e+00> : vector<4x128xf32>
    %230 = tpu.matmul %227, %229, %cst_207 {dimension_numbers = #tpu.dot_dimension_numbers<[1], [0], [0], [1], [0, 0, 1, 1], [], []>} : vector<4x64xbf16>, vector<64x128xbf16>, vector<4x128xf32> -> vector<4x128xf32>
    %231 = arith.addf %223, %230 : vector<4x128xf32>
    %c6_208 = arith.constant 6 : index
    %c0_209 = arith.constant 0 : index
    %c0_210 = arith.constant 0 : index
    %232 = vector.load %arg14[%c6_208, %c0_209, %c0_210] : memref<9x4x16xbf16, #tpu.memory_space<vmem>>, vector<1x4x16xbf16>
    %233 = vector.shape_cast %232 : vector<1x4x16xbf16> to vector<4x16xbf16>
    %cst_211 = arith.constant dense<0.000000e+00> : vector<4x64xf32>
    %234 = tpu.matmul %233, %184, %cst_211 {dimension_numbers = #tpu.dot_dimension_numbers<[1], [0], [0], [1], [0, 0, 1, 1], [], []>} : vector<4x16xbf16>, vector<16x64xbf16>, vector<4x64xf32> -> vector<4x64xf32>
    %235 = arith.truncf %234 : vector<4x64xf32> to vector<4x64xbf16>
    %c6_212 = arith.constant 6 : index
    %c0_213 = arith.constant 0 : index
    %c0_214 = arith.constant 0 : index
    %236 = vector.load %arg15[%c6_212, %c0_213, %c0_214] : memref<9x64x128xbf16, #tpu.memory_space<vmem>>, vector<1x64x128xbf16>
    %237 = vector.shape_cast %236 : vector<1x64x128xbf16> to vector<64x128xbf16>
    %cst_215 = arith.constant dense<0.000000e+00> : vector<4x128xf32>
    %238 = tpu.matmul %235, %237, %cst_215 {dimension_numbers = #tpu.dot_dimension_numbers<[1], [0], [0], [1], [0, 0, 1, 1], [], []>} : vector<4x64xbf16>, vector<64x128xbf16>, vector<4x128xf32> -> vector<4x128xf32>
    %239 = arith.addf %231, %238 : vector<4x128xf32>
    %c7_216 = arith.constant 7 : index
    %c0_217 = arith.constant 0 : index
    %c0_218 = arith.constant 0 : index
    %240 = vector.load %arg14[%c7_216, %c0_217, %c0_218] : memref<9x4x16xbf16, #tpu.memory_space<vmem>>, vector<1x4x16xbf16>
    %241 = vector.shape_cast %240 : vector<1x4x16xbf16> to vector<4x16xbf16>
    %cst_219 = arith.constant dense<0.000000e+00> : vector<4x64xf32>
    %242 = tpu.matmul %241, %184, %cst_219 {dimension_numbers = #tpu.dot_dimension_numbers<[1], [0], [0], [1], [0, 0, 1, 1], [], []>} : vector<4x16xbf16>, vector<16x64xbf16>, vector<4x64xf32> -> vector<4x64xf32>
    %243 = arith.truncf %242 : vector<4x64xf32> to vector<4x64xbf16>
    %c7_220 = arith.constant 7 : index
    %c0_221 = arith.constant 0 : index
    %c0_222 = arith.constant 0 : index
    %244 = vector.load %arg15[%c7_220, %c0_221, %c0_222] : memref<9x64x128xbf16, #tpu.memory_space<vmem>>, vector<1x64x128xbf16>
    %245 = vector.shape_cast %244 : vector<1x64x128xbf16> to vector<64x128xbf16>
    %cst_223 = arith.constant dense<0.000000e+00> : vector<4x128xf32>
    %246 = tpu.matmul %243, %245, %cst_223 {dimension_numbers = #tpu.dot_dimension_numbers<[1], [0], [0], [1], [0, 0, 1, 1], [], []>} : vector<4x64xbf16>, vector<64x128xbf16>, vector<4x128xf32> -> vector<4x128xf32>
    %247 = arith.addf %239, %246 : vector<4x128xf32>
    %c8_224 = arith.constant 8 : index
    %c0_225 = arith.constant 0 : index
    %c0_226 = arith.constant 0 : index
    %248 = vector.load %arg14[%c8_224, %c0_225, %c0_226] : memref<9x4x16xbf16, #tpu.memory_space<vmem>>, vector<1x4x16xbf16>
    %249 = vector.shape_cast %248 : vector<1x4x16xbf16> to vector<4x16xbf16>
    %cst_227 = arith.constant dense<0.000000e+00> : vector<4x64xf32>
    %250 = tpu.matmul %249, %184, %cst_227 {dimension_numbers = #tpu.dot_dimension_numbers<[1], [0], [0], [1], [0, 0, 1, 1], [], []>} : vector<4x16xbf16>, vector<16x64xbf16>, vector<4x64xf32> -> vector<4x64xf32>
    %251 = arith.truncf %250 : vector<4x64xf32> to vector<4x64xbf16>
    %c8_228 = arith.constant 8 : index
    %c0_229 = arith.constant 0 : index
    %c0_230 = arith.constant 0 : index
    %252 = vector.load %arg15[%c8_228, %c0_229, %c0_230] : memref<9x64x128xbf16, #tpu.memory_space<vmem>>, vector<1x64x128xbf16>
    %253 = vector.shape_cast %252 : vector<1x64x128xbf16> to vector<64x128xbf16>
    %cst_231 = arith.constant dense<0.000000e+00> : vector<4x128xf32>
    %254 = tpu.matmul %251, %253, %cst_231 {dimension_numbers = #tpu.dot_dimension_numbers<[1], [0], [0], [1], [0, 0, 1, 1], [], []>} : vector<4x64xbf16>, vector<64x128xbf16>, vector<4x128xf32> -> vector<4x128xf32>
    %255 = arith.addf %247, %254 : vector<4x128xf32>
    %c0_232 = arith.constant 0 : index
    %c0_233 = arith.constant 0 : index
    %256 = vector.load %arg16[%c0_232, %c0_233] : memref<1x128xf32, #tpu.memory_space<vmem>>, vector<1x128xf32>
    %257 = vector.broadcast %256 : vector<1x128xf32> to vector<4x128xf32>
    %258 = arith.addf %255, %257 : vector<4x128xf32>
    %cst_234 = arith.constant 0.000000e+00 : f32
    %259 = vector.broadcast %cst_234 : f32 to vector<4x128xf32>
    %260 = arith.cmpf oge, %258, %259 : vector<4x128xf32>
    %cst_235 = arith.constant 2.000000e-01 : f32
    %261 = vector.broadcast %cst_235 : f32 to vector<4x128xf32>
    %262 = arith.mulf %261, %258 : vector<4x128xf32>
    %263 = arith.select %260, %258, %262 : vector<4x128xi1>, vector<4x128xf32>
    %c0_236 = arith.constant 0 : index
    %c0_237 = arith.constant 0 : index
    %264 = vector.load %arg17[%c0_236, %c0_237] : memref<1x128xf32, #tpu.memory_space<vmem>>, vector<1x128xf32>
    %265 = vector.broadcast %264 : vector<1x128xf32> to vector<4x128xf32>
    %266 = arith.mulf %263, %265 : vector<4x128xf32>
    %c0_238 = arith.constant 0 : index
    %c0_239 = arith.constant 0 : index
    %267 = vector.load %arg18[%c0_238, %c0_239] : memref<1x128xf32, #tpu.memory_space<vmem>>, vector<1x128xf32>
    %268 = vector.broadcast %267 : vector<1x128xf32> to vector<4x128xf32>
    %269 = arith.addf %266, %268 : vector<4x128xf32>
    %c0_240 = arith.constant 0 : index
    %c0_241 = arith.constant 0 : index
    %270 = vector.load %arg20[%c0_240, %c0_241] : memref<1x128xf32, #tpu.memory_space<vmem>>, vector<1x128xf32>
    %271 = vector.extract_strided_slice %269 {offsets = [0, 0], sizes = [1, 128], strides = [1, 1]} : vector<4x128xf32> to vector<1x128xf32>
    %272 = arith.truncf %271 : vector<1x128xf32> to vector<1x128xbf16>
    %c0_242 = arith.constant 0 : index
    %c0_243 = arith.constant 0 : index
    %c0_244 = arith.constant 0 : index
    %273 = vector.load %arg19[%c0_242, %c0_243, %c0_244] : memref<4x128x128xbf16, #tpu.memory_space<vmem>>, vector<1x128x128xbf16>
    %274 = vector.shape_cast %273 : vector<1x128x128xbf16> to vector<128x128xbf16>
    %cst_245 = arith.constant dense<0.000000e+00> : vector<1x128xf32>
    %275 = tpu.matmul %272, %274, %cst_245 {dimension_numbers = #tpu.dot_dimension_numbers<[1], [0], [0], [1], [0, 0, 1, 1], [], []>} : vector<1x128xbf16>, vector<128x128xbf16>, vector<1x128xf32> -> vector<1x128xf32>
    %276 = arith.addf %270, %275 : vector<1x128xf32>
    %277 = vector.extract_strided_slice %269 {offsets = [1, 0], sizes = [1, 128], strides = [1, 1]} : vector<4x128xf32> to vector<1x128xf32>
    %278 = arith.truncf %277 : vector<1x128xf32> to vector<1x128xbf16>
    %c1_246 = arith.constant 1 : index
    %c0_247 = arith.constant 0 : index
    %c0_248 = arith.constant 0 : index
    %279 = vector.load %arg19[%c1_246, %c0_247, %c0_248] : memref<4x128x128xbf16, #tpu.memory_space<vmem>>, vector<1x128x128xbf16>
    %280 = vector.shape_cast %279 : vector<1x128x128xbf16> to vector<128x128xbf16>
    %cst_249 = arith.constant dense<0.000000e+00> : vector<1x128xf32>
    %281 = tpu.matmul %278, %280, %cst_249 {dimension_numbers = #tpu.dot_dimension_numbers<[1], [0], [0], [1], [0, 0, 1, 1], [], []>} : vector<1x128xbf16>, vector<128x128xbf16>, vector<1x128xf32> -> vector<1x128xf32>
    %282 = arith.addf %276, %281 : vector<1x128xf32>
    %283 = vector.extract_strided_slice %269 {offsets = [2, 0], sizes = [1, 128], strides = [1, 1]} : vector<4x128xf32> to vector<1x128xf32>
    %284 = arith.truncf %283 : vector<1x128xf32> to vector<1x128xbf16>
    %c2_250 = arith.constant 2 : index
    %c0_251 = arith.constant 0 : index
    %c0_252 = arith.constant 0 : index
    %285 = vector.load %arg19[%c2_250, %c0_251, %c0_252] : memref<4x128x128xbf16, #tpu.memory_space<vmem>>, vector<1x128x128xbf16>
    %286 = vector.shape_cast %285 : vector<1x128x128xbf16> to vector<128x128xbf16>
    %cst_253 = arith.constant dense<0.000000e+00> : vector<1x128xf32>
    %287 = tpu.matmul %284, %286, %cst_253 {dimension_numbers = #tpu.dot_dimension_numbers<[1], [0], [0], [1], [0, 0, 1, 1], [], []>} : vector<1x128xbf16>, vector<128x128xbf16>, vector<1x128xf32> -> vector<1x128xf32>
    %288 = arith.addf %282, %287 : vector<1x128xf32>
    %289 = vector.extract_strided_slice %269 {offsets = [3, 0], sizes = [1, 128], strides = [1, 1]} : vector<4x128xf32> to vector<1x128xf32>
    %290 = arith.truncf %289 : vector<1x128xf32> to vector<1x128xbf16>
    %c3_254 = arith.constant 3 : index
    %c0_255 = arith.constant 0 : index
    %c0_256 = arith.constant 0 : index
    %291 = vector.load %arg19[%c3_254, %c0_255, %c0_256] : memref<4x128x128xbf16, #tpu.memory_space<vmem>>, vector<1x128x128xbf16>
    %292 = vector.shape_cast %291 : vector<1x128x128xbf16> to vector<128x128xbf16>
    %cst_257 = arith.constant dense<0.000000e+00> : vector<1x128xf32>
    %293 = tpu.matmul %290, %292, %cst_257 {dimension_numbers = #tpu.dot_dimension_numbers<[1], [0], [0], [1], [0, 0, 1, 1], [], []>} : vector<1x128xbf16>, vector<128x128xbf16>, vector<1x128xf32> -> vector<1x128xf32>
    %294 = arith.addf %288, %293 : vector<1x128xf32>
    %cst_258 = arith.constant 0.000000e+00 : f32
    %295 = vector.broadcast %cst_258 : f32 to vector<1x128xf32>
    %296 = arith.subf %295, %294 : vector<1x128xf32>
    %297 = math.exp %296 : vector<1x128xf32>
    %cst_259 = arith.constant 1.000000e+00 : f32
    %298 = vector.broadcast %cst_259 : f32 to vector<1x128xf32>
    %299 = arith.addf %298, %297 : vector<1x128xf32>
    %300 = tpu.reciprocal %299 {approx = true} : vector<1x128xf32> -> vector<1x128xf32>
    %301 = vector.shape_cast %300 : vector<1x128xf32> to vector<1x1x128xf32>
    %c0_260 = arith.constant 0 : index
    %c0_261 = arith.constant 0 : index
    %c0_262 = arith.constant 0 : index
    %302 = vector.load %arg21[%c0_260, %c0_261, %c0_262] : memref<1x1x128xf32, #tpu.memory_space<vmem>>, vector<1x1x128xf32>
    tpu.vector_store %arg21[%c0_260, %c0_261, %c0_262], %301 {strides = array<i32>} : memref<1x1x128xf32, #tpu.memory_space<vmem>>, vector<1x1x128xf32>,
    return
  }
  func.func @transform_0(%arg0: i32) -> (i32, i32, i32) {
    %c0_i32 = arith.constant 0 : i32
    %c0_i32_0 = arith.constant 0 : i32
    %c0_i32_1 = arith.constant 0 : i32
    return %arg0, %c0_i32, %c0_i32_0 : i32, i32, i32
  }
  func.func @transform_1(%arg0: i32) -> (i32, i32) {
    %c0_i32 = arith.constant 0 : i32
    %c0_i32_0 = arith.constant 0 : i32
    %c0_i32_1 = arith.constant 0 : i32
    return %c0_i32, %c0_i32_0 : i32, i32
  }
  func.func @transform_2(%arg0: i32) -> (i32, i32) {
    %c0_i32 = arith.constant 0 : i32
    %c0_i32_0 = arith.constant 0 : i32
    %c0_i32_1 = arith.constant 0 : i32
    return %c0_i32, %c0_i32_0 : i32, i32
  }
  func.func @transform_3(%arg0: i32) -> (i32, i32, i32) {
    %c0_i32 = arith.constant 0 : i32
    %c0_i32_0 = arith.constant 0 : i32
    %c0_i32_1 = arith.constant 0 : i32
    %c0_i32_2 = arith.constant 0 : i32
    return %c0_i32, %c0_i32_0, %c0_i32_1 : i32, i32, i32
  }
  func.func @transform_4(%arg0: i32) -> (i32, i32, i32) {
    %c0_i32 = arith.constant 0 : i32
    %c0_i32_0 = arith.constant 0 : i32
    %c0_i32_1 = arith.constant 0 : i32
    %c0_i32_2 = arith.constant 0 : i32
    return %c0_i32, %c0_i32_0, %c0_i32_1 : i32, i32, i32
  }
  func.func @transform_5(%arg0: i32) -> (i32, i32) {
    %c0_i32 = arith.constant 0 : i32
    %c0_i32_0 = arith.constant 0 : i32
    %c0_i32_1 = arith.constant 0 : i32
    return %c0_i32, %c0_i32_0 : i32, i32
  }
  func.func @transform_6(%arg0: i32) -> (i32, i32) {
    %c0_i32 = arith.constant 0 : i32
    %c0_i32_0 = arith.constant 0 : i32
    %c0_i32_1 = arith.constant 0 : i32
    return %c0_i32, %c0_i32_0 : i32, i32
  }
  func.func @transform_7(%arg0: i32) -> (i32, i32) {
    %c0_i32 = arith.constant 0 : i32
    %c0_i32_0 = arith.constant 0 : i32
    %c0_i32_1 = arith.constant 0 : i32
    return %c0_i32, %c0_i32_0 : i32, i32
  }
  func.func @transform_8(%arg0: i32) -> (i32, i32, i32) {
    %c0_i32 = arith.constant 0 : i32
    %c0_i32_0 = arith.constant 0 : i32
    %c0_i32_1 = arith.constant 0 : i32
    %c0_i32_2 = arith.constant 0 : i32
    return %c0_i32, %c0_i32_0, %c0_i32_1 : i32, i32, i32
  }
  func.func @transform_9(%arg0: i32) -> (i32, i32, i32) {
    %c0_i32 = arith.constant 0 : i32
    %c0_i32_0 = arith.constant 0 : i32
    %c0_i32_1 = arith.constant 0 : i32
    %c0_i32_2 = arith.constant 0 : i32
    return %c0_i32, %c0_i32_0, %c0_i32_1 : i32, i32, i32
  }
  func.func @transform_10(%arg0: i32) -> (i32, i32) {
    %c0_i32 = arith.constant 0 : i32
    %c0_i32_0 = arith.constant 0 : i32
    %c0_i32_1 = arith.constant 0 : i32
    return %c0_i32, %c0_i32_0 : i32, i32
  }
  func.func @transform_11(%arg0: i32) -> (i32, i32) {
    %c0_i32 = arith.constant 0 : i32
    %c0_i32_0 = arith.constant 0 : i32
    %c0_i32_1 = arith.constant 0 : i32
    return %c0_i32, %c0_i32_0 : i32, i32
  }
  func.func @transform_12(%arg0: i32) -> (i32, i32) {
    %c0_i32 = arith.constant 0 : i32
    %c0_i32_0 = arith.constant 0 : i32
    %c0_i32_1 = arith.constant 0 : i32
    return %c0_i32, %c0_i32_0 : i32, i32
  }
  func.func @transform_13(%arg0: i32) -> (i32, i32, i32) {
    %c0_i32 = arith.constant 0 : i32
    %c0_i32_0 = arith.constant 0 : i32
    %c0_i32_1 = arith.constant 0 : i32
    %c0_i32_2 = arith.constant 0 : i32
    return %c0_i32, %c0_i32_0, %c0_i32_1 : i32, i32, i32
  }
  func.func @transform_14(%arg0: i32) -> (i32, i32, i32) {
    %c0_i32 = arith.constant 0 : i32
    %c0_i32_0 = arith.constant 0 : i32
    %c0_i32_1 = arith.constant 0 : i32
    %c0_i32_2 = arith.constant 0 : i32
    return %c0_i32, %c0_i32_0, %c0_i32_1 : i32, i32, i32
  }
  func.func @transform_15(%arg0: i32) -> (i32, i32) {
    %c0_i32 = arith.constant 0 : i32
    %c0_i32_0 = arith.constant 0 : i32
    %c0_i32_1 = arith.constant 0 : i32
    return %c0_i32, %c0_i32_0 : i32, i32
  }
  func.func @transform_16(%arg0: i32) -> (i32, i32) {
    %c0_i32 = arith.constant 0 : i32
    %c0_i32_0 = arith.constant 0 : i32
    %c0_i32_1 = arith.constant 0 : i32
    return %c0_i32, %c0_i32_0 : i32, i32
  }
  func.func @transform_17(%arg0: i32) -> (i32, i32) {
    %c0_i32 = arith.constant 0 : i32
    %c0_i32_0 = arith.constant 0 : i32
    %c0_i32_1 = arith.constant 0 : i32
    return %c0_i32, %c0_i32_0 : i32, i32
  }
  func.func @transform_18(%arg0: i32) -> (i32, i32, i32) {
    %c0_i32 = arith.constant 0 : i32
    %c0_i32_0 = arith.constant 0 : i32
    %c0_i32_1 = arith.constant 0 : i32
    %c0_i32_2 = arith.constant 0 : i32
    return %c0_i32, %c0_i32_0, %c0_i32_1 : i32, i32, i32
  }
  func.func @transform_19(%arg0: i32) -> (i32, i32) {
    %c0_i32 = arith.constant 0 : i32
    %c0_i32_0 = arith.constant 0 : i32
    %c0_i32_1 = arith.constant 0 : i32
    return %c0_i32, %c0_i32_0 : i32, i32
  }
  func.func @transform_20(%arg0: i32) -> (i32, i32, i32) {
    %c0_i32 = arith.constant 0 : i32
    %c0_i32_0 = arith.constant 0 : i32
    %c0_i32_1 = arith.constant 0 : i32
    return %arg0, %c0_i32, %c0_i32_0 : i32, i32, i32
  }
}

</mosaic_0001>

<bundles_post_ra>
// kernel: discriminator_forward.1
= control target key start
LH: loop header
LB: loop body
LE: loop exit
PB: predicated region body
PF: predicated region fallthrough
CT: control target
= control target key end

     0   :  { %s9235_s0 = inlined_call_operand.vmem [shape: bf16[2,256,32], index: 0, kind: input, shape index: {}]   ;;  %s9236_s1 = inlined_call_operand.vmem [shape: bf16[32,16], index: 1, kind: input, shape index: {}]   ;;  %s9237_s2 = inlined_call_operand.vmem [shape: f32[1,16], index: 2, kind: input, shape index: {}]   ;;  %s9238_s3 = inlined_call_operand.vmem [shape: bf16[9,64,256], index: 3, kind: input, shape index: {}]   ;;  %s9239_s4 = inlined_call_operand.vmem [shape: bf16[9,16,32], index: 4, kind: input, shape index: {}]   ;;  %s9240_s5 = inlined_call_operand.vmem [shape: f32[1,32], index: 5, kind: input, shape index: {}]   ;;  %s9241_s6 = inlined_call_operand.vmem [shape: f32[1,32], index: 6, kind: input, shape index: {}]   ;;  %s9242_s7 = inlined_call_operand.vmem [shape: f32[1,32], index: 7, kind: input, shape index: {}]   ;;  %s9243_s8 = inlined_call_operand.vmem [shape: bf16[9,16,64], index: 8, kind: input, shape index: {}]   ;;  %s9244_s9 = inlined_call_operand.vmem [shape: bf16[9,32,64], index: 9, kind: input, shape index: {}]   ;;  %s9245_s10 = inlined_call_operand.vmem [shape: f32[1,64], index: 10, kind: input, shape index: {}]   ;;  %s9246_s11 = inlined_call_operand.vmem [shape: f32[1,64], index: 11, kind: input, shape index: {}]   ;;  %s9247_s12 = inlined_call_operand.vmem [shape: f32[1,64], index: 12, kind: input, shape index: {}]   ;;  %s9248_s13 = inlined_call_operand.vmem [shape: bf16[9,4,16], index: 13, kind: input, shape index: {}]   ;;  %s9249_s14 = inlined_call_operand.vmem [shape: bf16[9,64,128], index: 14, kind: input, shape index: {}]   ;;  %s9250_s15 = inlined_call_operand.vmem [shape: f32[1,128], index: 15, kind: input, shape index: {}]   ;;  %s9251_s16 = inlined_call_operand.vmem [shape: f32[1,128], index: 16, kind: input, shape index: {}]   ;;  %s9252_s17 = inlined_call_operand.vmem [shape: f32[1,128], index: 17, kind: input, shape index: {}]   ;;  %s9253_s18 = inlined_call_operand.vmem [shape: bf16[4,128,128], index: 18, kind: input, shape index: {}]   ;;  %s9254_s19 = inlined_call_operand.vmem [shape: f32[1,128], index: 19, kind: input, shape index: {}]   ;;  %s9255_s20 = inlined_call_operand.vmem [shape: f32[2,1,128], index: 20, kind: output, shape index: {}]  }
   0x1   :  { %9259 = sst [smem:[#allocation2_spill]] %s9235_s0 }
   0x2   :  { %9260 = sst [smem:[#allocation3_spill]] %s9236_s1  ;;  %s7866_s1 = smov 0  }
   0x3   :  { %9261 = sst [smem:[#allocation4_spill]] %s9237_s2 }
   0x4   :  { %9262 = sst [smem:[#allocation5_spill]] %s9238_s3 }
   0x5   :  { %9263 = sst [smem:[#allocation6_spill]] %s9239_s4 }
   0x6 LB: > { %s5738_s22 = sadd.s32 4294967295, %s7757_s1   ;;  %p5742_p0 = scmp.ge.s32.totalorder %s7757_s1, 1  ;;  %s7757_s1 = sphi %s7866_s1, %s30_s1  }
   0x7   : > { %p562_p1 = scmp.lt.s32.totalorder %s7757_s1, 3 }
   0x9   : > { %p563_p2 = pnand %p5742_p0, %p562_p1 }
   0xa   : > { %s9264_s2 = sld [smem:[#allocation3_spill]] (!%p563_p2)  ;;  %p618_p3 = scmp.lt.s32.totalorder (!%p563_p2), %s5738_s22, 1  ;;  %vm762_vm0 = vcmask (!%p563_p2), 261120  }
   0xb   : > { %566 = sbr.rel (%p563_p2) target bundleno = 5187 (0x1443), region = 100  ;;  %s9265_s4 = sld [smem:[#allocation2_spill]] (!%p563_p2) }
   0xc   : > { %s9266_s21 = sld [smem:[#allocation6_spill]] (!%p563_p2)  ;;  %s9267_s25 = sld [smem:[#allocation5_spill]] (!%p563_p2) }
   0xd   : > { %s9268_s27 = sld [smem:[#allocation4_spill]] (!%p563_p2) }
  0x10   : > { %v7517_v0 = vld [vmem:[%s9264_s2] sm:$0xff] (!%p563_p2)   ;;  %v7518_v1 = vld [vmem:[%s9264_s2 + $0x8] sm:$0xff] (!%p563_p2)  }
  0x11   : > { %6882 = vmatprep.subr.bf16.mxu0 (!%p563_p2), %v7517_v0 }
  0x12   : > { %s9281_s22 = smov (!%p618_p3, %s5738_s22), 1  ;;  %6883 = vmatpush3.bf16.msra.mxu0 %v7517_v0  ;;  %v7535_v18 = vld [vmem:[%s9266_s21 + $0x8] sm:$0xff]  }
  0x13   : > { %6884 = vmatprep.subr.bf16.mxu0 %v7518_v1  ;;  %s6287_s26 = sshll.u32 %s9281_s22, 7  ;;  %6918 = vmatprep.subr.bf16.mxu1 %v7535_v18  ;;  %v7538_v19 = vld [vmem:[%s9267_s25 + $0x4] ss:$8 sps:$4 sm:$0xff]   ;;  %v7929_v20 = vld [vmem:[%s9268_s27] ss:$0 sm:$0xff] }
  0x14   : > { %s7886_s29 = scalar_lea.vmem %s9265_s4, %s6287_s26  ;;  %6919 = vmatpush3.bf16.msra.mxu1 %v7535_v18  ;;  %s625_s26 = scalar_lea.vmem %s9255_s20, %s9281_s22 }
  0x15   : > { %v7519_v2 = vld [vmem:[%s7886_s29] sm:$0xff]   ;;  %v7520_v3 = vld [vmem:[%s7886_s29 + $0x8] sm:$0xff]   ;;  %v7521_v4 = vld [vmem:[%s7886_s29 + $0x10] sm:$0xff]  }
  0x16   : > { %6885 = vmatpush3.bf16.msra.mxu0 %v7518_v1  ;;  %6886 = vmatprep.mubr.msk.bf16.mxu0 %vm762_vm0, %v7519_v2  ;;  %v7522_v5 = vld [vmem:[%s7886_s29 + $0x18] sm:$0xff]   ;;  %v7523_v6 = vld [vmem:[%s7886_s29 + $0x20] sm:$0xff]   ;;  %v7524_v7 = vld [vmem:[%s7886_s29 + $0x28] sm:$0xff]  }
  0x17   : > { %v7525_v8 = vld [vmem:[%s7886_s29 + $0x30] sm:$0xff]   ;;  %v7526_v9 = vld [vmem:[%s7886_s29 + $0x38] sm:$0xff]   ;;  %v7527_v10 = vld [vmem:[%s7886_s29 + $0x40] sm:$0xff]  }
  0x18   : > { %v7528_v11 = vld [vmem:[%s7886_s29 + $0x48] sm:$0xff]   ;;  %v7529_v12 = vld [vmem:[%s7886_s29 + $0x50] sm:$0xff]   ;;  %v7530_v13 = vld [vmem:[%s7886_s29 + $0x58] sm:$0xff]  }
  0x19   : > { %6887 = vmatmul.mubr.msk.bf16.vlgmr.msra.gmra.mrb[0].mxu0 %vm762_vm0, %v7520_v3  ;;  %v7531_v14 = vld [vmem:[%s7886_s29 + $0x60] sm:$0xff]   ;;  %v7532_v15 = vld [vmem:[%s7886_s29 + $0x68] sm:$0xff]   ;;  %v7533_v16 = vld [vmem:[%s7886_s29 + $0x70] sm:$0xff]  }
  0x1a   : > { %6890 = vmatprep.mubr.msk.bf16.mxu0 %vm762_vm0, %v7521_v4  ;;  %v7534_v17 = vld [vmem:[%s7886_s29 + $0x78] sm:$0xff]  }
  0x21   : > { %6891 = vmatmul.mubr.msk.bf16.gmra.mrb[4].mxu0 %vm762_vm0, %v7522_v5 }
  0x22   : > { %6894 = vmatprep.mubr.msk.bf16.mxu0 %vm762_vm0, %v7523_v6 }
  0x29   : > { %6895 = vmatmul.mubr.msk.bf16.gmra.mrb[8].mxu0 %vm762_vm0, %v7524_v7 }
  0x2a   : > { %6898 = vmatprep.mubr.msk.bf16.mxu0 %vm762_vm0, %v7525_v8 }
  0x31   : > { %6899 = vmatmul.mubr.msk.bf16.gmra.mrb[12].mxu0 %vm762_vm0, %v7526_v9 }
  0x32   : > { %6902 = vmatprep.mubr.msk.bf16.mxu0 %vm762_vm0, %v7527_v10 }
  0x39   : > { %6903 = vmatmul.mubr.msk.bf16.gmra.mrb[16].mxu0 %vm762_vm0, %v7528_v11 }
  0x3a   : > { %6906 = vmatprep.mubr.msk.bf16.mxu0 %vm762_vm0, %v7529_v12 }
  0x41   : > { %6907 = vmatmul.mubr.msk.bf16.gmra.mrb[20].mxu0 %vm762_vm0, %v7530_v13 }
  0x42   : > { %6910 = vmatprep.mubr.msk.bf16.mxu0 %vm762_vm0, %v7531_v14 }
  0x49   : > { %6911 = vmatmul.mubr.msk.bf16.gmra.mrb[24].mxu0 %vm762_vm0, %v7532_v15 }
  0x4a   : > { %6914 = vmatprep.mubr.msk.bf16.mxu0 %vm762_vm0, %v7533_v16 }
  0x51   : > { %6915 = vmatmul.mubr.msk.bf16.gmra.mrb[28].mxu0 %vm762_vm0, %v7534_v17 }
  0x52   : > { %1164 = vmatprep.mubr.bf16.mxu0 %v7538_v19 }
  0xec   : > { %v6888_v21 = vpop.f32.mrb[0].mxu0 }
  0xed   : > { %v854_v22 = vadd.f32 %v6888_v21, %v7929_v20  ;;  %v845_v23 = vpop.f32.mrb[1].mxu0 }
  0xee   : > { %v846_v24 = vadd.f32 %v7929_v20, %v845_v23  ;;  %v6889_v25 = vpop.f32.mrb[2].mxu0 }
  0xef   : > { %v1006_v26 = vmul.f32 0.2, %v854_v22  ;;  %v857_v27 = vadd.f32 %v6889_v25, %v7929_v20  ;;  %v848_v28 = vpop.f32.mrb[3].mxu0  ;;  %vm974_vm1 = vcmp.ge.f32.partialorder %v854_v22, 0.0 }
  0xf0   : > { %v1004_v29 = vmul.f32 0.2, %v846_v24  ;;  %v849_v30 = vadd.f32 %v7929_v20, %v848_v28  ;;  %vm972_vm2 = vcmp.ge.f32.partialorder %v846_v24, 0.0 }
  0xf1   : > { %vm975_vm3 = vcmp.ge.f32.partialorder %v857_v27, 0.0  ;;  %v1007_v31 = vmul.f32 0.2, %v857_v27  ;;  %v1038_v33 = vsel %vm974_vm1, %v854_v22, %v1006_v26 }
  0xf2   : > { %vm973_vm4 = vcmp.ge.f32.partialorder %v849_v30, 0.0  ;;  %v1005_v32 = vmul.f32 0.2, %v849_v30  ;;  %v1036_v35 = vsel %vm972_vm2, %v846_v24, %v1004_v29 }
  0xf3   : > { %v1039_v34 = vsel %vm975_vm3, %v857_v27, %v1007_v31 }
  0xf4   : > { %v7935_v36 = vpack.c.bf16 %v1039_v34, %v1038_v33  ;;  %v1037_v37 = vsel %vm973_vm4, %v849_v30, %v1005_v32  ;;  %v6892_v38 = vpop.f32.mrb[4].mxu0 }
  0xf5   : > { %v7937_v39 = vpack.c.bf16 %v1037_v37, %v1036_v35  ;;  %v870_v40 = vadd.f32 %v6892_v38, %v7929_v20  ;;  %v861_v41 = vpop.f32.mrb[5].mxu0 }
  0xf6   : > { %v862_v42 = vadd.f32 %v7929_v20, %v861_v41  ;;  %v6893_v43 = vpop.f32.mrb[6].mxu0 }
  0xf7   : > { %v1010_v44 = vmul.f32 0.2, %v870_v40  ;;  %v873_v45 = vadd.f32 %v6893_v43, %v7929_v20  ;;  %v864_v46 = vpop.f32.mrb[7].mxu0  ;;  %vm978_vm5 = vcmp.ge.f32.partialorder %v870_v40, 0.0 }
  0xf8   : > { %v1008_v47 = vmul.f32 0.2, %v862_v42  ;;  %v865_v48 = vadd.f32 %v7929_v20, %v864_v46  ;;  %vm976_vm6 = vcmp.ge.f32.partialorder %v862_v42, 0.0 }
  0xf9   : > { %vm979_vm7 = vcmp.ge.f32.partialorder %v873_v45, 0.0  ;;  %v1011_v49 = vmul.f32 0.2, %v873_v45  ;;  %v1042_v51 = vsel %vm978_vm5, %v870_v40, %v1010_v44 }
  0xfa   : > { %vm977_vm8 = vcmp.ge.f32.partialorder %v865_v48, 0.0  ;;  %v1009_v50 = vmul.f32 0.2, %v865_v48  ;;  %v1040_v53 = vsel %vm976_vm6, %v862_v42, %v1008_v47 }
  0xfb   : > { %v1043_v52 = vsel %vm979_vm7, %v873_v45, %v1011_v49 }
  0xfc   : > { %v7943_v54 = vpack.c.bf16 %v1043_v52, %v1042_v51  ;;  %v1041_v55 = vsel %vm977_vm8, %v865_v48, %v1009_v50  ;;  %v6896_v56 = vpop.f32.mrb[8].mxu0 }
  0xfd   : > { %v7945_v57 = vpack.c.bf16 %v1041_v55, %v1040_v53  ;;  %v886_v58 = vadd.f32 %v6896_v56, %v7929_v20  ;;  %v877_v59 = vpop.f32.mrb[9].mxu0 }
  0xfe   : > { %v878_v60 = vadd.f32 %v7929_v20, %v877_v59  ;;  %v6897_v61 = vpop.f32.mrb[10].mxu0 }
  0xff   : > { %v1014_v62 = vmul.f32 0.2, %v886_v58  ;;  %v889_v63 = vadd.f32 %v6897_v61, %v7929_v20  ;;  %v880_v0 = vpop.f32.mrb[11].mxu0  ;;  %vm982_vm9 = vcmp.ge.f32.partialorder %v886_v58, 0.0 }
 0x100   : > { %v1012_v1 = vmul.f32 0.2, %v878_v60  ;;  %v881_v2 = vadd.f32 %v7929_v20, %v880_v0  ;;  %vm980_vm10 = vcmp.ge.f32.partialorder %v878_v60, 0.0 }
 0x101   : > { %vm983_vm11 = vcmp.ge.f32.partialorder %v889_v63, 0.0  ;;  %v1015_v3 = vmul.f32 0.2, %v889_v63  ;;  %v1046_v5 = vsel %vm982_vm9, %v886_v58, %v1014_v62 }
 0x102   : > { %vm981_vm12 = vcmp.ge.f32.partialorder %v881_v2, 0.0  ;;  %v1013_v4 = vmul.f32 0.2, %v881_v2  ;;  %v1044_v7 = vsel %vm980_vm10, %v878_v60, %v1012_v1 }
 0x103   : > { %v1047_v6 = vsel %vm983_vm11, %v889_v63, %v1015_v3 }
 0x104   : > { %v7951_v8 = vpack.c.bf16 %v1047_v6, %v1046_v5  ;;  %v1045_v9 = vsel %vm981_vm12, %v881_v2, %v1013_v4  ;;  %v6900_v10 = vpop.f32.mrb[12].mxu0 }
 0x105   : > { %v7953_v11 = vpack.c.bf16 %v1045_v9, %v1044_v7  ;;  %v902_v12 = vadd.f32 %v6900_v10, %v7929_v20  ;;  %v893_v13 = vpop.f32.mrb[13].mxu0 }
 0x106   : > { %v894_v14 = vadd.f32 %v7929_v20, %v893_v13  ;;  %v6901_v15 = vpop.f32.mrb[14].mxu0 }
 0x107   : > { %v1018_v16 = vmul.f32 0.2, %v902_v12  ;;  %v905_v17 = vadd.f32 %v6901_v15, %v7929_v20  ;;  %v896_v18 = vpop.f32.mrb[15].mxu0  ;;  %vm986_vm13 = vcmp.ge.f32.partialorder %v902_v12, 0.0 }
 0x108   : > { %v1016_v19 = vmul.f32 0.2, %v894_v14  ;;  %v897_v21 = vadd.f32 %v7929_v20, %v896_v18  ;;  %vm984_vm14 = vcmp.ge.f32.partialorder %v894_v14, 0.0 }
 0x109   : > { %vm987_vm15 = vcmp.ge.f32.partialorder %v905_v17, 0.0  ;;  %v1019_v22 = vmul.f32 0.2, %v905_v17  ;;  %v1050_v24 = vsel %vm986_vm13, %v902_v12, %v1018_v16 }
 0x10a   : > { %vm985_vm1 = vcmp.ge.f32.partialorder %v897_v21, 0.0  ;;  %v1017_v23 = vmul.f32 0.2, %v897_v21  ;;  %v1048_v26 = vsel %vm984_vm14, %v894_v14, %v1016_v19 }
 0x10b   : > { %v1051_v25 = vsel %vm987_vm15, %v905_v17, %v1019_v22 }
 0x10c   : > { %v7959_v27 = vpack.c.bf16 %v1051_v25, %v1050_v24  ;;  %v1049_v28 = vsel %vm985_vm1, %v897_v21, %v1017_v23  ;;  %v6904_v29 = vpop.f32.mrb[16].mxu0 }
 0x10d   : > { %v7961_v30 = vpack.c.bf16 %v1049_v28, %v1048_v26  ;;  %v918_v31 = vadd.f32 %v6904_v29, %v7929_v20  ;;  %v909_v32 = vpop.f32.mrb[17].mxu0 }
 0x10e   : > { %v910_v33 = vadd.f32 %v7929_v20, %v909_v32  ;;  %v6905_v34 = vpop.f32.mrb[18].mxu0 }
 0x10f   : > { %v1022_v35 = vmul.f32 0.2, %v918_v31  ;;  %v921_v37 = vadd.f32 %v6905_v34, %v7929_v20  ;;  %v912_v38 = vpop.f32.mrb[19].mxu0  ;;  %vm990_vm2 = vcmp.ge.f32.partialorder %v918_v31, 0.0 }
 0x110   : > { %v1020_v40 = vmul.f32 0.2, %v910_v33  ;;  %v913_v41 = vadd.f32 %v7929_v20, %v912_v38  ;;  %vm988_vm3 = vcmp.ge.f32.partialorder %v910_v33, 0.0 }
 0x111   : > { %vm991_vm4 = vcmp.ge.f32.partialorder %v921_v37, 0.0  ;;  %v1023_v42 = vmul.f32 0.2, %v921_v37  ;;  %v1054_v44 = vsel %vm990_vm2, %v918_v31, %v1022_v35 }
 0x112   : > { %vm989_vm5 = vcmp.ge.f32.partialorder %v913_v41, 0.0  ;;  %v1021_v43 = vmul.f32 0.2, %v913_v41  ;;  %v1052_v46 = vsel %vm988_vm3, %v910_v33, %v1020_v40  ;;  %vm1330_vm3 = vcmask 130048  }
 0x113   : > { %v1055_v45 = vsel %vm991_vm4, %v921_v37, %v1023_v42  ;;  %vm7760_vm4 = vmmov 0  }
 0x114   : > { %v7967_v47 = vpack.c.bf16 %v1055_v45, %v1054_v44  ;;  %v1053_v48 = vsel %vm989_vm5, %v913_v41, %v1021_v43  ;;  %v6908_v49 = vpop.f32.mrb[20].mxu0 }
 0x115   : > { %v7969_v50 = vpack.c.bf16 %v1053_v48, %v1052_v46  ;;  %v934_v51 = vadd.f32 %v6908_v49, %v7929_v20  ;;  %v925_v52 = vpop.f32.mrb[21].mxu0 }
 0x116   : > { %v926_v53 = vadd.f32 %v7929_v20, %v925_v52  ;;  %v6909_v55 = vpop.f32.mrb[22].mxu0  ;;  %v7541_v52 = vld [vmem:[%s9267_s25 + $0x10] ss:$8 sps:$4 sm:$0xff]  }
 0x117   : > { %v1026_v56 = vmul.f32 0.2, %v934_v51  ;;  %v937_v58 = vadd.f32 %v6909_v55, %v7929_v20  ;;  %v928_v59 = vpop.f32.mrb[23].mxu0  ;;  %6306 = vmatprep.subr.bf16.mxu0 %v7969_v50  ;;  %6396 = vmatprep.subr.bf16.mxu1 %v7969_v50  ;;  %vm994_vm6 = vcmp.ge.f32.partialorder %v934_v51, 0.0  ;;  %v7544_v55 = vld [vmem:[%s9267_s25 + $0x20] ss:$8 sps:$4 sm:$0xff]  }
 0x118   : > { %v1024_v60 = vmul.f32 0.2, %v926_v53  ;;  %v929_v61 = vadd.f32 %v7929_v20, %v928_v59  ;;  %6307 = vmatpush3.bf16.msra.mxu0 %v7937_v39  ;;  %vm992_vm7 = vcmp.ge.f32.partialorder %v926_v53, 0.0  ;;  %v7550_v59 = vld [vmem:[%s9267_s25 + $0x44] ss:$8 sps:$4 sm:$0xff]  }
 0x119   : > { %vm995_vm8 = vcmp.ge.f32.partialorder %v937_v58, 0.0  ;;  %v1027_v62 = vmul.f32 0.2, %v937_v58  ;;  %6308 = vmatprep.subr.bf16.mxu0 %v7967_v47  ;;  %v1058_v0 = vsel %vm994_vm6, %v934_v51, %v1026_v56  ;;  %v7539_v51 = vld [vmem:[%s9267_s25 + $0x14] ss:$8 sps:$4 sm:$0xff]  }
 0x11a   : > { %vm993_vm9 = vcmp.ge.f32.partialorder %v929_v61, 0.0  ;;  %v1025_v63 = vmul.f32 0.2, %v929_v61  ;;  %v1056_v2 = vsel %vm992_vm7, %v926_v53, %v1024_v60  ;;  %v7542_v53 = vld [vmem:[%s9267_s25 + $0x24] ss:$8 sps:$4 sm:$0xff]  }
 0x11b   : > { %v1059_v1 = vsel %vm995_vm8, %v937_v58, %v1027_v62  ;;  %v7545_v56 = vld [vmem:[%s9267_s25 + $0x34] ss:$8 sps:$4 sm:$0xff]   ;;  %v7547_v58 = vld [vmem:[%s9267_s25 + $0x30] ss:$8 sps:$4 sm:$0xff]   ;;  %v7548_v60 = vld [vmem:[%s9267_s25 + $0x40] ss:$8 sps:$4 sm:$0xff]  }
 0x11c   : > { %v7979_v3 = vpack.c.bf16 %v1059_v1, %v1058_v0  ;;  %v1057_v4 = vsel %vm993_vm9, %v929_v61, %v1025_v63  ;;  %v6912_v5 = vpop.f32.mrb[24].mxu0  ;;  %6309 = vmatpush3.bf16.msra.mxu0 %v7935_v36  ;;  %v7551_v61 = vld [vmem:[%s9267_s25 + $0x54] ss:$8 sps:$4 sm:$0xff]   ;;  %v7553_v62 = vld [vmem:[%s9267_s25 + $0x50] ss:$8 sps:$4 sm:$0xff]  }
 0x11d   : > { %v7982_v6 = vpack.c.bf16 %v1057_v4, %v1056_v2  ;;  %v950_v7 = vadd.f32 %v6912_v5, %v7929_v20  ;;  %v941_v9 = vpop.f32.mrb[25].mxu0  ;;  %v7554_v63 = vld [vmem:[%s9267_s25 + $0x64] ss:$8 sps:$4 sm:$0xff]   ;;  %v7556_v0 = vld [vmem:[%s9267_s25 + $0x60] ss:$8 sps:$4 sm:$0xff]  }
 0x11e   : > { %v942_v10 = vadd.f32 %v7929_v20, %v941_v9  ;;  %v6913_v12 = vpop.f32.mrb[26].mxu0  ;;  %v7557_v1 = vld [vmem:[%s9267_s25 + $0x74] ss:$8 sps:$4 sm:$0xff]   ;;  %v7559_v2 = vld [vmem:[%s9267_s25 + $0x70] ss:$8 sps:$4 sm:$0xff]   ;;  %v7560_v4 = vld [vmem:[%s9266_s21] sm:$0xff]  }
 0x11f   : > { %v1030_v13 = vmul.f32 0.2, %v950_v7  ;;  %v953_v14 = vadd.f32 %v6913_v12, %v7929_v20  ;;  %v944_v15 = vpop.f32.mrb[27].mxu0  ;;  %6310 = vmatprep.subr.bf16.mxu0 %v7982_v6  ;;  %vm998_vm10 = vcmp.ge.f32.partialorder %v950_v7, 0.0 }
 0x120   : > { %v1028_v16 = vmul.f32 0.2, %v942_v10  ;;  %v945_v17 = vadd.f32 %v7929_v20, %v944_v15  ;;  %6311 = vmatpush3.bf16.msra.mxu0 %v7945_v57  ;;  %vm996_vm11 = vcmp.ge.f32.partialorder %v942_v10, 0.0 }
 0x121   : > { %vm999_vm12 = vcmp.ge.f32.partialorder %v953_v14, 0.0  ;;  %v1031_v18 = vmul.f32 0.2, %v953_v14  ;;  %6312 = vmatprep.subr.bf16.mxu0 %v7979_v3  ;;  %v1062_v21 = vsel %vm998_vm10, %v950_v7, %v1030_v13 }
 0x122   : > { %vm997_vm13 = vcmp.ge.f32.partialorder %v945_v17, 0.0  ;;  %v1029_v19 = vmul.f32 0.2, %v945_v17  ;;  %v1060_v23 = vsel %vm996_vm11, %v942_v10, %v1028_v16 }
 0x123   : > { %v1063_v22 = vsel %vm999_vm12, %v953_v14, %v1031_v18 }
 0x124   : > { %v7991_v24 = vpack.c.bf16 %v1063_v22, %v1062_v21  ;;  %v1061_v25 = vsel %vm997_vm13, %v945_v17, %v1029_v19  ;;  %v6916_v26 = vpop.f32.mrb[28].mxu0  ;;  %6313 = vmatpush3.bf16.msra.mxu0 %v7943_v54  ;;  %vm3055_vm13 = vcmask 523264  }
 0x125   : > { %v7994_v28 = vpack.c.bf16 %v1061_v25, %v1060_v23  ;;  %v966_v29 = vadd.f32 %v6916_v26, %v7929_v20  ;;  %v957_v31 = vpop.f32.mrb[29].mxu0 }
 0x126   : > { %v958_v32 = vadd.f32 %v7929_v20, %v957_v31  ;;  %v6917_v33 = vpop.f32.mrb[30].mxu0 }
 0x127   : > { %v1034_v34 = vmul.f32 0.2, %v966_v29  ;;  %v969_v35 = vadd.f32 %v6917_v33, %v7929_v20  ;;  %v960_v37 = vpop.f32.mrb[31].mxu0  ;;  %6314 = vmatprep.subr.bf16.mxu0 %v7994_v28  ;;  %vm1002_vm14 = vcmp.ge.f32.partialorder %v966_v29, 0.0 }
 0x128   : > { %v1032_v38 = vmul.f32 0.2, %v958_v32  ;;  %v961_v40 = vadd.f32 %v7929_v20, %v960_v37  ;;  %6315 = vmatpush3.bf16.msra.mxu0 %v7953_v11  ;;  %vm1000_vm15 = vcmp.ge.f32.partialorder %v958_v32, 0.0  ;;  %v7536_v20 = vld [vmem:[%s9267_s25] ss:$8 sps:$4 sm:$0xff]  }
 0x129   : > { %vm1003_vm1 = vcmp.ge.f32.partialorder %v969_v35, 0.0  ;;  %v1035_v41 = vmul.f32 0.2, %v969_v35  ;;  %6316 = vmatprep.subr.bf16.mxu0 %v7991_v24  ;;  %v1066_v43 = vsel %vm1002_vm14, %v966_v29, %v1034_v34 }
 0x12a   : > { %vm1001_vm2 = vcmp.ge.f32.partialorder %v961_v40, 0.0  ;;  %v1033_v42 = vmul.f32 0.2, %v961_v40  ;;  %v1064_v45 = vsel %vm1000_vm15, %v958_v32, %v1032_v38 }
 0x12b   : > { %v1067_v44 = vsel %vm1003_vm1, %v969_v35, %v1035_v41 }
 0x12c   : > { %v8003_v46 = vpack.c.bf16 %v1067_v44, %v1066_v43  ;;  %v1065_v48 = vsel %vm1001_vm2, %v961_v40, %v1033_v42  ;;  %6317 = vmatpush3.bf16.msra.mxu0 %v7951_v8 }
 0x12d   : > { %v8006_v49 = vpack.c.bf16 %v1065_v48, %v1064_v45 }
 0x12f   : > { %6318 = vmatprep.subr.bf16.mxu0 %v8006_v49 }
 0x130   : > { %6319 = vmatpush3.bf16.msra.mxu0 %v7961_v30 }
 0x131   : > { %6320 = vmatprep.subr.bf16.mxu0 %v8003_v46 }
 0x134   : > { %6321 = vmatpush3.bf16.msra.mxu0 %v7959_v27 }
 0x135   : > { %6346 = vmatprep.subr.bf16.mxu0 %v7969_v50 }
 0x137   : > { %1165 = vmatmul.mubr.bf16.vlgmr.msra.gmra.mrb[32].mxu0 %v7536_v20 }
 0x138   : > { %6347 = vmatpush3.bf16.msra.mxu0 %v7937_v39  ;;  %1172 = vmatprep.mubr.bf16.mxu0 %v7539_v51 }
 0x139   : > { %6348 = vmatprep.subr.bf16.mxu0 %v7967_v47 }
 0x13c   : > { %6349 = vmatpush3.bf16.msra.mxu0 %v7935_v36 }
 0x13d   : > { %6350 = vmatprep.subr.bf16.mxu0 %v7982_v6 }
 0x13f   : > { %1173 = vmatmul.mubr.bf16.gmra.mrb[36].mxu0 %v7541_v52 }
 0x140   : > { %6351 = vmatpush3.bf16.msra.mxu0 %v7945_v57  ;;  %1180 = vmatprep.mubr.bf16.mxu0 %v7542_v53 }
 0x141   : > { %6352 = vmatprep.subr.bf16.mxu0 %v7979_v3 }
 0x144   : > { %6353 = vmatpush3.bf16.msra.mxu0 %v7943_v54 }
 0x145   : > { %6354 = vmatprep.subr.bf16.mxu0 %v7994_v28 }
 0x147   : > { %1181 = vmatmul.mubr.bf16.gmra.mrb[40].mxu0 %v7544_v55 }
 0x148   : > { %6355 = vmatpush3.bf16.msra.mxu0 %v7953_v11  ;;  %1188 = vmatprep.mubr.bf16.mxu0 %v7545_v56 }
 0x149   : > { %6356 = vmatprep.subr.bf16.mxu0 %v7991_v24 }
 0x14c   : > { %6357 = vmatpush3.bf16.msra.mxu0 %v7951_v8 }
 0x14d   : > { %6358 = vmatprep.subr.bf16.mxu0 %v8006_v49 }
 0x14f   : > { %1189 = vmatmul.mubr.bf16.gmra.mrb[44].mxu0 %v7547_v58 }
 0x150   : > { %6359 = vmatpush3.bf16.msra.mxu0 %v7961_v30  ;;  %1284 = vmatprep.mubr.bf16.mxu0 %v7550_v59 }
 0x151   : > { %6360 = vmatprep.subr.bf16.mxu0 %v8003_v46 }
 0x154   : > { %6361 = vmatpush3.bf16.msra.mxu0 %v7959_v27 }
 0x155   : > { %6928 = vmatprep.subr.bf16.mxu0 %v7560_v4 }
 0x157   : > { %1285 = vmatmul.mubr.bf16.vlgmr.msra.gmra.mrb[48].mxu0 %v7548_v60 }
 0x158   : > { %1292 = vmatprep.mubr.bf16.mxu0 %v7551_v61  ;;  %6929 = vmatpush3.bf16.msra.mxu0 %v7560_v4 }
 0x15f   : > { %1293 = vmatmul.mubr.bf16.gmra.mrb[52].mxu0 %v7553_v62 }
 0x160   : > { %1300 = vmatprep.mubr.bf16.mxu0 %v7554_v63 }
 0x167   : > { %1301 = vmatmul.mubr.bf16.gmra.mrb[56].mxu0 %v7556_v0 }
 0x168   : > { %1308 = vmatprep.mubr.bf16.mxu0 %v7557_v1 }
 0x16f   : > { %1309 = vmatmul.mubr.bf16.gmra.mrb[60].mxu0 %v7559_v2 }
 0x20a   : > { %v6322_v5 = vpop.f32.mrb[32].mxu0 }
 0x20b   : > { %v6323_v7 = vpop.f32.mrb[33].mxu0 }
 0x20c   : > { %v6324_v9 = vadd.f32 %v6323_v7, %v6322_v5  ;;  %v6325_v10 = vpop.f32.mrb[34].mxu0 }
 0x20d   : > { %v6326_v12 = vpop.f32.mrb[35].mxu0 }
 0x20e   : > { %v6327_v13 = vadd.f32 %v6326_v12, %v6325_v10 }
 0x210   : > { %v1197_v14 = vpack.c.bf16 %v6327_v13, %v6324_v9 }
 0x212   : > { %v6328_v15 = vpop.f32.mrb[36].mxu0  ;;  %6930 = vmatprep.mubr.msk.bf16.mxu0 %vm1330_vm3, %v1197_v14 }
 0x213   : > { %v6329_v16 = vpop.f32.mrb[37].mxu0 }
 0x214   : > { %v6330_v17 = vadd.f32 %v6329_v16, %v6328_v15  ;;  %v6331_v18 = vpop.f32.mrb[38].mxu0  ;;  %v7563_v15 = vld [vmem:[%s9267_s25 + $0x84] ss:$8 sps:$4 sm:$0xff]  }
 0x215   : > { %v6332_v19 = vpop.f32.mrb[39].mxu0 }
 0x216   : > { %v6333_v21 = vadd.f32 %v6332_v19, %v6331_v18  ;;  %v7564_v18 = vld [vmem:[%s9267_s25 + $0x94] ss:$8 sps:$4 sm:$0xff]   ;;  %v7566_v19 = vld [vmem:[%s9267_s25 + $0x90] ss:$8 sps:$4 sm:$0xff]  }
 0x218   : > { %v1198_v22 = vpack.c.bf16 %v6333_v21, %v6330_v17  ;;  %v7561_v17 = vld [vmem:[%s9267_s25 + $0x80] ss:$8 sps:$4 sm:$0xff]   ;;  %v7567_v21 = vld [vmem:[%s9267_s25 + $0xa4] ss:$8 sps:$4 sm:$0xff]  }
 0x21a   : > { %v6334_v23 = vpop.f32.mrb[40].mxu0  ;;  %6931 = vmatmul.mubr.msk.bf16.vlgmr.msra.gmra.mrb[64].mxu0 %vm1330_vm3, %v1198_v22  ;;  %v7569_v22 = vld [vmem:[%s9267_s25 + $0xa0] ss:$8 sps:$4 sm:$0xff]  }
 0x21b   : > { %v6335_v25 = vpop.f32.mrb[41].mxu0 }
 0x21c   : > { %v6336_v26 = vadd.f32 %v6335_v25, %v6334_v23  ;;  %v6337_v29 = vpop.f32.mrb[42].mxu0  ;;  %v7570_v23 = vld [vmem:[%s9267_s25 + $0xb4] ss:$8 sps:$4 sm:$0xff]   ;;  %v7572_v25 = vld [vmem:[%s9267_s25 + $0xb0] ss:$8 sps:$4 sm:$0xff]  }
 0x21d   : > { %v6338_v31 = vpop.f32.mrb[43].mxu0 }
 0x21e   : > { %v6339_v32 = vadd.f32 %v6338_v31, %v6337_v29  ;;  %v7573_v29 = vld [vmem:[%s9267_s25 + $0xc0] ss:$8 sps:$4 sm:$0xff]   ;;  %v7576_v31 = vld [vmem:[%s9267_s25 + $0xd4] ss:$8 sps:$4 sm:$0xff]  }
 0x220   : > { %v1199_v33 = vpack.c.bf16 %v6339_v32, %v6336_v26  ;;  %v7575_v26 = vld [vmem:[%s9267_s25 + $0xc4] ss:$8 sps:$4 sm:$0xff]   ;;  %v7578_v32 = vld [vmem:[%s9267_s25 + $0xd0] ss:$8 sps:$4 sm:$0xff]  }
 0x222   : > { %v6340_v34 = vpop.f32.mrb[44].mxu0  ;;  %6934 = vmatprep.mubr.msk.bf16.mxu0 %vm1330_vm3, %v1199_v33  ;;  %v7579_v33 = vld [vmem:[%s9267_s25 + $0xe4] ss:$8 sps:$4 sm:$0xff]  }
 0x223   : > { %v6341_v35 = vpop.f32.mrb[45].mxu0 }
 0x224   : > { %v6342_v37 = vadd.f32 %v6341_v35, %v6340_v34  ;;  %v6343_v38 = vpop.f32.mrb[46].mxu0  ;;  %v7581_v34 = vld [vmem:[%s9267_s25 + $0xe0] ss:$8 sps:$4 sm:$0xff]   ;;  %v7582_v35 = vld [vmem:[%s9267_s25 + $0xf4] ss:$8 sps:$4 sm:$0xff]  }
 0x225   : > { %v6344_v40 = vpop.f32.mrb[47].mxu0 }
 0x226   : > { %v6345_v41 = vadd.f32 %v6344_v40, %v6343_v38  ;;  %v7587_v38 = vld [vmem:[%s9267_s25 + $0x144] ss:$8 sps:$4 sm:$0xff]   ;;  %v7585_v40 = vld [vmem:[%s9267_s25 + $0x140] ss:$8 sps:$4 sm:$0xff]  }
 0x228   : > { %v1200_v42 = vpack.c.bf16 %v6345_v41, %v6342_v37  ;;  %v7584_v37 = vld [vmem:[%s9267_s25 + $0xf0] ss:$8 sps:$4 sm:$0xff]   ;;  %v7588_v41 = vld [vmem:[%s9267_s25 + $0x154] ss:$8 sps:$4 sm:$0xff]  }
 0x22a   : > { %v6362_v43 = vpop.f32.mrb[48].mxu0  ;;  %6935 = vmatmul.mubr.msk.bf16.gmra.mrb[68].mxu0 %vm1330_vm3, %v1200_v42  ;;  %v7590_v42 = vld [vmem:[%s9267_s25 + $0x150] ss:$8 sps:$4 sm:$0xff]  }
 0x22b   : > { %v6363_v44 = vpop.f32.mrb[49].mxu0 }
 0x22c   : > { %v6364_v45 = vadd.f32 %v6363_v44, %v6362_v43  ;;  %v6365_v48 = vpop.f32.mrb[50].mxu0  ;;  %v7591_v43 = vld [vmem:[%s9267_s25 + $0x164] ss:$8 sps:$4 sm:$0xff]   ;;  %v7593_v44 = vld [vmem:[%s9267_s25 + $0x160] ss:$8 sps:$4 sm:$0xff]  }
 0x22d   : > { %v6366_v20 = vpop.f32.mrb[51].mxu0 }
 0x22e   : > { %v6367_v51 = vadd.f32 %v6366_v20, %v6365_v48  ;;  %v7596_v48 = vld [vmem:[%s9267_s25 + $0x170] ss:$8 sps:$4 sm:$0xff]   ;;  %v7599_v20 = vld [vmem:[%s9267_s25 + $0x184] ss:$8 sps:$4 sm:$0xff]  }
 0x230   : > { %v1317_v52 = vpack.c.bf16 %v6367_v51, %v6364_v45  ;;  %v7594_v45 = vld [vmem:[%s9267_s25 + $0x174] ss:$8 sps:$4 sm:$0xff]   ;;  %v7597_v51 = vld [vmem:[%s9267_s25 + $0x180] ss:$8 sps:$4 sm:$0xff]  }
 0x232   : > { %v6368_v53 = vpop.f32.mrb[52].mxu0  ;;  %6920 = vmatprep.mubr.msk.bf16.mxu1 %vm1330_vm3, %v1317_v52  ;;  %v7612_v52 = vld [vmem:[%s9266_s21 + $0x10] sm:$0xff]  }
 0x233   : > { %v6369_v55 = vpop.f32.mrb[53].mxu0  ;;  %6938 = vmatprep.subr.bf16.mxu0 %v7612_v52 }
 0x234   : > { %v6370_v56 = vadd.f32 %v6369_v55, %v6368_v53  ;;  %v6371_v58 = vpop.f32.mrb[54].mxu0  ;;  %v7600_v53 = vld [vmem:[%s9267_s25 + $0x194] ss:$8 sps:$4 sm:$0xff]   ;;  %6939 = vmatpush3.bf16.msra.mxu0 %v7612_v52 }
 0x235   : > { %v6372_v59 = vpop.f32.mrb[55].mxu0  ;;  %v8235_v55 = vld [vmem:[%s9266_s21 + $0x18] sm:$0xff]  }
 0x236   : > { %v6373_v60 = vadd.f32 %v6372_v59, %v6371_v58  ;;  %6948 = vmatprep.subr.bf16.mxu0 %v8235_v55  ;;  %v7603_v58 = vld [vmem:[%s9267_s25 + $0x1a4] ss:$8 sps:$4 sm:$0xff]   ;;  %v7605_v59 = vld [vmem:[%s9267_s25 + $0x1a0] ss:$8 sps:$4 sm:$0xff]  }
 0x238   : > { %v1318_v61 = vpack.c.bf16 %v6373_v60, %v6370_v56  ;;  %v7602_v56 = vld [vmem:[%s9267_s25 + $0x190] ss:$8 sps:$4 sm:$0xff]   ;;  %v7606_v60 = vld [vmem:[%s9267_s25 + $0x1b4] ss:$8 sps:$4 sm:$0xff]  }
 0x23a   : > { %6921 = vmatmul.mubr.msk.bf16.vlgmr.msra.gmra.mrb[0].mxu1 %vm1330_vm3, %v1318_v61  ;;  %v6374_v62 = vpop.f32.mrb[56].mxu0  ;;  %v7608_v61 = vld [vmem:[%s9267_s25 + $0x1b0] ss:$8 sps:$4 sm:$0xff]  }
 0x23b   : > { %6397 = vmatpush3.bf16.msra.mxu1 %v7937_v39  ;;  %v6375_v63 = vpop.f32.mrb[57].mxu0 }
 0x23c   : > { %6398 = vmatprep.subr.bf16.mxu1 %v7967_v47  ;;  %v6376_v0 = vadd.f32 %v6375_v63, %v6374_v62  ;;  %v6377_v1 = vpop.f32.mrb[58].mxu0  ;;  %v7611_v62 = vld [vmem:[%s9267_s25 + $0x1c4] ss:$8 sps:$4 sm:$0xff]   ;;  %v7609_v63 = vld [vmem:[%s9267_s25 + $0x1c0] ss:$8 sps:$4 sm:$0xff]  }
 0x23d   : > { %v6378_v2 = vpop.f32.mrb[59].mxu0 }
 0x23e   : > { %v6379_v4 = vadd.f32 %v6378_v2, %v6377_v1 }
 0x23f   : > { %6399 = vmatpush3.bf16.msra.mxu1 %v7935_v36 }
 0x240   : > { %6400 = vmatprep.subr.bf16.mxu1 %v7982_v6  ;;  %v1319_v5 = vpack.c.bf16 %v6379_v4, %v6376_v0 }
 0x242   : > { %v6380_v7 = vpop.f32.mrb[60].mxu0  ;;  %6924 = vmatprep.mubr.msk.bf16.mxu1 %vm1330_vm3, %v1319_v5  ;;  %v7626_v5 = vld [vmem:[%s9267_s25 + $0x1d4] ss:$8 sps:$4 sm:$0xff]  }
 0x243   : > { %6401 = vmatpush3.bf16.msra.mxu1 %v7945_v57  ;;  %v6381_v9 = vpop.f32.mrb[61].mxu0 }
 0x244   : > { %6402 = vmatprep.subr.bf16.mxu1 %v7979_v3  ;;  %v6382_v10 = vadd.f32 %v6381_v9, %v6380_v7  ;;  %v6383_v12 = vpop.f32.mrb[62].mxu0  ;;  %v7628_v7 = vld [vmem:[%s9267_s25 + $0x1d0] ss:$8 sps:$4 sm:$0xff]   ;;  %v7629_v9 = vld [vmem:[%s9267_s25 + $0x1e4] ss:$8 sps:$4 sm:$0xff]  }
 0x245   : > { %v6384_v13 = vpop.f32.mrb[63].mxu0 }
 0x246   : > { %v6385_v14 = vadd.f32 %v6384_v13, %v6383_v12  ;;  %v7632_v13 = vld [vmem:[%s9267_s25 + $0x1f4] ss:$8 sps:$4 sm:$0xff]  }
 0x247   : > { %6403 = vmatpush3.bf16.msra.mxu1 %v7943_v54 }
 0x248   : > { %6404 = vmatprep.subr.bf16.mxu1 %v7994_v28  ;;  %v1320_v16 = vpack.c.bf16 %v6385_v14, %v6382_v10  ;;  %v7631_v10 = vld [vmem:[%s9267_s25 + $0x1e0] ss:$8 sps:$4 sm:$0xff]  }
 0x24a   : > { %6925 = vmatmul.mubr.msk.bf16.gmra.mrb[4].mxu1 %vm1330_vm3, %v1320_v16 }
 0x24b   : > { %6405 = vmatpush3.bf16.msra.mxu1 %v7953_v11  ;;  %1572 = vmatprep.mubr.bf16.mxu1 %v7563_v15 }
 0x24c   : > { %6406 = vmatprep.subr.bf16.mxu1 %v7991_v24 }
 0x24f   : > { %6407 = vmatpush3.bf16.msra.mxu1 %v7951_v8 }
 0x250   : > { %6408 = vmatprep.subr.bf16.mxu1 %v8006_v49 }
 0x253   : > { %6409 = vmatpush3.bf16.msra.mxu1 %v7961_v30 }
 0x254   : > { %6410 = vmatprep.subr.bf16.mxu1 %v8003_v46 }
 0x257   : > { %6411 = vmatpush3.bf16.msra.mxu1 %v7959_v27 }
 0x258   : > { %6441 = vmatprep.subr.bf16.mxu1 %v7969_v50 }
 0x25a   : > { %1573 = vmatmul.mubr.bf16.vlgmr.msra.gmra.mrb[8].mxu1 %v7561_v17  ;;  %v7634_v17 = vld [vmem:[%s9267_s25 + $0x1f0] ss:$8 sps:$4 sm:$0xff]  }
 0x25b   : > { %6442 = vmatpush3.bf16.msra.mxu1 %v7937_v39  ;;  %1580 = vmatprep.mubr.bf16.mxu1 %v7564_v18  ;;  %v7637_v18 = vld [vmem:[%s9267_s25 + $0x204] ss:$8 sps:$4 sm:$0xff]  }
 0x25c   : > { %6443 = vmatprep.subr.bf16.mxu1 %v7967_v47 }
 0x25f   : > { %6444 = vmatpush3.bf16.msra.mxu1 %v7935_v36 }
 0x260   : > { %6445 = vmatprep.subr.bf16.mxu1 %v7982_v6 }
 0x262   : > { %1581 = vmatmul.mubr.bf16.gmra.mrb[12].mxu1 %v7566_v19  ;;  %v7635_v19 = vld [vmem:[%s9267_s25 + $0x200] ss:$8 sps:$4 sm:$0xff]  }
 0x263   : > { %6446 = vmatpush3.bf16.msra.mxu1 %v7945_v57  ;;  %1588 = vmatprep.mubr.bf16.mxu1 %v7567_v21 }
 0x264   : > { %6447 = vmatprep.subr.bf16.mxu1 %v7979_v3 }
 0x267   : > { %6448 = vmatpush3.bf16.msra.mxu1 %v7943_v54 }
 0x268   : > { %6449 = vmatprep.subr.bf16.mxu1 %v7994_v28 }
 0x26a   : > { %1589 = vmatmul.mubr.bf16.gmra.mrb[16].mxu1 %v7569_v22  ;;  %v7638_v22 = vld [vmem:[%s9267_s25 + $0x214] ss:$8 sps:$4 sm:$0xff]  }
 0x26b   : > { %6450 = vmatpush3.bf16.msra.mxu1 %v7953_v11  ;;  %1596 = vmatprep.mubr.bf16.mxu1 %v7570_v23 }
 0x26c   : > { %6451 = vmatprep.subr.bf16.mxu1 %v7991_v24 }
 0x26f   : > { %6452 = vmatpush3.bf16.msra.mxu1 %v7951_v8 }
 0x270   : > { %6453 = vmatprep.subr.bf16.mxu1 %v8006_v49 }
 0x272   : > { %1597 = vmatmul.mubr.bf16.gmra.mrb[20].mxu1 %v7572_v25 }
 0x273   : > { %6454 = vmatpush3.bf16.msra.mxu1 %v7961_v30  ;;  %1784 = vmatprep.mubr.bf16.mxu1 %v7575_v26 }
 0x274   : > { %6455 = vmatprep.subr.bf16.mxu1 %v8003_v46 }
 0x277   : > { %6456 = vmatpush3.bf16.msra.mxu1 %v7959_v27 }
 0x278   : > { %6531 = vmatprep.subr.bf16.mxu1 %v7969_v50 }
 0x27a   : > { %1785 = vmatmul.mubr.bf16.vlgmr.msra.gmra.mrb[24].mxu1 %v7573_v29 }
 0x27b   : > { %6532 = vmatpush3.bf16.msra.mxu1 %v7937_v39  ;;  %1792 = vmatprep.mubr.bf16.mxu1 %v7576_v31 }
 0x27c   : > { %6533 = vmatprep.subr.bf16.mxu1 %v7967_v47 }
 0x27f   : > { %6534 = vmatpush3.bf16.msra.mxu1 %v7935_v36 }
 0x280   : > { %6535 = vmatprep.subr.bf16.mxu1 %v7982_v6 }
 0x282   : > { %1793 = vmatmul.mubr.bf16.gmra.mrb[28].mxu1 %v7578_v32 }
 0x283   : > { %6536 = vmatpush3.bf16.msra.mxu1 %v7945_v57  ;;  %1800 = vmatprep.mubr.bf16.mxu1 %v7579_v33  ;;  %v7640_v33 = vld [vmem:[%s9267_s25 + $0x210] ss:$8 sps:$4 sm:$0xff]  }
 0x284   : > { %6537 = vmatprep.subr.bf16.mxu1 %v7979_v3 }
 0x287   : > { %6538 = vmatpush3.bf16.msra.mxu1 %v7943_v54 }
 0x288   : > { %6539 = vmatprep.subr.bf16.mxu1 %v7994_v28 }
 0x28a   : > { %1801 = vmatmul.mubr.bf16.gmra.mrb[32].mxu1 %v7581_v34 }
 0x28b   : > { %6540 = vmatpush3.bf16.msra.mxu1 %v7953_v11  ;;  %1808 = vmatprep.mubr.bf16.mxu1 %v7582_v35  ;;  %v7641_v35 = vld [vmem:[%s9267_s25 + $0x224] ss:$8 sps:$4 sm:$0xff]  }
 0x28c   : > { %6541 = vmatprep.subr.bf16.mxu1 %v7991_v24 }
 0x28f   : > { %6542 = vmatpush3.bf16.msra.mxu1 %v7951_v8 }
 0x290   : > { %6543 = vmatprep.subr.bf16.mxu1 %v8006_v49 }
 0x292   : > { %1809 = vmatmul.mubr.bf16.gmra.mrb[36].mxu1 %v7584_v37 }
 0x293   : > { %6544 = vmatpush3.bf16.msra.mxu1 %v7961_v30  ;;  %2208 = vmatprep.mubr.bf16.mxu1 %v7587_v38 }
 0x294   : > { %6545 = vmatprep.subr.bf16.mxu1 %v8003_v46 }
 0x297   : > { %6546 = vmatpush3.bf16.msra.mxu1 %v7959_v27 }
 0x298   : > { %6576 = vmatprep.subr.bf16.mxu1 %v7969_v50 }
 0x29a   : > { %2209 = vmatmul.mubr.bf16.vlgmr.msra.gmra.mrb[40].mxu1 %v7585_v40 }
 0x29b   : > { %6577 = vmatpush3.bf16.msra.mxu1 %v7937_v39  ;;  %2216 = vmatprep.mubr.bf16.mxu1 %v7588_v41 }
 0x29c   : > { %6578 = vmatprep.subr.bf16.mxu1 %v7967_v47 }
 0x29f   : > { %6579 = vmatpush3.bf16.msra.mxu1 %v7935_v36 }
 0x2a0   : > { %6580 = vmatprep.subr.bf16.mxu1 %v7982_v6 }
 0x2a2   : > { %2217 = vmatmul.mubr.bf16.gmra.mrb[44].mxu1 %v7590_v42 }
 0x2a3   : > { %6581 = vmatpush3.bf16.msra.mxu1 %v7945_v57  ;;  %2224 = vmatprep.mubr.bf16.mxu1 %v7591_v43 }
 0x2a4   : > { %6582 = vmatprep.subr.bf16.mxu1 %v7979_v3 }
 0x2a7   : > { %6583 = vmatpush3.bf16.msra.mxu1 %v7943_v54 }
 0x2a8   : > { %6584 = vmatprep.subr.bf16.mxu1 %v7994_v28 }
 0x2aa   : > { %2225 = vmatmul.mubr.bf16.gmra.mrb[48].mxu1 %v7593_v44  ;;  %v7643_v44 = vld [vmem:[%s9267_s25 + $0x220] ss:$8 sps:$4 sm:$0xff]  }
 0x2ab   : > { %6585 = vmatpush3.bf16.msra.mxu1 %v7953_v11  ;;  %2232 = vmatprep.mubr.bf16.mxu1 %v7594_v45 }
 0x2ac   : > { %6586 = vmatprep.subr.bf16.mxu1 %v7991_v24 }
 0x2af   : > { %6587 = vmatpush3.bf16.msra.mxu1 %v7951_v8 }
 0x2b0   : > { %6588 = vmatprep.subr.bf16.mxu1 %v8006_v49 }
 0x2b2   : > { %2233 = vmatmul.mubr.bf16.gmra.mrb[52].mxu1 %v7596_v48  ;;  %v7644_v48 = vld [vmem:[%s9267_s25 + $0x234] ss:$8 sps:$4 sm:$0xff]  }
 0x2b3   : > { %6589 = vmatpush3.bf16.msra.mxu1 %v7961_v30  ;;  %2420 = vmatprep.mubr.bf16.mxu1 %v7599_v20 }
 0x2b4   : > { %6590 = vmatprep.subr.bf16.mxu1 %v8003_v46 }
 0x2b7   : > { %6591 = vmatpush3.bf16.msra.mxu1 %v7959_v27 }
 0x2b8   : > { %6621 = vmatprep.subr.bf16.mxu1 %v7969_v50 }
 0x2ba   : > { %2421 = vmatmul.mubr.bf16.vlgmr.msra.gmra.mrb[56].mxu1 %v7597_v51 }
 0x2bb   : > { %6622 = vmatpush3.bf16.msra.mxu1 %v7937_v39  ;;  %2428 = vmatprep.mubr.bf16.mxu1 %v7600_v53 }
 0x2bc   : > { %6623 = vmatprep.subr.bf16.mxu1 %v7967_v47 }
 0x2bf   : > { %6624 = vmatpush3.bf16.msra.mxu1 %v7935_v36 }
 0x2c0   : > { %6625 = vmatprep.subr.bf16.mxu1 %v7982_v6 }
 0x2c2   : > { %2429 = vmatmul.mubr.bf16.gmra.mrb[60].mxu1 %v7602_v56 }
 0x2c3   : > { %6626 = vmatpush3.bf16.msra.mxu1 %v7945_v57  ;;  %2436 = vmatprep.mubr.bf16.mxu1 %v7603_v58 }
 0x2c4   : > { %6627 = vmatprep.subr.bf16.mxu1 %v7979_v3 }
 0x2c7   : > { %6628 = vmatpush3.bf16.msra.mxu1 %v7943_v54 }
 0x2c8   : > { %6629 = vmatprep.subr.bf16.mxu1 %v7994_v28 }
 0x2ca   : > { %2437 = vmatmul.mubr.bf16.gmra.mrb[64].mxu1 %v7605_v59  ;;  %v7646_v59 = vld [vmem:[%s9267_s25 + $0x230] ss:$8 sps:$4 sm:$0xff]  }
 0x2cb   : > { %6630 = vmatpush3.bf16.msra.mxu1 %v7953_v11  ;;  %2444 = vmatprep.mubr.bf16.mxu1 %v7606_v60 }
 0x2cc   : > { %6631 = vmatprep.subr.bf16.mxu1 %v7991_v24 }
 0x2cf   : > { %6632 = vmatpush3.bf16.msra.mxu1 %v7951_v8 }
 0x2d0   : > { %6633 = vmatprep.subr.bf16.mxu1 %v8006_v49 }
 0x2d2   : > { %2445 = vmatmul.mubr.bf16.gmra.mrb[68].mxu1 %v7608_v61 }
 0x2d3   : > { %6634 = vmatpush3.bf16.msra.mxu1 %v7961_v30  ;;  %2632 = vmatprep.mubr.bf16.mxu1 %v7611_v62 }
 0x2d4   : > { %6635 = vmatprep.subr.bf16.mxu1 %v8003_v46 }
 0x2d7   : > { %6636 = vmatpush3.bf16.msra.mxu1 %v7959_v27 }
 0x2d8   : > { %6666 = vmatprep.subr.bf16.mxu1 %v7969_v50 }
 0x2da   : > { %2633 = vmatmul.mubr.bf16.vlgmr.msra.gmra.mrb[72].mxu1 %v7609_v63 }
 0x2db   : > { %6667 = vmatpush3.bf16.msra.mxu1 %v7937_v39  ;;  %2640 = vmatprep.mubr.bf16.mxu1 %v7626_v5 }
 0x2dc   : > { %6668 = vmatprep.subr.bf16.mxu1 %v7967_v47 }
 0x2df   : > { %6669 = vmatpush3.bf16.msra.mxu1 %v7935_v36 }
 0x2e0   : > { %6670 = vmatprep.subr.bf16.mxu1 %v7982_v6 }
 0x2e2   : > { %2641 = vmatmul.mubr.bf16.gmra.mrb[76].mxu1 %v7628_v7 }
 0x2e3   : > { %6671 = vmatpush3.bf16.msra.mxu1 %v7945_v57  ;;  %2648 = vmatprep.mubr.bf16.mxu1 %v7629_v9 }
 0x2e4   : > { %6672 = vmatprep.subr.bf16.mxu1 %v7979_v3 }
 0x2e7   : > { %6673 = vmatpush3.bf16.msra.mxu1 %v7943_v54 }
 0x2e8   : > { %6674 = vmatprep.subr.bf16.mxu1 %v7994_v28 }
 0x2ea   : > { %2649 = vmatmul.mubr.bf16.gmra.mrb[80].mxu1 %v7631_v10 }
 0x2eb   : > { %6675 = vmatpush3.bf16.msra.mxu1 %v7953_v11  ;;  %2656 = vmatprep.mubr.bf16.mxu1 %v7632_v13 }
 0x2ec   : > { %6676 = vmatprep.subr.bf16.mxu1 %v7991_v24 }
 0x2ef   : > { %6677 = vmatpush3.bf16.msra.mxu1 %v7951_v8 }
 0x2f0   : > { %6678 = vmatprep.subr.bf16.mxu1 %v8006_v49 }
 0x2f2   : > { %2657 = vmatmul.mubr.bf16.gmra.mrb[84].mxu1 %v7634_v17 }
 0x2f3   : > { %6679 = vmatpush3.bf16.msra.mxu1 %v7961_v30  ;;  %2844 = vmatprep.mubr.bf16.mxu1 %v7637_v18 }
 0x2f4   : > { %6680 = vmatprep.subr.bf16.mxu1 %v8003_v46 }
 0x2f7   : > { %6681 = vmatpush3.bf16.msra.mxu1 %v7959_v27 }
 0x2fa   : > { %2845 = vmatmul.mubr.bf16.vlgmr.msra.gmra.mrb[88].mxu1 %v7635_v19 }
 0x2fb   : > { %2852 = vmatprep.mubr.bf16.mxu1 %v7638_v22 }
 0x302   : > { %2853 = vmatmul.mubr.bf16.gmra.mrb[92].mxu1 %v7640_v33 }
 0x303   : > { %2860 = vmatprep.mubr.bf16.mxu1 %v7641_v35 }
 0x30a   : > { %2861 = vmatmul.mubr.bf16.gmra.mrb[96].mxu1 %v7643_v44 }
 0x30b   : > { %2868 = vmatprep.mubr.bf16.mxu1 %v7644_v48 }
 0x30d   : > { %v8290_v0 = vpop.f32.mrb[0].mxu1 }
 0x30e   : > { %v8292_v1 = vpop.f32.mrb[1].mxu1 }
 0x30f   : > { %v8294_v2 = vpop.f32.mrb[2].mxu1 }
 0x310   : > { %v8296_v4 = vpop.f32.mrb[3].mxu1 }
 0x312   : > { %2869 = vmatmul.mubr.bf16.gmra.mrb[100].mxu1 %v7646_v59 }
 0x31d   : > { %v8310_v12 = vpop.f32.mrb[4].mxu1 }
 0x31e   : > { %v8315_v14 = vpop.f32.mrb[5].mxu1 }
 0x31f   : > { %v8317_v15 = vpop.f32.mrb[6].mxu1 }
 0x320   : > { %v8319_v16 = vpop.f32.mrb[7].mxu1 }
 0x32d   : > { %v6412_v21 = vpop.f32.mrb[8].mxu1 }
 0x32e   : > { %v6413_v23 = vpop.f32.mrb[9].mxu1 }
 0x32f   : > { %v6414_v25 = vadd.f32 %v6413_v23, %v6412_v21  ;;  %v6415_v26 = vpop.f32.mrb[10].mxu1 }
 0x330   : > { %v6416_v29 = vpop.f32.mrb[11].mxu1 }
 0x331   : > { %v6417_v31 = vadd.f32 %v6416_v29, %v6415_v26 }
 0x333   : > { %v1605_v32 = vpack.c.bf16 %v6417_v31, %v6414_v25 }
 0x335   : > { %v6418_v34 = vpop.f32.mrb[12].mxu1  ;;  %6940 = vmatprep.mubr.msk.bf16.mxu0 %vm1330_vm3, %v1605_v32 }
 0x336   : > { %v6419_v37 = vpop.f32.mrb[13].mxu1 }
 0x337   : > { %v6420_v38 = vadd.f32 %v6419_v37, %v6418_v34  ;;  %v6421_v40 = vpop.f32.mrb[14].mxu1 }
 0x338   : > { %v6422_v41 = vpop.f32.mrb[15].mxu1 }
 0x339   : > { %v6423_v42 = vadd.f32 %v6422_v41, %v6421_v40 }
 0x33b   : > { %v1606_v43 = vpack.c.bf16 %v6423_v42, %v6420_v38 }
 0x33d   : > { %6941 = vmatmul.mubr.msk.bf16.vlgmr.msra.gmra.mrb[64].mxu0 %vm1330_vm3, %v1606_v43  ;;  %v6424_v45 = vpop.f32.mrb[16].mxu1 }
 0x33e   : > { %6949 = vmatpush3.bf16.msra.mxu0 %v8235_v55  ;;  %v6425_v20 = vpop.f32.mrb[17].mxu1 }
 0x33f   : > { %6486 = vmatprep.subr.bf16.mxu0 %v7969_v50  ;;  %v6426_v51 = vadd.f32 %v6425_v20, %v6424_v45  ;;  %v6427_v52 = vpop.f32.mrb[18].mxu1 }
 0x340   : > { %v6428_v53 = vpop.f32.mrb[19].mxu1 }
 0x341   : > { %v6429_v56 = vadd.f32 %v6428_v53, %v6427_v52 }
 0x343   : > { %v1607_v58 = vpack.c.bf16 %v6429_v56, %v6426_v51  ;;  %v7614_v56 = vld [vmem:[%s9267_s25 + $0x100] ss:$8 sps:$4 sm:$0xff]  }
 0x345   : > { %v6430_v60 = vpop.f32.mrb[20].mxu1  ;;  %6944 = vmatprep.mubr.msk.bf16.mxu0 %vm1330_vm3, %v1607_v58 }
 0x346   : > { %v6431_v61 = vpop.f32.mrb[21].mxu1 }
 0x347   : > { %v6432_v62 = vadd.f32 %v6431_v61, %v6430_v60  ;;  %v6433_v55 = vpop.f32.mrb[22].mxu1  ;;  %v7619_v61 = vld [vmem:[%s9267_s25 + $0x110] ss:$8 sps:$4 sm:$0xff]  }
 0x348   : > { %v6434_v63 = vpop.f32.mrb[23].mxu1 }
 0x349   : > { %v6435_v50 = vadd.f32 %v6434_v63, %v6433_v55  ;;  %v7623_v55 = vld [vmem:[%s9267_s25 + $0x134] ss:$8 sps:$4 sm:$0xff]   ;;  %v7625_v63 = vld [vmem:[%s9267_s25 + $0x130] ss:$8 sps:$4 sm:$0xff]  }
 0x34b   : > { %v1608_v5 = vpack.c.bf16 %v6435_v50, %v6432_v62  ;;  %v7622_v62 = vld [vmem:[%s9267_s25 + $0x120] ss:$8 sps:$4 sm:$0xff]  }
 0x34d   : > { %v6457_v7 = vpop.f32.mrb[24].mxu1  ;;  %6945 = vmatmul.mubr.msk.bf16.gmra.mrb[68].mxu0 %vm1330_vm3, %v1608_v5 }
 0x34e   : > { %v6458_v9 = vpop.f32.mrb[25].mxu1 }
 0x34f   : > { %v6459_v10 = vadd.f32 %v6458_v9, %v6457_v7  ;;  %v6460_v13 = vpop.f32.mrb[26].mxu1 }
 0x350   : > { %v6461_v17 = vpop.f32.mrb[27].mxu1 }
 0x351   : > { %v6462_v18 = vadd.f32 %v6461_v17, %v6460_v13 }
 0x353   : > { %v1817_v19 = vpack.c.bf16 %v6462_v18, %v6459_v10 }
 0x355   : > { %v6463_v21 = vpop.f32.mrb[28].mxu1  ;;  %6950 = vmatprep.mubr.msk.bf16.mxu0 %vm1330_vm3, %v1817_v19 }
 0x356   : > { %v6464_v22 = vpop.f32.mrb[29].mxu1 }
 0x357   : > { %v6465_v23 = vadd.f32 %v6464_v22, %v6463_v21  ;;  %v6466_v25 = vpop.f32.mrb[30].mxu1 }
 0x358   : > { %v6467_v26 = vpop.f32.mrb[31].mxu1 }
 0x359   : > { %v6468_v29 = vadd.f32 %v6467_v26, %v6466_v25 }
 0x35b   : > { %v1818_v31 = vpack.c.bf16 %v6468_v29, %v6465_v23 }
 0x35d   : > { %6951 = vmatmul.mubr.msk.bf16.vlgmr.msra.gmra.mrb[64].mxu0 %vm1330_vm3, %v1818_v31  ;;  %v6469_v32 = vpop.f32.mrb[32].mxu1 }
 0x35e   : > { %6487 = vmatpush3.bf16.msra.mxu0 %v7937_v39  ;;  %v6470_v33 = vpop.f32.mrb[33].mxu1 }
 0x35f   : > { %6488 = vmatprep.subr.bf16.mxu0 %v7967_v47  ;;  %v6471_v34 = vadd.f32 %v6470_v33, %v6469_v32  ;;  %v6472_v35 = vpop.f32.mrb[34].mxu1 }
 0x360   : > { %v6473_v37 = vpop.f32.mrb[35].mxu1 }
 0x361   : > { %v6474_v38 = vadd.f32 %v6473_v37, %v6472_v35 }
 0x362   : > { %6489 = vmatpush3.bf16.msra.mxu0 %v7935_v36  ;;  %v7616_v36 = vld [vmem:[%s9267_s25 + $0x104] ss:$8 sps:$4 sm:$0xff]  }
 0x363   : > { %6490 = vmatprep.subr.bf16.mxu0 %v7982_v6  ;;  %v1819_v40 = vpack.c.bf16 %v6474_v38, %v6471_v34 }
 0x365   : > { %v6475_v41 = vpop.f32.mrb[36].mxu1  ;;  %6954 = vmatprep.mubr.msk.bf16.mxu0 %vm1330_vm3, %v1819_v40 }
 0x366   : > { %6491 = vmatpush3.bf16.msra.mxu0 %v7945_v57  ;;  %v6476_v42 = vpop.f32.mrb[37].mxu1 }
 0x367   : > { %6492 = vmatprep.subr.bf16.mxu0 %v7979_v3  ;;  %v6477_v39 = vadd.f32 %v6476_v42, %v6475_v41  ;;  %v6478_v43 = vpop.f32.mrb[38].mxu1  ;;  %v7647_v41 = vld [vmem:[%s9266_s21 + $0x20] sm:$0xff]  }
 0x368   : > { %v6479_v47 = vpop.f32.mrb[39].mxu1 }
 0x369   : > { %v6480_v44 = vadd.f32 %v6479_v47, %v6478_v43 }
 0x36a   : > { %6493 = vmatpush3.bf16.msra.mxu0 %v7943_v54 }
 0x36b   : > { %6494 = vmatprep.subr.bf16.mxu0 %v7994_v28  ;;  %v1820_v6 = vpack.c.bf16 %v6480_v44, %v6477_v39 }
 0x36d   : > { %6955 = vmatmul.mubr.msk.bf16.gmra.mrb[68].mxu0 %vm1330_vm3, %v1820_v6  ;;  %v6547_v45 = vpop.f32.mrb[40].mxu1 }
 0x36e   : > { %6495 = vmatpush3.bf16.msra.mxu0 %v7953_v11  ;;  %1996 = vmatprep.mubr.bf16.mxu0 %v7616_v36  ;;  %v6548_v57 = vpop.f32.mrb[41].mxu1 }
 0x36f   : > { %6496 = vmatprep.subr.bf16.mxu0 %v7991_v24  ;;  %v8371_v3 = vadd.f32 %v6548_v57, %v6547_v45  ;;  %v6550_v48 = vpop.f32.mrb[42].mxu1 }
 0x370   : > { %v6551_v54 = vpop.f32.mrb[43].mxu1 }
 0x371   : > { %v8373_v20 = vadd.f32 %v6551_v54, %v6550_v48 }
 0x372   : > { %6497 = vmatpush3.bf16.msra.mxu0 %v7951_v8 }
 0x373   : > { %6498 = vmatprep.subr.bf16.mxu0 %v8006_v49  ;;  %v2241_v28 = vpack.c.bf16 %v8373_v20, %v8371_v3  ;;  %v7617_v49 = vld [vmem:[%s9267_s25 + $0x114] ss:$8 sps:$4 sm:$0xff]   ;;  %v7651_v20 = vld [vmem:[%s9266_s21 + $0x40] sm:$0xff]  }
 0x375   : > { %v6553_v51 = vpop.f32.mrb[44].mxu1 }
 0x376   : > { %6499 = vmatpush3.bf16.msra.mxu0 %v7961_v30  ;;  %v6554_v11 = vpop.f32.mrb[45].mxu1 }
 0x377   : > { %6500 = vmatprep.subr.bf16.mxu0 %v8003_v46  ;;  %v8381_v24 = vadd.f32 %v6554_v11, %v6553_v51  ;;  %v6556_v52 = vpop.f32.mrb[46].mxu1 }
 0x378   : > { %v6557_v53 = vpop.f32.mrb[47].mxu1 }
 0x379   : > { %v8386_v8 = vadd.f32 %v6557_v53, %v6556_v52 }
 0x37a   : > { %6501 = vmatpush3.bf16.msra.mxu0 %v7959_v27  ;;  %v7620_v27 = vld [vmem:[%s9267_s25 + $0x124] ss:$8 sps:$4 sm:$0xff]  }
 0x37b   : > { %v2242_v30 = vpack.c.bf16 %v8386_v8, %v8381_v24  ;;  %6958 = vmatprep.subr.bf16.mxu0 %v7647_v41 }
 0x37d   : > { %1997 = vmatmul.mubr.bf16.vlgmr.msra.gmra.mrb[72].mxu0 %v7614_v56  ;;  %v6559_v46 = vpop.f32.mrb[48].mxu1 }
 0x37e   : > { %2004 = vmatprep.mubr.bf16.mxu0 %v7617_v49  ;;  %v6560_v58 = vpop.f32.mrb[49].mxu1  ;;  %6959 = vmatpush3.bf16.msra.mxu0 %v7647_v41 }
 0x37f   : > { %v8394_v59 = vadd.f32 %v6560_v58, %v6559_v46  ;;  %v6562_v60 = vpop.f32.mrb[50].mxu1 }
 0x380   : > { %v6563_v50 = vpop.f32.mrb[51].mxu1 }
 0x381   : > { %v8411_v5 = vadd.f32 %v6563_v50, %v6562_v60  ;;  %v8451_v60 = vld [vmem:[%s9266_s21 + $0x28] sm:$0xff]  }
 0x382   : > { %6968 = vmatprep.subr.bf16.mxu0 %v8451_v60 }
 0x383   : > { %v2243_v7 = vpack.c.bf16 %v8411_v5, %v8394_v59 }
 0x385   : > { %2005 = vmatmul.mubr.bf16.gmra.mrb[76].mxu0 %v7619_v61  ;;  %v6565_v9 = vpop.f32.mrb[52].mxu1 }
 0x386   : > { %2012 = vmatprep.mubr.bf16.mxu0 %v7620_v27  ;;  %v6566_v10 = vpop.f32.mrb[53].mxu1 }
 0x387   : > { %v6568_v13 = vpop.f32.mrb[54].mxu1  ;;  %v8415_v18 = vadd.f32 %v6566_v10, %v6565_v9 }
 0x388   : > { %v6569_v17 = vpop.f32.mrb[55].mxu1 }
 0x389   : > { %v8417_v19 = vadd.f32 %v6569_v17, %v6568_v13 }
 0x38b   : > { %v2244_v21 = vpack.c.bf16 %v8417_v19, %v8415_v18 }
 0x38d   : > { %2013 = vmatmul.mubr.bf16.gmra.mrb[80].mxu0 %v7622_v62  ;;  %v6592_v22 = vpop.f32.mrb[56].mxu1 }
 0x38e   : > { %2020 = vmatprep.mubr.bf16.mxu0 %v7623_v55  ;;  %v6593_v23 = vpop.f32.mrb[57].mxu1 }
 0x38f   : > { %v6595_v25 = vpop.f32.mrb[58].mxu1  ;;  %v8421_v29 = vadd.f32 %v6593_v23, %v6592_v22 }
 0x390   : > { %v6596_v26 = vpop.f32.mrb[59].mxu1 }
 0x391   : > { %v8423_v31 = vadd.f32 %v6596_v26, %v6595_v25 }
 0x393   : > { %v9269_v3 = vpack.c.bf16 %v8423_v31, %v8421_v29  ;;  %v7759_v29 = vmov 0.0  }
 0x394   : > { %7040 = vmatprep.subr.bf16.mxu1 %v7759_v29  ;;  %7044 = vmatprep.mubr.msk.bf16.mxu1 %vm7760_vm4, %v7759_v29 }
 0x395   : > { %2021 = vmatmul.mubr.bf16.gmra.mrb[84].mxu0 %v7625_v63  ;;  %v6598_v33 = vpop.f32.mrb[60].mxu1 }
 0x396   : > { %v6599_v34 = vpop.f32.mrb[61].mxu1 }
 0x397   : > { %v6601_v35 = vpop.f32.mrb[62].mxu1  ;;  %v8427_v38 = vadd.f32 %v6599_v34, %v6598_v33 }
 0x398   : > { %v6602_v37 = vpop.f32.mrb[63].mxu1 }
 0x399   : > { %v8429_v40 = vadd.f32 %v6602_v37, %v6601_v35 }
 0x39d   : > { %v6604_v39 = vpop.f32.mrb[64].mxu1 }
 0x39e   : > { %v6605_v43 = vpop.f32.mrb[65].mxu1 }
 0x39f   : > { %v6607_v47 = vpop.f32.mrb[66].mxu1  ;;  %v8436_v36 = vadd.f32 %v6605_v43, %v6604_v39 }
 0x3a0   : > { %v6608_v44 = vpop.f32.mrb[67].mxu1 }
 0x3a1   : > { %v8438_v6 = vadd.f32 %v6608_v44, %v6607_v47 }
 0x3a3   : > { %v9271_v24 = vpack.c.bf16 %v8438_v6, %v8436_v36 }
 0x3a5   : > { %v6610_v57 = vpop.f32.mrb[68].mxu1 }
 0x3a6   : > { %v6611_v48 = vpop.f32.mrb[69].mxu1 }
 0x3a7   : > { %v6613_v54 = vpop.f32.mrb[70].mxu1  ;;  %v8442_v11 = vadd.f32 %v6611_v48, %v6610_v57 }
 0x3a8   : > { %v6614_v51 = vpop.f32.mrb[71].mxu1 }
 0x3a9   : > { %v8444_v52 = vadd.f32 %v6614_v51, %v6613_v54 }
 0x3ab   : > { %v9272_v8 = vpack.c.bf16 %v8444_v52, %v8442_v11 }
 0x3ad   : > { %v6637_v56 = vpop.f32.mrb[72].mxu1 }
 0x3ae   : > { %v6638_v49 = vpop.f32.mrb[73].mxu1 }
 0x3af   : > { %v6640_v46 = vpop.f32.mrb[74].mxu1  ;;  %v8453_v61 = vadd.f32 %v6638_v49, %v6637_v56 }
 0x3b0   : > { %v6641_v58 = vpop.f32.mrb[75].mxu1 }
 0x3b1   : > { %v8455_v27 = vadd.f32 %v6641_v58, %v6640_v46 }
 0x3b5   : > { %v6643_v55 = vpop.f32.mrb[76].mxu1 }
 0x3b6   : > { %v6644_v63 = vpop.f32.mrb[77].mxu1 }
 0x3b7   : > { %v6646_v50 = vpop.f32.mrb[78].mxu1  ;;  %v8460_v10 = vadd.f32 %v6644_v63, %v6643_v55 }
 0x3b8   : > { %v6647_v9 = vpop.f32.mrb[79].mxu1 }
 0x3b9   : > { %v8462_v13 = vadd.f32 %v6647_v9, %v6646_v50 }
 0x3bb   : > { %v9274_v59 = vpack.c.bf16 %v8462_v13, %v8460_v10 }
 0x3bd   : > { %v6649_v22 = vpop.f32.mrb[80].mxu1 }
 0x3be   : > { %v6650_v23 = vpop.f32.mrb[81].mxu1 }
 0x3bf   : > { %v6652_v25 = vpop.f32.mrb[82].mxu1  ;;  %v8466_v33 = vadd.f32 %v6650_v23, %v6649_v22 }
 0x3c0   : > { %v6653_v26 = vpop.f32.mrb[83].mxu1 }
 0x3c1   : > { %v8468_v34 = vadd.f32 %v6653_v26, %v6652_v25 }
 0x3c3   : > { %v9275_v5 = vpack.c.bf16 %v8468_v34, %v8466_v33  ;;  %v5978_v33 = vld [vmem:[%s9241_s6] ss:$0 sm:$0xff] }
 0x3c5   : > { %v6655_v37 = vpop.f32.mrb[84].mxu1 }
 0x3c6   : > { %v6656_v41 = vpop.f32.mrb[85].mxu1 }
 0x3c7   : > { %v6658_v39 = vpop.f32.mrb[86].mxu1  ;;  %v8472_v47 = vadd.f32 %v6656_v41, %v6655_v37 }
 0x3c8   : > { %v6659_v43 = vpop.f32.mrb[87].mxu1 }
 0x3c9   : > { %v8474_v44 = vadd.f32 %v6659_v43, %v6658_v39 }
 0x3cd   : > { %v6682_v48 = vpop.f32.mrb[88].mxu1 }
 0x3ce   : > { %v6683_v54 = vpop.f32.mrb[89].mxu1 }
 0x3cf   : > { %v6685_v51 = vpop.f32.mrb[90].mxu1  ;;  %v8478_v49 = vadd.f32 %v6683_v54, %v6682_v48 }
 0x3d0   : > { %v6686_v56 = vpop.f32.mrb[91].mxu1 }
 0x3d1   : > { %v8480_v46 = vadd.f32 %v6686_v56, %v6685_v51 }
 0x3d3   : > { %v9277_v18 = vpack.c.bf16 %v8480_v46, %v8478_v49 }
 0x3d5   : > { %v6688_v55 = vpop.f32.mrb[92].mxu1 }
 0x3d6   : > { %v6689_v63 = vpop.f32.mrb[93].mxu1 }
 0x3d7   : > { %v6691_v50 = vpop.f32.mrb[94].mxu1  ;;  %v8484_v22 = vadd.f32 %v6689_v63, %v6688_v55 }
 0x3d8   : > { %v6692_v9 = vpop.f32.mrb[95].mxu1 }
 0x3d9   : > { %v8486_v23 = vadd.f32 %v6692_v9, %v6691_v50 }
 0x3db   : > { %v9278_v19 = vpack.c.bf16 %v8486_v23, %v8484_v22 }
 0x3dd   : > { %v6694_v26 = vpop.f32.mrb[96].mxu1 }
 0x3de   : > { %v6695_v37 = vpop.f32.mrb[97].mxu1 }
 0x3df   : > { %v6697_v41 = vpop.f32.mrb[98].mxu1  ;;  %v8490_v39 = vadd.f32 %v6695_v37, %v6694_v26 }
 0x3e0   : > { %v6698_v43 = vpop.f32.mrb[99].mxu1 }
 0x3e1   : > { %v8492_v48 = vadd.f32 %v6698_v43, %v6697_v41 }
 0x3e5   : > { %v6700_v54 = vpop.f32.mrb[100].mxu1 }
 0x3e6   : > { %v6701_v56 = vpop.f32.mrb[101].mxu1 }
 0x3e7   : > { %v6703_v55 = vpop.f32.mrb[102].mxu1  ;;  %v6702_v63 = vadd.f32 %v6701_v56, %v6700_v54  ;;  %v7649_v54 = vld [vmem:[%s9266_s21 + $0x30] sm:$0xff]  }
 0x3e8   : > { %v6704_v50 = vpop.f32.mrb[103].mxu1 }
 0x3e9   : > { %v6705_v9 = vadd.f32 %v6704_v50, %v6703_v55 }
 0x3eb   : > { %v2880_v58 = vpack.c.bf16 %v6705_v9, %v6702_v63 }
 0x450   : > { %v6502_v57 = vpop.f32.mrb[72].mxu0 }
 0x451   : > { %v6503_v25 = vpop.f32.mrb[73].mxu0 }
 0x452   : > { %v6504_v35 = vadd.f32 %v6503_v25, %v6502_v57  ;;  %v6505_v17 = vpop.f32.mrb[74].mxu0 }
 0x453   : > { %v6506_v62 = vpop.f32.mrb[75].mxu0 }
 0x454   : > { %v6507_v26 = vadd.f32 %v6506_v62, %v6505_v17 }
 0x456   : > { %v2029_v37 = vpack.c.bf16 %v6507_v26, %v6504_v35 }
 0x458   : > { %v6508_v53 = vpop.f32.mrb[76].mxu0  ;;  %6960 = vmatprep.mubr.msk.bf16.mxu0 %vm1330_vm3, %v2029_v37 }
 0x459   : > { %v6509_v41 = vpop.f32.mrb[77].mxu0 }
 0x45a   : > { %v6510_v43 = vadd.f32 %v6509_v41, %v6508_v53  ;;  %v6511_v45 = vpop.f32.mrb[78].mxu0 }
 0x45b   : > { %v6512_v51 = vpop.f32.mrb[79].mxu0 }
 0x45c   : > { %v6513_v42 = vadd.f32 %v6512_v51, %v6511_v45 }
 0x45e   : > { %v2030_v32 = vpack.c.bf16 %v6513_v42, %v6510_v43 }
 0x460   : > { %v6514_v56 = vpop.f32.mrb[80].mxu0  ;;  %6961 = vmatmul.mubr.msk.bf16.vlgmr.msra.gmra.mrb[64].mxu0 %vm1330_vm3, %v2030_v32  ;;  %v7650_v32 = vld [vmem:[%s9266_s21 + $0x38] sm:$0xff]  }
 0x461   : > { %v6515_v57 = vpop.f32.mrb[81].mxu0  ;;  %6969 = vmatpush3.bf16.msra.mxu0 %v8451_v60 }
 0x462   : > { %v6516_v62 = vadd.f32 %v6515_v57, %v6514_v56  ;;  %v6517_v17 = vpop.f32.mrb[82].mxu0  ;;  %6978 = vmatprep.subr.bf16.mxu0 %v7649_v54 }
 0x463   : > { %v6518_v35 = vpop.f32.mrb[83].mxu0 }
 0x464   : > { %v6519_v25 = vadd.f32 %v6518_v35, %v6517_v17 }
 0x466   : > { %v2031_v53 = vpack.c.bf16 %v6519_v25, %v6516_v62 }
 0x468   : > { %v6520_v55 = vpop.f32.mrb[84].mxu0  ;;  %6964 = vmatprep.mubr.msk.bf16.mxu0 %vm1330_vm3, %v2031_v53 }
 0x469   : > { %v6521_v42 = vpop.f32.mrb[85].mxu0 }
 0x46a   : > { %v6522_v45 = vadd.f32 %v6521_v42, %v6520_v55  ;;  %v6523_v51 = vpop.f32.mrb[86].mxu0 }
 0x46b   : > { %v6524_v63 = vpop.f32.mrb[87].mxu0 }
 0x46c   : > { %v6525_v50 = vadd.f32 %v6524_v63, %v6523_v51 }
 0x46e   : > { %v2032_v9 = vpack.c.bf16 %v6525_v50, %v6522_v45 }
 0x470   : > { %6965 = vmatmul.mubr.msk.bf16.gmra.mrb[68].mxu0 %vm1330_vm3, %v2032_v9 }
 0x471   : > { %6970 = vmatprep.mubr.msk.bf16.mxu0 %vm1330_vm3, %v2241_v28  ;;  %v9270_v28 = vpack.c.bf16 %v8429_v40, %v8427_v38  ;;  %v5977_v38 = vld [vmem:[%s9240_s5] ss:$0 sm:$0xff] }
 0x478   : > { %6971 = vmatmul.mubr.msk.bf16.vlgmr.msra.gmra.mrb[64].mxu0 %vm1330_vm3, %v2242_v30  ;;  %v9273_v30 = vpack.c.bf16 %v8455_v27, %v8453_v61 }
 0x479   : > { %6974 = vmatprep.mubr.msk.bf16.mxu0 %vm1330_vm3, %v2243_v7  ;;  %6979 = vmatpush3.bf16.msra.mxu0 %v7649_v54  ;;  %v9276_v7 = vpack.c.bf16 %v8474_v44, %v8472_v47 }
 0x47a   : > { %6988 = vmatprep.subr.bf16.mxu0 %v7650_v32 }
 0x480   : > { %6975 = vmatmul.mubr.msk.bf16.gmra.mrb[68].mxu0 %vm1330_vm3, %v2244_v21  ;;  %v9279_v21 = vpack.c.bf16 %v8492_v48, %v8490_v39 }
 0x481   : > { %6980 = vmatprep.mubr.msk.bf16.mxu0 %vm1330_vm3, %v9269_v3 }
 0x488   : > { %6981 = vmatmul.mubr.msk.bf16.vlgmr.msra.gmra.mrb[64].mxu0 %vm1330_vm3, %v9270_v28 }
 0x489   : > { %6984 = vmatprep.mubr.msk.bf16.mxu0 %vm1330_vm3, %v9271_v24  ;;  %6989 = vmatpush3.bf16.msra.mxu0 %v7650_v32 }
 0x48a   : > { %6998 = vmatprep.subr.bf16.mxu0 %v7651_v20 }
 0x490   : > { %6985 = vmatmul.mubr.msk.bf16.gmra.mrb[68].mxu0 %vm1330_vm3, %v9272_v8 }
 0x491   : > { %6990 = vmatprep.mubr.msk.bf16.mxu0 %vm1330_vm3, %v9273_v30 }
 0x498   : > { %6991 = vmatmul.mubr.msk.bf16.vlgmr.msra.gmra.mrb[64].mxu0 %vm1330_vm3, %v9274_v59 }
 0x499   : > { %6994 = vmatprep.mubr.msk.bf16.mxu0 %vm1330_vm3, %v9275_v5  ;;  %6999 = vmatpush3.bf16.msra.mxu0 %v7651_v20 }
 0x49a   : > { %7008 = vmatprep.subr.bf16.mxu0 %v7759_v29 }
 0x4a0   : > { %6995 = vmatmul.mubr.msk.bf16.gmra.mrb[68].mxu0 %vm1330_vm3, %v9276_v7 }
 0x4a1   : > { %7000 = vmatprep.mubr.msk.bf16.mxu0 %vm1330_vm3, %v9277_v18 }
 0x4a8   : > { %7001 = vmatmul.mubr.msk.bf16.vlgmr.msra.gmra.mrb[64].mxu0 %vm1330_vm3, %v9278_v19 }
 0x4a9   : > { %7004 = vmatprep.mubr.msk.bf16.mxu0 %vm1330_vm3, %v9279_v21 }
 0x4b0   : > { %7005 = vmatmul.mubr.msk.bf16.gmra.mrb[68].mxu0 %vm1330_vm3, %v2880_v58 }
 0x4b1   : > { %7016 = vmatprep.mubr.msk.bf16.mxu0 %vm7760_vm4, %v7759_v29 }
 0x57b   : > { %v7002_v31 = vpop.f32.mrb[64].mxu0 }
 0x57c   : > { %v7430_v40 = vadd.f32 %v7002_v31, %v8290_v0  ;;  %v2936_v36 = vpop.f32.mrb[65].mxu0  ;;  %v7652_v31 = vld [vmem:[%s9243_s8] sm:$0xff]  }
 0x57d   : > { %v7431_v6 = vadd.f32 %v2936_v36, %v8292_v1  ;;  %v7003_v11 = vpop.f32.mrb[66].mxu0  ;;  %v7654_v36 = vld [vmem:[%s9244_s9 + $0x10] sm:$0xff]  }
 0x57e   : > { %v2984_v52 = vadd.f32 %v7430_v40, %v5977_v38  ;;  %v7432_v60 = vadd.f32 %v7003_v11, %v8294_v2  ;;  %v2939_v61 = vpop.f32.mrb[67].mxu0  ;;  %v5979_v2 = vld [vmem:[%s9242_s7] ss:$0 sm:$0xff]  ;;  %v7655_v11 = vld [vmem:[%s9244_s9 + $0x18] sm:$0xff]  }
 0x57f   : > { %v2982_v27 = vadd.f32 %v7431_v6, %v5977_v38  ;;  %v7433_v10 = vadd.f32 %v2939_v61, %v8296_v4  ;;  %v7656_v40 = vld [vmem:[%s9244_s9] sm:$0xff]   ;;  %v7657_v6 = vld [vmem:[%s9244_s9 + $0x8] sm:$0xff]  }
 0x580   : > { %vm2992_vm5 = vcmp.ge.f32.partialorder %v2984_v52, 0.0  ;;  %v3000_v13 = vmul.f32 0.2, %v2984_v52  ;;  %v2985_v34 = vadd.f32 %v7432_v60, %v5977_v38  ;;  %7041 = vmatpush3.bf16.msra.mxu1 %v7656_v40 }
 0x581   : > { %vm2990_vm6 = vcmp.ge.f32.partialorder %v2982_v27, 0.0  ;;  %v2998_v0 = vmul.f32 0.2, %v2982_v27  ;;  %v2983_v47 = vadd.f32 %v7433_v10, %v5977_v38  ;;  %7042 = vmatprep.subr.bf16.mxu1 %v7759_v29 }
 0x582   : > { %v3008_v44 = vsel %vm2992_vm5, %v2984_v52, %v3000_v13  ;;  %vm2993_vm7 = vcmp.ge.f32.partialorder %v2985_v34, 0.0  ;;  %v3001_v1 = vmul.f32 0.2, %v2985_v34 }
 0x583   : > { %v3023_v49 = vmul.f32 %v5978_v33, %v3008_v44  ;;  %v3006_v46 = vsel %vm2990_vm6, %v2982_v27, %v2998_v0  ;;  %vm2991_vm8 = vcmp.ge.f32.partialorder %v2983_v47, 0.0  ;;  %v2999_v4 = vmul.f32 0.2, %v2983_v47  ;;  %v7006_v58 = vpop.f32.mrb[68].mxu0  ;;  %v7658_v44 = vld [vmem:[%s9243_s8 + $0x10] sm:$0xff]  }
 0x584   : > { %v3021_v22 = vmul.f32 %v5978_v33, %v3006_v46  ;;  %v3009_v23 = vsel %vm2993_vm7, %v2985_v34, %v3001_v1  ;;  %v7434_v39 = vadd.f32 %v7006_v58, %v8310_v12  ;;  %v2952_v48 = vpop.f32.mrb[69].mxu0  ;;  %7043 = vmatpush3.bf16.msra.mxu1 %v7657_v6  ;;  %v7659_v1 = vld [vmem:[%s9244_s9 + $0x20] sm:$0xff]   ;;  %v7668_v6 = vld [vmem:[%s9244_s9 + $0x50] sm:$0xff]  }
 0x585   : > { %v3024_v26 = vmul.f32 %v5978_v33, %v3009_v23  ;;  %v3007_v37 = vsel %vm2991_vm8, %v2983_v47, %v2999_v4  ;;  %v7435_v41 = vadd.f32 %v2952_v48, %v8315_v14  ;;  %v7007_v43 = vpop.f32.mrb[70].mxu0  ;;  %v3038_v54 = vadd.f32 %v5979_v2, %v3023_v49  ;;  %7060 = vmatprep.subr.bf16.mxu1 %v7759_v29  ;;  %v7660_v49 = vld [vmem:[%s9244_s9 + $0x28] sm:$0xff]  }
 0x586   : > { %v3022_v56 = vmul.f32 %v5978_v33, %v3007_v37  ;;  %v2988_v57 = vadd.f32 %v7434_v39, %v5977_v38  ;;  %v7436_v62 = vadd.f32 %v7007_v43, %v8317_v15  ;;  %v2955_v17 = vpop.f32.mrb[71].mxu0  ;;  %v3036_v35 = vadd.f32 %v5979_v2, %v3021_v22 }
 0x587   : > { %v3039_v25 = vadd.f32 %v5979_v2, %v3024_v26  ;;  %v2986_v53 = vadd.f32 %v7435_v41, %v5977_v38  ;;  %v7437_v55 = vadd.f32 %v2955_v17, %v8319_v16  ;;  %v7662_v17 = vld [vmem:[%s9244_s9 + $0x30] sm:$0xff]  }
 0x588   : > { %v3037_v42 = vadd.f32 %v5979_v2, %v3022_v56  ;;  %vm2996_vm9 = vcmp.ge.f32.partialorder %v2988_v57, 0.0  ;;  %v3004_v12 = vmul.f32 0.2, %v2988_v57  ;;  %v2989_v45 = vadd.f32 %v7436_v62, %v5977_v38  ;;  %v7661_v62 = vld [vmem:[%s9243_s8 + $0x18] sm:$0xff]  }
 0x589   : > { %v8594_v51 = vpack.c.bf16 %v3039_v25, %v3038_v54  ;;  %vm2994_vm10 = vcmp.ge.f32.partialorder %v2986_v53, 0.0  ;;  %v3002_v14 = vmul.f32 0.2, %v2986_v53  ;;  %v2987_v63 = vadd.f32 %v7437_v55, %v5977_v38  ;;  %v7653_v38 = vld [vmem:[%s9243_s8 + $0x8] sm:$0xff]  }
 0x58a   : > { %v8596_v50 = vpack.c.bf16 %v3037_v42, %v3036_v35  ;;  %v3012_v9 = vsel %vm2996_vm9, %v2988_v57, %v3004_v12  ;;  %vm2997_vm11 = vcmp.ge.f32.partialorder %v2989_v45, 0.0  ;;  %v3005_v15 = vmul.f32 0.2, %v2989_v45  ;;  %v7663_v35 = vld [vmem:[%s9244_s9 + $0x38] sm:$0xff]  }
 0x58b   : > { %v3027_v32 = vmul.f32 %v5978_v33, %v3012_v9  ;;  %v3010_v3 = vsel %vm2994_vm10, %v2986_v53, %v3002_v14  ;;  %vm2995_vm12 = vcmp.ge.f32.partialorder %v2987_v63, 0.0  ;;  %v3003_v20 = vmul.f32 0.2, %v2987_v63 }
 0x58c   : > { %v3025_v28 = vmul.f32 %v5978_v33, %v3010_v3  ;;  %v3013_v16 = vsel %vm2997_vm11, %v2989_v45, %v3005_v15  ;;  %7009 = vmatpush3.bf16.msra.mxu0 %v8596_v50  ;;  %v7664_v3 = vld [vmem:[%s9243_s8 + $0x20] sm:$0xff]  }
 0x58d   : > { %v3028_v24 = vmul.f32 %v5978_v33, %v3013_v16  ;;  %v3011_v8 = vsel %vm2995_vm12, %v2987_v63, %v3003_v20  ;;  %7010 = vmatprep.subr.bf16.mxu0 %v7759_v29  ;;  %v3042_v59 = vadd.f32 %v5979_v2, %v3027_v32  ;;  %v7665_v20 = vld [vmem:[%s9244_s9 + $0x40] sm:$0xff]  }
 0x58e   : > { %v3026_v30 = vmul.f32 %v5978_v33, %v3011_v8  ;;  %v3040_v7 = vadd.f32 %v5979_v2, %v3025_v28  ;;  %v7666_v28 = vld [vmem:[%s9244_s9 + $0x48] sm:$0xff]  }
 0x58f   : > { %v3043_v5 = vadd.f32 %v5979_v2, %v3028_v24 }
 0x590   : > { %v3041_v18 = vadd.f32 %v5979_v2, %v3026_v30  ;;  %7011 = vmatpush3.bf16.msra.mxu0 %v8594_v51 }
 0x591   : > { %v8601_v19 = vpack.c.bf16 %v3043_v5, %v3042_v59  ;;  %7012 = vmatprep.subr.bf16.mxu0 %v7759_v29 }
 0x592   : > { %v8604_v21 = vpack.c.bf16 %v3041_v18, %v3040_v7 }
 0x594   : > { %7013 = vmatpush3.bf16.msra.mxu0 %v8604_v21 }
 0x595   : > { %7014 = vmatprep.subr.bf16.mxu0 %v7759_v29 }
 0x598   : > { %7015 = vmatpush3.bf16.msra.mxu0 %v8601_v19 }
 0x599   : > { %7020 = vmatprep.subr.bf16.mxu0 %v7759_v29 }
 0x59b   : > { %7017 = vmatmul.mubr.msk.bf16.vlgmr.msra.gmra.mrb[88].mxu0 %vm3055_vm13, %v7652_v31 }
 0x59c   : > { %7021 = vmatpush3.bf16.msra.mxu0 %v8596_v50  ;;  %7028 = vmatprep.mubr.msk.bf16.mxu0 %vm7760_vm4, %v7759_v29 }
 0x59d   : > { %7022 = vmatprep.subr.bf16.mxu0 %v7759_v29 }
 0x5a0   : > { %7023 = vmatpush3.bf16.msra.mxu0 %v8594_v51 }
 0x5a1   : > { %7024 = vmatprep.subr.bf16.mxu0 %v7759_v29 }
 0x5a4   : > { %7025 = vmatpush3.bf16.msra.mxu0 %v8604_v21 }
 0x5a5   : > { %7026 = vmatprep.subr.bf16.mxu0 %v7759_v29 }
 0x5a8   : > { %7027 = vmatpush3.bf16.msra.mxu0 %v8601_v19 }
 0x5a9   : > { %7032 = vmatprep.subr.bf16.mxu0 %v7759_v29 }
 0x5ab   : > { %7029 = vmatmul.mubr.msk.bf16.vlgmr.msra.gmra.mrb[92].mxu0 %vm3055_vm13, %v7653_v38 }
 0x5ac   : > { %7036 = vmatprep.mubr.msk.bf16.mxu0 %vm7760_vm4, %v7759_v29  ;;  %7033 = vmatpush3.bf16.msra.mxu0 %v7654_v36  ;;  %v7667_v36 = vld [vmem:[%s9243_s8 + $0x28] sm:$0xff]  }
 0x5ad   : > { %7034 = vmatprep.subr.bf16.mxu0 %v7759_v29 }
 0x5b0   : > { %7035 = vmatpush3.bf16.msra.mxu0 %v7655_v11  ;;  %v7669_v11 = vld [vmem:[%s9244_s9 + $0x58] sm:$0xff]  }
 0x5b1   : > { %7048 = vmatprep.subr.bf16.mxu0 %v7759_v29 }
 0x66e   : > { %v3093_v52 = vpop.f32.mrb[88].mxu0 }
 0x66f   : > { %v7018_v60 = vpop.f32.mrb[89].mxu0 }
 0x670   : > { %v3096_v61 = vpop.f32.mrb[90].mxu0 }
 0x671   : > { %v3100_v27 = vpack.c.bf16 %v3096_v61, %v3093_v52  ;;  %v7019_v10 = vpop.f32.mrb[91].mxu0 }
 0x673   : > { %7045 = vmatmul.mubr.msk.bf16.vlgmr.msra.gmra.mrb[104].mxu1 %vm762_vm0, %v3100_v27 }
 0x674   : > { %7064 = vmatprep.mubr.msk.bf16.mxu1 %vm7760_vm4, %v7759_v29  ;;  %7061 = vmatpush3.bf16.msra.mxu1 %v7659_v1  ;;  %v7670_v1 = vld [vmem:[%s9243_s8 + $0x30] sm:$0xff]  }
 0x675   : > { %7062 = vmatprep.subr.bf16.mxu1 %v7759_v29 }
 0x678   : > { %7063 = vmatpush3.bf16.msra.mxu1 %v7660_v49  ;;  %v7671_v49 = vld [vmem:[%s9244_s9 + $0x60] sm:$0xff]  }
 0x679   : > { %7068 = vmatprep.subr.bf16.mxu1 %v7759_v29 }
 0x67e   : > { %v3150_v13 = vpop.f32.mrb[92].mxu0 }
 0x67f   : > { %v7030_v33 = vpop.f32.mrb[93].mxu0 }
 0x680   : > { %v3153_v34 = vpop.f32.mrb[94].mxu0 }
 0x681   : > { %v3157_v0 = vpack.c.bf16 %v3153_v34, %v3150_v13  ;;  %v7031_v47 = vpop.f32.mrb[95].mxu0 }
 0x683   : > { %7037 = vmatmul.mubr.msk.bf16.vlgmr.msra.gmra.mrb[96].mxu0 %vm762_vm0, %v3157_v0 }
 0x684   : > { %7049 = vmatpush3.bf16.msra.mxu0 %v8596_v50  ;;  %7056 = vmatprep.mubr.msk.bf16.mxu0 %vm7760_vm4, %v7759_v29 }
 0x685   : > { %7050 = vmatprep.subr.bf16.mxu0 %v7759_v29 }
 0x688   : > { %7051 = vmatpush3.bf16.msra.mxu0 %v8594_v51 }
 0x689   : > { %7052 = vmatprep.subr.bf16.mxu0 %v7759_v29 }
 0x68c   : > { %7053 = vmatpush3.bf16.msra.mxu0 %v8604_v21 }
 0x68d   : > { %7054 = vmatprep.subr.bf16.mxu0 %v7759_v29 }
 0x690   : > { %7055 = vmatpush3.bf16.msra.mxu0 %v8601_v19 }
 0x691   : > { %7080 = vmatprep.subr.bf16.mxu0 %v7759_v29 }
 0x693   : > { %7057 = vmatmul.mubr.msk.bf16.vlgmr.msra.gmra.mrb[100].mxu0 %vm3055_vm13, %v7658_v44 }
 0x694   : > { %7084 = vmatprep.mubr.msk.bf16.mxu0 %vm7760_vm4, %v7759_v29  ;;  %7081 = vmatpush3.bf16.msra.mxu0 %v7662_v17 }
 0x695   : > { %7082 = vmatprep.subr.bf16.mxu0 %v7759_v29 }
 0x698   : > { %7083 = vmatpush3.bf16.msra.mxu0 %v7663_v35 }
 0x699   : > { %7088 = vmatprep.subr.bf16.mxu0 %v7759_v29 }
 0x746   : > { %v3268_v2 = vpop.f32.mrb[104].mxu1 }
 0x747   : > { %v7046_v46 = vpop.f32.mrb[105].mxu1 }
 0x748   : > { %v3271_v4 = vpop.f32.mrb[106].mxu1 }
 0x749   : > { %v7047_v58 = vpop.f32.mrb[107].mxu1 }
 0x756   : > { %v3212_v22 = vpop.f32.mrb[96].mxu0 }
 0x757   : > { %v3269_v23 = vadd.f32 %v3268_v2, %v3212_v22  ;;  %v7038_v39 = vpop.f32.mrb[97].mxu0  ;;  %v7672_v2 = vld [vmem:[%s9244_s9 + $0x68] sm:$0xff]  }
 0x758   : > { %v3215_v48 = vpop.f32.mrb[98].mxu0 }
 0x759   : > { %v3272_v26 = vadd.f32 %v3271_v4, %v3215_v48  ;;  %v7039_v37 = vpop.f32.mrb[99].mxu0 }
 0x766   : > { %v3320_v41 = vpop.f32.mrb[100].mxu0 }
 0x767   : > { %v7058_v43 = vpop.f32.mrb[101].mxu0 }
 0x768   : > { %v3323_v54 = vpop.f32.mrb[102].mxu0 }
 0x769   : > { %v3327_v56 = vpack.c.bf16 %v3323_v54, %v3320_v41  ;;  %v7059_v57 = vpop.f32.mrb[103].mxu0  ;;  %v7673_v54 = vld [vmem:[%s9243_s8 + $0x38] sm:$0xff]  }
 0x76a   : > { %v7675_v57 = vld [vmem:[%s9244_s9 + $0x78] sm:$0xff]  }
 0x76b   : > { %7065 = vmatmul.mubr.msk.bf16.vlgmr.msra.gmra.mrb[108].mxu1 %vm762_vm0, %v3327_v56  ;;  %v7674_v56 = vld [vmem:[%s9244_s9 + $0x70] sm:$0xff]  }
 0x76c   : > { %7069 = vmatpush3.bf16.msra.mxu1 %v8596_v50  ;;  %7076 = vmatprep.mubr.msk.bf16.mxu1 %vm7760_vm4, %v7759_v29 }
 0x76d   : > { %7070 = vmatprep.subr.bf16.mxu1 %v7759_v29 }
 0x770   : > { %7071 = vmatpush3.bf16.msra.mxu1 %v8594_v51 }
 0x771   : > { %7072 = vmatprep.subr.bf16.mxu1 %v7759_v29 }
 0x774   : > { %7073 = vmatpush3.bf16.msra.mxu1 %v8604_v21 }
 0x775   : > { %7074 = vmatprep.subr.bf16.mxu1 %v7759_v29 }
 0x778   : > { %7075 = vmatpush3.bf16.msra.mxu1 %v8601_v19 }
 0x779   : > { %7100 = vmatprep.subr.bf16.mxu1 %v7759_v29 }
 0x77b   : > { %7077 = vmatmul.mubr.msk.bf16.vlgmr.msra.gmra.mrb[112].mxu1 %vm3055_vm13, %v7661_v62 }
 0x77c   : > { %7104 = vmatprep.mubr.msk.bf16.mxu1 %vm7760_vm4, %v7759_v29  ;;  %7101 = vmatpush3.bf16.msra.mxu1 %v7665_v20 }
 0x77d   : > { %7102 = vmatprep.subr.bf16.mxu1 %v7759_v29 }
 0x780   : > { %7103 = vmatpush3.bf16.msra.mxu1 %v7666_v28 }
 0x781   : > { %7108 = vmatprep.subr.bf16.mxu1 %v7759_v29 }
 0x83e   : > { %v3382_v25 = vpop.f32.mrb[108].mxu1 }
 0x83f   : > { %v3389_v53 = vadd.f32 %v3382_v25, %v3269_v23  ;;  %v7066_v55 = vpop.f32.mrb[109].mxu1 }
 0x840   : > { %v3385_v42 = vpop.f32.mrb[110].mxu1 }
 0x841   : > { %v3390_v12 = vadd.f32 %v3385_v42, %v3272_v26  ;;  %v7067_v45 = vpop.f32.mrb[111].mxu1 }
 0x84e   : > { %v3436_v14 = vpop.f32.mrb[112].mxu1 }
 0x84f   : > { %v7078_v63 = vpop.f32.mrb[113].mxu1 }
 0x850   : > { %v3439_v9 = vpop.f32.mrb[114].mxu1 }
 0x851   : > { %v3443_v15 = vpack.c.bf16 %v3439_v9, %v3436_v14  ;;  %v7079_v32 = vpop.f32.mrb[115].mxu1  ;;  %v7676_v9 = vld [vmem:[%s9243_s8 + $0x40] sm:$0xff]  }
 0x853   : > { %7085 = vmatmul.mubr.msk.bf16.vlgmr.msra.gmra.mrb[104].mxu0 %vm762_vm0, %v3443_v15 }
 0x854   : > { %7089 = vmatpush3.bf16.msra.mxu0 %v8596_v50  ;;  %7096 = vmatprep.mubr.msk.bf16.mxu0 %vm7760_vm4, %v7759_v29 }
 0x855   : > { %7090 = vmatprep.subr.bf16.mxu0 %v7759_v29 }
 0x858   : > { %7091 = vmatpush3.bf16.msra.mxu0 %v8594_v51 }
 0x859   : > { %7092 = vmatprep.subr.bf16.mxu0 %v7759_v29 }
 0x85c   : > { %7093 = vmatpush3.bf16.msra.mxu0 %v8604_v21 }
 0x85d   : > { %7094 = vmatprep.subr.bf16.mxu0 %v7759_v29 }
 0x860   : > { %7095 = vmatpush3.bf16.msra.mxu0 %v8601_v19 }
 0x861   : > { %7120 = vmatprep.subr.bf16.mxu0 %v7759_v29 }
 0x863   : > { %7097 = vmatmul.mubr.msk.bf16.vlgmr.msra.gmra.mrb[108].mxu0 %vm3055_vm13, %v7664_v3 }
 0x864   : > { %7124 = vmatprep.mubr.msk.bf16.mxu0 %vm7760_vm4, %v7759_v29  ;;  %7121 = vmatpush3.bf16.msra.mxu0 %v7668_v6 }
 0x865   : > { %7122 = vmatprep.subr.bf16.mxu0 %v7759_v29 }
 0x868   : > { %7123 = vmatpush3.bf16.msra.mxu0 %v7669_v11  ;;  %v6074_v11 = vld [vmem:[%s9246_s11] ss:$0 sm:$0xff] }
 0x869   : > { %7128 = vmatprep.subr.bf16.mxu0 %v7759_v29 }
 0x926   : > { %v3498_v16 = vpop.f32.mrb[104].mxu0 }
 0x927   : > { %v3505_v24 = vadd.f32 %v3498_v16, %v3389_v53  ;;  %v7086_v8 = vpop.f32.mrb[105].mxu0 }
 0x928   : > { %v3501_v30 = vpop.f32.mrb[106].mxu0 }
 0x929   : > { %v3506_v59 = vadd.f32 %v3501_v30, %v3390_v12  ;;  %v7087_v5 = vpop.f32.mrb[107].mxu0 }
 0x92a   : > { %v6073_v5 = vld [vmem:[%s9245_s10] ss:$0 sm:$0xff] }
 0x936   : > { %v3552_v7 = vpop.f32.mrb[108].mxu0 }
 0x937   : > { %v7098_v18 = vpop.f32.mrb[109].mxu0 }
 0x938   : > { %v3555_v31 = vpop.f32.mrb[110].mxu0 }
 0x939   : > { %v3559_v38 = vpack.c.bf16 %v3555_v31, %v3552_v7  ;;  %v7099_v40 = vpop.f32.mrb[111].mxu0 }
 0x93b   : > { %7105 = vmatmul.mubr.msk.bf16.vlgmr.msra.gmra.mrb[116].mxu1 %vm762_vm0, %v3559_v38 }
 0x93c   : > { %7109 = vmatpush3.bf16.msra.mxu1 %v8596_v50  ;;  %7116 = vmatprep.mubr.msk.bf16.mxu1 %vm7760_vm4, %v7759_v29 }
 0x93d   : > { %7110 = vmatprep.subr.bf16.mxu1 %v7759_v29 }
 0x940   : > { %7111 = vmatpush3.bf16.msra.mxu1 %v8594_v51 }
 0x941   : > { %7112 = vmatprep.subr.bf16.mxu1 %v7759_v29 }
 0x944   : > { %7113 = vmatpush3.bf16.msra.mxu1 %v8604_v21 }
 0x945   : > { %7114 = vmatprep.subr.bf16.mxu1 %v7759_v29 }
 0x948   : > { %7115 = vmatpush3.bf16.msra.mxu1 %v8601_v19 }
 0x949   : > { %7140 = vmatprep.subr.bf16.mxu1 %v7759_v29 }
 0x94b   : > { %7117 = vmatmul.mubr.msk.bf16.vlgmr.msra.gmra.mrb[120].mxu1 %vm3055_vm13, %v7667_v36 }
 0x94c   : > { %7144 = vmatprep.mubr.msk.bf16.mxu1 %vm7760_vm4, %v7759_v29  ;;  %7141 = vmatpush3.bf16.msra.mxu1 %v7671_v49  ;;  %v7679_v49 = vld [vmem:[%s9249_s14 + $0x20] sm:$0xff]  }
 0x94d   : > { %7142 = vmatprep.subr.bf16.mxu1 %v7759_v29 }
 0x950   : > { %7143 = vmatpush3.bf16.msra.mxu1 %v7672_v2  ;;  %v7680_v2 = vld [vmem:[%s9249_s14 + $0x28] sm:$0xff]  }
 0x951   : > { %7148 = vmatprep.subr.bf16.mxu1 %v7759_v29 }
 0xa0e   : > { %v3614_v52 = vpop.f32.mrb[116].mxu1 }
 0xa0f   : > { %v3621_v60 = vadd.f32 %v3614_v52, %v3505_v24  ;;  %v7106_v61 = vpop.f32.mrb[117].mxu1 }
 0xa10   : > { %v3617_v27 = vpop.f32.mrb[118].mxu1 }
 0xa11   : > { %v3622_v10 = vadd.f32 %v3617_v27, %v3506_v59  ;;  %v7107_v13 = vpop.f32.mrb[119].mxu1 }
 0xa1e   : > { %v3668_v33 = vpop.f32.mrb[120].mxu1 }
 0xa1f   : > { %v7118_v34 = vpop.f32.mrb[121].mxu1 }
 0xa20   : > { %v3671_v0 = vpop.f32.mrb[122].mxu1 }
 0xa21   : > { %v3675_v47 = vpack.c.bf16 %v3671_v0, %v3668_v33  ;;  %v7119_v44 = vpop.f32.mrb[123].mxu1 }
 0xa22   : > { %v6077_v44 = vld [vmem:[%s9248_s13 + $0x2] sm:$0x3] }
 0xa23   : > { %7125 = vmatmul.mubr.msk.bf16.vlgmr.msra.gmra.mrb[112].mxu0 %vm762_vm0, %v3675_v47 }
 0xa24   : > { %7129 = vmatpush3.bf16.msra.mxu0 %v8596_v50  ;;  %7136 = vmatprep.mubr.msk.bf16.mxu0 %vm7760_vm4, %v7759_v29 }
 0xa25   : > { %7130 = vmatprep.subr.bf16.mxu0 %v7759_v29 }
 0xa28   : > { %7131 = vmatpush3.bf16.msra.mxu0 %v8594_v51 }
 0xa29   : > { %7132 = vmatprep.subr.bf16.mxu0 %v7759_v29 }
 0xa2c   : > { %7133 = vmatpush3.bf16.msra.mxu0 %v8604_v21 }
 0xa2d   : > { %7134 = vmatprep.subr.bf16.mxu0 %v7759_v29 }
 0xa30   : > { %7135 = vmatpush3.bf16.msra.mxu0 %v8601_v19 }
 0xa31   : > { %7160 = vmatprep.subr.bf16.mxu0 %v7759_v29 }
 0xa33   : > { %7137 = vmatmul.mubr.msk.bf16.vlgmr.msra.gmra.mrb[116].mxu0 %vm3055_vm13, %v7670_v1  ;;  %v4121_v1 = vld [vmem:[%s9248_s13] sm:$0x3] }
 0xa34   : > { %7164 = vmatprep.mubr.msk.bf16.mxu0 %vm7760_vm4, %v7759_v29  ;;  %7161 = vmatpush3.bf16.msra.mxu0 %v7674_v56 }
 0xa35   : > { %7162 = vmatprep.subr.bf16.mxu0 %v7759_v29 }
 0xa38   : > { %7163 = vmatpush3.bf16.msra.mxu0 %v7675_v57 }
 0xa39   : > { %7168 = vmatprep.subr.bf16.mxu0 %v7759_v29 }
 0xaf6   : > { %v3730_v46 = vpop.f32.mrb[112].mxu0 }
 0xaf7   : > { %v3737_v4 = vadd.f32 %v3730_v46, %v3621_v60  ;;  %v7126_v58 = vpop.f32.mrb[113].mxu0  ;;  %v7681_v46 = vld [vmem:[%s9249_s14 + $0x30] sm:$0xff]  }
 0xaf8   : > { %v3733_v22 = vpop.f32.mrb[114].mxu0  ;;  %v7683_v58 = vld [vmem:[%s9249_s14] sm:$0xff]  }
 0xaf9   : > { %v3738_v23 = vadd.f32 %v3733_v22, %v3622_v10  ;;  %v7127_v39 = vpop.f32.mrb[115].mxu0  ;;  %v6075_v10 = vld [vmem:[%s9247_s12] ss:$0 sm:$0xff]  ;;  %v7684_v22 = vld [vmem:[%s9249_s14 + $0x8] sm:$0xff]  }
 0xafa   : > { %v7686_v39 = vld [vmem:[%s9249_s14 + $0x18] sm:$0xff]  }
 0xb06   : > { %v3784_v48 = vpop.f32.mrb[116].mxu0 }
 0xb07   : > { %v7138_v26 = vpop.f32.mrb[117].mxu0 }
 0xb08   : > { %v3787_v37 = vpop.f32.mrb[118].mxu0 }
 0xb09   : > { %v3791_v41 = vpack.c.bf16 %v3787_v37, %v3784_v48  ;;  %v7139_v43 = vpop.f32.mrb[119].mxu0 }
 0xb0b   : > { %7145 = vmatmul.mubr.msk.bf16.vlgmr.msra.gmra.mrb[124].mxu1 %vm762_vm0, %v3791_v41 }
 0xb0c   : > { %7149 = vmatpush3.bf16.msra.mxu1 %v8596_v50  ;;  %7156 = vmatprep.mubr.msk.bf16.mxu1 %vm7760_vm4, %v7759_v29 }
 0xb0d   : > { %7150 = vmatprep.subr.bf16.mxu1 %v7759_v29 }
 0xb10   : > { %7151 = vmatpush3.bf16.msra.mxu1 %v8594_v51 }
 0xb11   : > { %7152 = vmatprep.subr.bf16.mxu1 %v7759_v29 }
 0xb14   : > { %7153 = vmatpush3.bf16.msra.mxu1 %v8604_v21 }
 0xb15   : > { %7154 = vmatprep.subr.bf16.mxu1 %v7759_v29 }
 0xb18   : > { %7155 = vmatpush3.bf16.msra.mxu1 %v8601_v19 }
 0xb19   : > { %7180 = vmatprep.subr.bf16.mxu1 %v7759_v29 }
 0xb1b   : > { %7157 = vmatmul.mubr.msk.bf16.vlgmr.msra.gmra.mrb[128].mxu1 %vm3055_vm13, %v7673_v54  ;;  %v7687_v54 = vld [vmem:[%s9249_s14 + $0x40] sm:$0xff]  }
 0xb1c   : > { %7184 = vmatprep.mubr.msk.bf16.mxu1 %vm7760_vm4, %v7759_v29 }
 0xbde   : > { %v3846_v62 = vpop.f32.mrb[124].mxu1 }
 0xbdf   : > { %v3853_v17 = vadd.f32 %v3846_v62, %v3737_v4  ;;  %v7146_v35 = vpop.f32.mrb[125].mxu1  ;;  %v7682_v4 = vld [vmem:[%s9249_s14 + $0x38] sm:$0xff]  }
 0xbe0   : > { %v3849_v25 = vpop.f32.mrb[126].mxu1 }
 0xbe1   : > { %v3854_v53 = vadd.f32 %v3849_v25, %v3738_v23  ;;  %v7147_v55 = vpop.f32.mrb[127].mxu1  ;;  %v7685_v23 = vld [vmem:[%s9249_s14 + $0x10] sm:$0xff]   ;;  %v7688_v25 = vld [vmem:[%s9249_s14 + $0x48] sm:$0xff]  }
 0xbe2   : > { %v7689_v55 = vld [vmem:[%s9249_s14 + $0x50] sm:$0xff]  }
 0xbee   : > { %v3900_v42 = vpop.f32.mrb[128].mxu1 }
 0xbef   : > { %v7158_v12 = vpop.f32.mrb[129].mxu1 }
 0xbf0   : > { %v3903_v45 = vpop.f32.mrb[130].mxu1  ;;  %v7690_v12 = vld [vmem:[%s9249_s14 + $0x60] sm:$0xff]  }
 0xbf1   : > { %v3907_v14 = vpack.c.bf16 %v3903_v45, %v3900_v42  ;;  %v7159_v63 = vpop.f32.mrb[131].mxu1  ;;  %v6112_v42 = vld [vmem:[%s9248_s13 + $0x6] sm:$0x3]  ;;  %v7691_v45 = vld [vmem:[%s9249_s14 + $0x58] sm:$0xff]  }
 0xbf2   : > { %v7693_v63 = vld [vmem:[%s9249_s14 + $0x70] sm:$0xff]  }
 0xbf3   : > { %7165 = vmatmul.mubr.msk.bf16.vlgmr.msra.gmra.mrb[120].mxu0 %vm762_vm0, %v3907_v14  ;;  %v7692_v14 = vld [vmem:[%s9249_s14 + $0x68] sm:$0xff]  }
 0xbf4   : > { %7169 = vmatpush3.bf16.msra.mxu0 %v8596_v50  ;;  %7176 = vmatprep.mubr.msk.bf16.mxu0 %vm7760_vm4, %v7759_v29  ;;  %v7678_v50 = vld [vmem:[%s9244_s9 + $0x88] sm:$0xff]  }
 0xbf5   : > { %7170 = vmatprep.subr.bf16.mxu0 %v7759_v29 }
 0xbf8   : > { %7171 = vmatpush3.bf16.msra.mxu0 %v8594_v51  ;;  %v7677_v51 = vld [vmem:[%s9244_s9 + $0x80] sm:$0xff]  }
 0xbf9   : > { %7172 = vmatprep.subr.bf16.mxu0 %v7759_v29  ;;  %7181 = vmatpush3.bf16.msra.mxu1 %v7677_v51 }
 0xbfa   : > { %7182 = vmatprep.subr.bf16.mxu1 %v7759_v29 }
 0xbfc   : > { %7173 = vmatpush3.bf16.msra.mxu0 %v8604_v21 }
 0xbfd   : > { %7174 = vmatprep.subr.bf16.mxu0 %v7759_v29  ;;  %7183 = vmatpush3.bf16.msra.mxu1 %v7678_v50 }
 0xbfe   : > { %7188 = vmatprep.subr.bf16.mxu1 %v7759_v29 }
 0xc00   : > { %7175 = vmatpush3.bf16.msra.mxu0 %v8601_v19 }
 0xc01   : > { %7194 = vmatprep.subr.bf16.mxu0 %v7759_v29 }
 0xc03   : > { %7177 = vmatmul.mubr.msk.bf16.vlgmr.msra.gmra.mrb[124].mxu0 %vm3055_vm13, %v7676_v9  ;;  %v7694_v9 = vld [vmem:[%s9249_s14 + $0x78] sm:$0xff]  }
 0xc04   : > { %7196 = vmatprep.mubr.msk.bf16.mxu0 %vm7760_vm4, %v7759_v29 }
 0xcc6   : > { %v3962_v19 = vpop.f32.mrb[120].mxu0 }
 0xcc7   : > { %v3969_v21 = vadd.f32 %v3962_v19, %v3853_v17  ;;  %v7166_v15 = vpop.f32.mrb[121].mxu0 }
 0xcc8   : > { %v3965_v32 = vpop.f32.mrb[122].mxu0 }
 0xcc9   : > { %v3970_v3 = vadd.f32 %v3965_v32, %v3854_v53  ;;  %v7167_v20 = vpop.f32.mrb[123].mxu0  ;;  %v6097_v53 = vld [vmem:[%s9248_s13 + $0x4] sm:$0x3] }
 0xcd6   : > { %v4016_v28 = vpop.f32.mrb[124].mxu0 }
 0xcd7   : > { %v7178_v16 = vpop.f32.mrb[125].mxu0 }
 0xcd8   : > { %v4019_v24 = vpop.f32.mrb[126].mxu0 }
 0xcd9   : > { %v4023_v8 = vpack.c.bf16 %v4019_v24, %v4016_v28  ;;  %v7179_v30 = vpop.f32.mrb[127].mxu0 }
 0xcdb   : > { %7185 = vmatmul.mubr.msk.bf16.vlgmr.msra.gmra.mrb[132].mxu1 %vm762_vm0, %v4023_v8 }
 0xcdc   : > { %7190 = vmatprep.mubr.msk.bf16.mxu1 %vm7760_vm4, %v7759_v29 }
 0xdae   : > { %v4078_v59 = vpop.f32.mrb[132].mxu1 }
 0xdaf   : > { %v4085_v7 = vadd.f32 %v4078_v59, %v3969_v21  ;;  %v7186_v18 = vpop.f32.mrb[133].mxu1 }
 0xdb0   : > { %v4081_v31 = vpop.f32.mrb[134].mxu1 }
 0xdb1   : > { %v4094_v38 = vadd.f32 %v6073_v5, %v4085_v7  ;;  %v4086_v40 = vadd.f32 %v4081_v31, %v3970_v3  ;;  %v7187_v36 = vpop.f32.mrb[135].mxu1  ;;  %v6127_v7 = vld [vmem:[%s9248_s13 + $0x8] sm:$0x3]  ;;  %v7695_v31 = vld [vmem:[%s9249_s14 + $0x80] sm:$0xff]  }
 0xdb3   : > { %vm4096_vm14 = vcmp.ge.f32.partialorder %v4094_v38, 0.0  ;;  %v4098_v6 = vmul.f32 0.2, %v4094_v38  ;;  %v4095_v52 = vadd.f32 %v6073_v5, %v4086_v40 }
 0xdb5   : > { %v4100_v60 = vsel %vm4096_vm14, %v4094_v38, %v4098_v6  ;;  %vm4097_vm0 = vcmp.ge.f32.partialorder %v4095_v52, 0.0  ;;  %v4099_v61 = vmul.f32 0.2, %v4095_v52  ;;  %v7696_v6 = vld [vmem:[%s9249_s14 + $0x88] sm:$0xff]  }
 0xdb6   : > { %v4109_v27 = vmul.f32 %v6074_v11, %v4100_v60  ;;  %v7698_v60 = vld [vmem:[%s9249_s14 + $0xa0] sm:$0xff]  }
 0xdb7   : > { %v4101_v13 = vsel %vm4097_vm0, %v4095_v52, %v4099_v61  ;;  %v7697_v52 = vld [vmem:[%s9249_s14 + $0x90] sm:$0xff]   ;;  %v7699_v61 = vld [vmem:[%s9249_s14 + $0x98] sm:$0xff]  }
 0xdb8   : > { %v4110_v33 = vmul.f32 %v6074_v11, %v4101_v13  ;;  %v4118_v34 = vadd.f32 %v6075_v10, %v4109_v27  ;;  %v6142_v11 = vld [vmem:[%s9248_s13 + $0xa] sm:$0x3]  ;;  %v7702_v13 = vld [vmem:[%s9249_s14 + $0xb8] sm:$0xff]  }
 0xdb9   : > { %v7700_v27 = vld [vmem:[%s9249_s14 + $0xa8] sm:$0xff]  }
 0xdba   : > { %v4119_v0 = vadd.f32 %v6075_v10, %v4110_v33  ;;  %v7701_v10 = vld [vmem:[%s9249_s14 + $0xb0] sm:$0xff]  }
 0xdbc   : > { %v8836_v47 = vpack.c.bf16 %v4119_v0, %v4118_v34 }
 0xdbe   : > { %7189 = vmatpush3.bf16.msra.mxu1 %v8836_v47  ;;  %7195 = vmatpush3.bf16.msra.mxu0 %v8836_v47 }
 0xdbf   : > { %7200 = vmatprep.subr.bf16.mxu1 %v7759_v29  ;;  %7212 = vmatprep.subr.bf16.mxu0 %v7759_v29 }
 0xdc1   : > { %7197 = vmatmul.mubr.msk.bf16.vlgmr.msra.gmra.mrb[128].mxu0 %vm1330_vm3, %v6077_v44  ;;  %7191 = vmatmul.mubr.msk.bf16.vlgmr.msra.gmra.mrb[136].mxu1 %vm1330_vm3, %v4121_v1 }
 0xdc2   : > { %7201 = vmatpush3.bf16.msra.mxu1 %v7679_v49  ;;  %7208 = vmatprep.mubr.msk.bf16.mxu1 %vm7760_vm4, %v7759_v29 }
 0xdc3   : > { %7202 = vmatprep.subr.bf16.mxu1 %v7759_v29  ;;  %7220 = vmatprep.mubr.msk.bf16.mxu0 %vm7760_vm4, %v7759_v29 }
 0xdc4   : > { %7213 = vmatpush3.bf16.msra.mxu0 %v7683_v58 }
 0xdc5   : > { %7214 = vmatprep.subr.bf16.mxu0 %v7759_v29 }
 0xdc6   : > { %7203 = vmatpush3.bf16.msra.mxu1 %v7680_v2 }
 0xdc7   : > { %7204 = vmatprep.subr.bf16.mxu1 %v7759_v29 }
 0xdc8   : > { %7215 = vmatpush3.bf16.msra.mxu0 %v7684_v22 }
 0xdc9   : > { %7216 = vmatprep.subr.bf16.mxu0 %v7759_v29 }
 0xdca   : > { %7205 = vmatpush3.bf16.msra.mxu1 %v7681_v46 }
 0xdcb   : > { %7206 = vmatprep.subr.bf16.mxu1 %v7759_v29 }
 0xdcc   : > { %7217 = vmatpush3.bf16.msra.mxu0 %v7685_v23 }
 0xdcd   : > { %7218 = vmatprep.subr.bf16.mxu0 %v7759_v29 }
 0xdce   : > { %7207 = vmatpush3.bf16.msra.mxu1 %v7682_v4 }
 0xdcf   : > { %7224 = vmatprep.subr.bf16.mxu1 %v7759_v29 }
 0xdd0   : > { %7219 = vmatpush3.bf16.msra.mxu0 %v7686_v39 }
 0xdd1   : > { %7230 = vmatprep.subr.bf16.mxu0 %v7759_v29 }
 0xe94   : > { %v4213_v48 = vpop.f32.mrb[128].mxu0  ;;  %v4159_v26 = vpop.f32.mrb[136].mxu1 }
 0xe95   : > { %v4219_v37 = vpack.c.bf16 %v4213_v48, %v4213_v48  ;;  %v7198_v41 = vpop.f32.mrb[129].mxu0  ;;  %v4165_v43 = vpack.c.bf16 %v4159_v26, %v4159_v26  ;;  %v7192_v56 = vpop.f32.mrb[137].mxu1 }
 0xe96   : > { %v4216_v57 = vpop.f32.mrb[130].mxu0  ;;  %v4162_v62 = vpop.f32.mrb[138].mxu1  ;;  %v6157_v41 = vld [vmem:[%s9248_s13 + $0xc] sm:$0x3] }
 0xe97   : > { %7209 = vmatmul.mubr.msk.bf16.vlgmr.msra.gmra.mrb[140].mxu1 %vm3055_vm13, %v4219_v37  ;;  %v7199_v17 = vpop.f32.mrb[131].mxu0  ;;  %7221 = vmatmul.mubr.msk.bf16.vlgmr.msra.gmra.mrb[132].mxu0 %vm3055_vm13, %v4165_v43  ;;  %v7193_v35 = vpop.f32.mrb[139].mxu1 }
 0xe98   : > { %7225 = vmatpush3.bf16.msra.mxu1 %v8836_v47  ;;  %7226 = vmatprep.mubr.msk.bf16.mxu1 %vm7760_vm4, %v7759_v29  ;;  %v7704_v17 = vld [vmem:[%s9249_s14 + $0xc8] sm:$0xff]  }
 0xe99   : > { %7242 = vmatprep.subr.bf16.mxu1 %v7759_v29  ;;  %7231 = vmatpush3.bf16.msra.mxu0 %v7687_v54  ;;  %v7703_v54 = vld [vmem:[%s9249_s14 + $0xc0] sm:$0xff]   ;;  %v6172_v35 = vld [vmem:[%s9248_s13 + $0xe] sm:$0x3] }
 0xe9a   : > { %7232 = vmatprep.subr.bf16.mxu0 %v7759_v29  ;;  %7238 = vmatprep.mubr.msk.bf16.mxu0 %vm7760_vm4, %v7759_v29 }
 0xe9d   : > { %7233 = vmatpush3.bf16.msra.mxu0 %v7688_v25  ;;  %v7705_v25 = vld [vmem:[%s9249_s14 + $0xd0] sm:$0xff]  }
 0xe9e   : > { %7234 = vmatprep.subr.bf16.mxu0 %v7759_v29 }
 0xe9f   : > { %7227 = vmatmul.mubr.msk.bf16.vlgmr.msra.gmra.mrb[144].mxu1 %vm1330_vm3, %v6097_v53  ;;  %v7706_v53 = vld [vmem:[%s9249_s14 + $0xe0] sm:$0xff]  }
 0xea0   : > { %7243 = vmatpush3.bf16.msra.mxu1 %v8836_v47  ;;  %7244 = vmatprep.mubr.msk.bf16.mxu1 %vm7760_vm4, %v7759_v29 }
 0xea1   : > { %7248 = vmatprep.subr.bf16.mxu1 %v7759_v29  ;;  %7235 = vmatpush3.bf16.msra.mxu0 %v7689_v55  ;;  %v7707_v55 = vld [vmem:[%s9249_s14 + $0xd8] sm:$0xff]  }
 0xea2   : > { %7236 = vmatprep.subr.bf16.mxu0 %v7759_v29 }
 0xea5   : > { %7237 = vmatpush3.bf16.msra.mxu0 %v7691_v45  ;;  %v7710_v45 = vld [vmem:[%s9249_s14 + $0xf8] sm:$0xff]  }
 0xea6   : > { %7260 = vmatprep.subr.bf16.mxu0 %v7759_v29 }
 0xea7   : > { %7245 = vmatmul.mubr.msk.bf16.vlgmr.msra.gmra.mrb[148].mxu1 %vm1330_vm3, %v6112_v42  ;;  %v7708_v42 = vld [vmem:[%s9249_s14 + $0xe8] sm:$0xff]  }
 0xea8   : > { %7249 = vmatpush3.bf16.msra.mxu1 %v7690_v12  ;;  %7256 = vmatprep.mubr.msk.bf16.mxu1 %vm7760_vm4, %v7759_v29  ;;  %v7709_v12 = vld [vmem:[%s9249_s14 + $0xf0] sm:$0xff]  }
 0xea9   : > { %7250 = vmatprep.subr.bf16.mxu1 %v7759_v29 }
 0xeac   : > { %7251 = vmatpush3.bf16.msra.mxu1 %v7692_v14 }
 0xead   : > { %7252 = vmatprep.subr.bf16.mxu1 %v7759_v29 }
 0xeb0   : > { %7253 = vmatpush3.bf16.msra.mxu1 %v7693_v63 }
 0xeb1   : > { %7254 = vmatprep.subr.bf16.mxu1 %v7759_v29 }
 0xeb4   : > { %7255 = vmatpush3.bf16.msra.mxu1 %v7694_v9 }
 0xeb5   : > { %7278 = vmatprep.subr.bf16.mxu1 %v7759_v29 }
 0xf6a   : > { %v4290_v51 = vpop.f32.mrb[140].mxu1  ;;  %v4357_v50 = vpop.f32.mrb[132].mxu0 }
 0xf6b   : > { %v7210_v19 = vpop.f32.mrb[141].mxu1  ;;  %v4358_v21 = vadd.f32 %v4357_v50, %v4290_v51  ;;  %v7222_v15 = vpop.f32.mrb[133].mxu0 }
 0xf6c   : > { %v4293_v32 = vpop.f32.mrb[142].mxu1  ;;  %v4360_v3 = vpop.f32.mrb[134].mxu0 }
 0xf6d   : > { %v7211_v20 = vpop.f32.mrb[143].mxu1  ;;  %v7223_v28 = vpop.f32.mrb[135].mxu0 }
 0xf72   : > { %v4402_v16 = vpop.f32.mrb[144].mxu1 }
 0xf73   : > { %v4408_v24 = vpack.c.bf16 %v4402_v16, %v4402_v16  ;;  %v7228_v8 = vpop.f32.mrb[145].mxu1 }
 0xf74   : > { %v4405_v30 = vpop.f32.mrb[146].mxu1 }
 0xf75   : > { %7239 = vmatmul.mubr.msk.bf16.vlgmr.msra.gmra.mrb[136].mxu0 %vm3055_vm13, %v4408_v24  ;;  %v7229_v59 = vpop.f32.mrb[147].mxu1 }
 0xf76   : > { %7261 = vmatpush3.bf16.msra.mxu0 %v8836_v47  ;;  %7262 = vmatprep.mubr.msk.bf16.mxu0 %vm7760_vm4, %v7759_v29  ;;  %v6187_v59 = vld [vmem:[%s9248_s13 + $0x10] sm:$0x3] }
 0xf77   : > { %7266 = vmatprep.subr.bf16.mxu0 %v7759_v29 }
 0xf7a   : > { %v4525_v5 = vpop.f32.mrb[148].mxu1 }
 0xf7b   : > { %v4531_v18 = vpack.c.bf16 %v4525_v5, %v4525_v5  ;;  %v7246_v38 = vpop.f32.mrb[149].mxu1  ;;  %v7711_v5 = vld [vmem:[%s9249_s14 + $0x100] sm:$0xff]  }
 0xf7c   : > { %v4528_v40 = vpop.f32.mrb[150].mxu1  ;;  %v7712_v38 = vld [vmem:[%s9249_s14 + $0x108] sm:$0xff]  }
 0xf7d   : > { %7257 = vmatmul.mubr.msk.bf16.vlgmr.msra.gmra.mrb[152].mxu1 %vm3055_vm13, %v4531_v18  ;;  %7263 = vmatmul.mubr.msk.bf16.vlgmr.msra.gmra.mrb[140].mxu0 %vm1330_vm3, %v6127_v7  ;;  %v7247_v36 = vpop.f32.mrb[151].mxu1  ;;  %v7713_v40 = vld [vmem:[%s9249_s14 + $0x110] sm:$0xff]  }
 0xf7e   : > { %7279 = vmatpush3.bf16.msra.mxu1 %v8836_v47  ;;  %7280 = vmatprep.mubr.msk.bf16.mxu1 %vm7760_vm4, %v7759_v29  ;;  %v7714_v36 = vld [vmem:[%s9249_s14 + $0x118] sm:$0xff]  }
 0xf7f   : > { %7267 = vmatpush3.bf16.msra.mxu0 %v7695_v31  ;;  %7284 = vmatprep.subr.bf16.mxu1 %v7759_v29 }
 0xf80   : > { %7268 = vmatprep.subr.bf16.mxu0 %v7759_v29  ;;  %7274 = vmatprep.mubr.msk.bf16.mxu0 %vm7760_vm4, %v7759_v29 }
 0xf83   : > { %7269 = vmatpush3.bf16.msra.mxu0 %v7696_v6  ;;  %v7715_v6 = vld [vmem:[%s9253_s18] sm:$0xff]  }
 0xf84   : > { %7270 = vmatprep.subr.bf16.mxu0 %v7759_v29 }
 0xf85   : > { %7281 = vmatmul.mubr.msk.bf16.vlgmr.msra.gmra.mrb[156].mxu1 %vm1330_vm3, %v6142_v11  ;;  %v7716_v11 = vld [vmem:[%s9253_s18 + $0x8] sm:$0xff]  }
 0xf86   : > { %7292 = vmatprep.mubr.msk.bf16.mxu1 %vm7760_vm4, %v7759_v29  ;;  %7285 = vmatpush3.bf16.msra.mxu1 %v7698_v60  ;;  %v7718_v60 = vld [vmem:[%s9253_s18 + $0x18] sm:$0xff]  }
 0xf87   : > { %7271 = vmatpush3.bf16.msra.mxu0 %v7697_v52  ;;  %7286 = vmatprep.subr.bf16.mxu1 %v7759_v29  ;;  %v7717_v52 = vld [vmem:[%s9253_s18 + $0x10] sm:$0xff]  }
 0xf88   : > { %7272 = vmatprep.subr.bf16.mxu0 %v7759_v29 }
 0xf8a   : > { %7287 = vmatpush3.bf16.msra.mxu1 %v7700_v27 }
 0xf8b   : > { %7273 = vmatpush3.bf16.msra.mxu0 %v7699_v61  ;;  %7288 = vmatprep.subr.bf16.mxu1 %v7759_v29  ;;  %v7719_v61 = vld [vmem:[%s9253_s18 + $0x20] sm:$0xff]  }
 0xf8c   : > { %7296 = vmatprep.subr.bf16.mxu0 %v7759_v29 }
 0xf8e   : > { %7289 = vmatpush3.bf16.msra.mxu1 %v7701_v10 }
 0xf8f   : > { %7290 = vmatprep.subr.bf16.mxu1 %v7759_v29 }
 0xf92   : > { %7291 = vmatpush3.bf16.msra.mxu1 %v7702_v13 }
 0xf93   : > { %7314 = vmatprep.subr.bf16.mxu1 %v7759_v29 }
0x1048   : > { %v4479_v33 = vpop.f32.mrb[136].mxu0 }
0x1049   : > { %v4485_v34 = vadd.f32 %v4479_v33, %v4358_v21  ;;  %v7240_v0 = vpop.f32.mrb[137].mxu0 }
0x104a   : > { %v4482_v44 = vpop.f32.mrb[138].mxu0 }
0x104b   : > { %v7241_v1 = vpop.f32.mrb[139].mxu0 }
0x1050   : > { %v4602_v49 = vpop.f32.mrb[152].mxu1  ;;  %v4648_v2 = vpop.f32.mrb[140].mxu0 }
0x1051   : > { %v4608_v46 = vadd.f32 %v4602_v49, %v4485_v34  ;;  %v4654_v4 = vpack.c.bf16 %v4648_v2, %v4648_v2  ;;  %v7258_v58 = vpop.f32.mrb[153].mxu1  ;;  %v7264_v22 = vpop.f32.mrb[141].mxu0 }
0x1052   : > { %v4605_v23 = vpop.f32.mrb[154].mxu1  ;;  %v4651_v39 = vpop.f32.mrb[142].mxu0 }
0x1053   : > { %7275 = vmatmul.mubr.msk.bf16.vlgmr.msra.gmra.mrb[144].mxu0 %vm3055_vm13, %v4654_v4  ;;  %v7259_v48 = vpop.f32.mrb[155].mxu1  ;;  %v7265_v26 = vpop.f32.mrb[143].mxu0  ;;  %v7720_v39 = vld [vmem:[%s9253_s18 + $0x28] sm:$0xff]  }
0x1054   : > { %7297 = vmatpush3.bf16.msra.mxu0 %v8836_v47  ;;  %7298 = vmatprep.mubr.msk.bf16.mxu0 %vm7760_vm4, %v7759_v29  ;;  %v7721_v48 = vld [vmem:[%s9253_s18 + $0x30] sm:$0xff]   ;;  %v7722_v26 = vld [vmem:[%s9253_s18 + $0x38] sm:$0xff]  }
0x1055   : > { %7302 = vmatprep.subr.bf16.mxu0 %v7759_v29 }
0x1058   : > { %v4771_v37 = vpop.f32.mrb[156].mxu1 }
0x1059   : > { %v4777_v43 = vpack.c.bf16 %v4771_v37, %v4771_v37  ;;  %v7282_v56 = vpop.f32.mrb[157].mxu1 }
0x105a   : > { %v4774_v57 = vpop.f32.mrb[158].mxu1 }
0x105b   : > { %7293 = vmatmul.mubr.msk.bf16.vlgmr.msra.gmra.mrb[160].mxu1 %vm3055_vm13, %v4777_v43  ;;  %7299 = vmatmul.mubr.msk.bf16.vlgmr.msra.gmra.mrb[148].mxu0 %vm1330_vm3, %v6157_v41  ;;  %v7283_v62 = vpop.f32.mrb[159].mxu1  ;;  %v6202_v41 = vld [vmem:[%s9250_s15] ss:$0 sm:$0xff] }
0x105c   : > { %7315 = vmatpush3.bf16.msra.mxu1 %v8836_v47  ;;  %7316 = vmatprep.mubr.msk.bf16.mxu1 %vm7760_vm4, %v7759_v29 }
0x105d   : > { %7303 = vmatpush3.bf16.msra.mxu0 %v7703_v54  ;;  %7320 = vmatprep.subr.bf16.mxu1 %v7759_v29 }
0x105e   : > { %7304 = vmatprep.subr.bf16.mxu0 %v7759_v29  ;;  %7310 = vmatprep.mubr.msk.bf16.mxu0 %vm7760_vm4, %v7759_v29 }
0x1061   : > { %7305 = vmatpush3.bf16.msra.mxu0 %v7704_v17 }
0x1062   : > { %7306 = vmatprep.subr.bf16.mxu0 %v7759_v29 }
0x1063   : > { %7317 = vmatmul.mubr.msk.bf16.vlgmr.msra.gmra.mrb[164].mxu1 %vm1330_vm3, %v6172_v35  ;;  %v6203_v35 = vld [vmem:[%s9251_s16] ss:$0 sm:$0xff] }
0x1064   : > { %7328 = vmatprep.mubr.msk.bf16.mxu1 %vm7760_vm4, %v7759_v29  ;;  %7321 = vmatpush3.bf16.msra.mxu1 %v7706_v53  ;;  %v6204_v53 = vld [vmem:[%s9252_s17] ss:$0 sm:$0xff] }
0x1065   : > { %7307 = vmatpush3.bf16.msra.mxu0 %v7705_v25  ;;  %7322 = vmatprep.subr.bf16.mxu1 %v7759_v29 }
0x1066   : > { %7308 = vmatprep.subr.bf16.mxu0 %v7759_v29 }
0x1068   : > { %7323 = vmatpush3.bf16.msra.mxu1 %v7708_v42 }
0x1069   : > { %7309 = vmatpush3.bf16.msra.mxu0 %v7707_v55  ;;  %7324 = vmatprep.subr.bf16.mxu1 %v7759_v29 }
0x106a   : > { %7332 = vmatprep.subr.bf16.mxu0 %v7759_v29 }
0x106c   : > { %7325 = vmatpush3.bf16.msra.mxu1 %v7709_v12  ;;  %v7723_v12 = vld [vmem:[%s9253_s18 + $0x40] sm:$0xff]  }
0x106d   : > { %7326 = vmatprep.subr.bf16.mxu1 %v7759_v29 }
0x1070   : > { %7327 = vmatpush3.bf16.msra.mxu1 %v7710_v45 }
0x1071   : > { %7350 = vmatprep.subr.bf16.mxu1 %v7759_v29 }
0x1126   : > { %v4725_v14 = vpop.f32.mrb[144].mxu0 }
0x1127   : > { %v4731_v63 = vadd.f32 %v4725_v14, %v4608_v46  ;;  %v7276_v9 = vpop.f32.mrb[145].mxu0  ;;  %v7724_v14 = vld [vmem:[%s9253_s18 + $0x48] sm:$0xff]  }
0x1128   : > { %v4728_v51 = vpop.f32.mrb[146].mxu0  ;;  %v7726_v9 = vld [vmem:[%s9253_s18 + $0x58] sm:$0xff]  }
0x1129   : > { %v7277_v50 = vpop.f32.mrb[147].mxu0  ;;  %v7727_v51 = vld [vmem:[%s9253_s18 + $0x60] sm:$0xff]  }
0x112a   : > { %v7728_v50 = vld [vmem:[%s9253_s18 + $0x68] sm:$0xff]  }
0x112e   : > { %v4848_v19 = vpop.f32.mrb[160].mxu1  ;;  %v4894_v21 = vpop.f32.mrb[148].mxu0 }
0x112f   : > { %v4854_v15 = vadd.f32 %v4848_v19, %v4731_v63  ;;  %v4900_v32 = vpack.c.bf16 %v4894_v21, %v4894_v21  ;;  %v7294_v3 = vpop.f32.mrb[161].mxu1  ;;  %v7300_v20 = vpop.f32.mrb[149].mxu0  ;;  %v7725_v63 = vld [vmem:[%s9253_s18 + $0x50] sm:$0xff]   ;;  %v7730_v21 = vld [vmem:[%s9253_s18 + $0x78] sm:$0xff]  }
0x1130   : > { %v4851_v28 = vpop.f32.mrb[162].mxu1  ;;  %v4897_v16 = vpop.f32.mrb[150].mxu0  ;;  %v7729_v19 = vld [vmem:[%s9253_s18 + $0x70] sm:$0xff]   ;;  %v7732_v3 = vld [vmem:[%s9253_s18 + $0x88] sm:$0xff]  }
0x1131   : > { %7311 = vmatmul.mubr.msk.bf16.vlgmr.msra.gmra.mrb[152].mxu0 %vm3055_vm13, %v4900_v32  ;;  %v7295_v24 = vpop.f32.mrb[163].mxu1  ;;  %v7301_v8 = vpop.f32.mrb[151].mxu0  ;;  %v7733_v20 = vld [vmem:[%s9253_s18 + $0x90] sm:$0xff]   ;;  %v7734_v28 = vld [vmem:[%s9253_s18 + $0x98] sm:$0xff]   ;;  %v7735_v16 = vld [vmem:[%s9253_s18 + $0xa0] sm:$0xff]  }
0x1132   : > { %7333 = vmatpush3.bf16.msra.mxu0 %v8836_v47  ;;  %7334 = vmatprep.mubr.msk.bf16.mxu0 %vm7760_vm4, %v7759_v29  ;;  %v7736_v24 = vld [vmem:[%s9253_s18 + $0xa8] sm:$0xff]   ;;  %v7737_v8 = vld [vmem:[%s9253_s18 + $0xb0] sm:$0xff]  }
0x1133   : > { %7338 = vmatprep.subr.bf16.mxu0 %v7759_v29 }
0x1136   : > { %v5017_v30 = vpop.f32.mrb[164].mxu1 }
0x1137   : > { %v5023_v7 = vpack.c.bf16 %v5017_v30, %v5017_v30  ;;  %v7318_v18 = vpop.f32.mrb[165].mxu1  ;;  %v7738_v30 = vld [vmem:[%s9253_s18 + $0xb8] sm:$0xff]  }
0x1138   : > { %v5020_v31 = vpop.f32.mrb[166].mxu1  ;;  %v7741_v18 = vld [vmem:[%s9253_s18 + $0xd0] sm:$0xff]  }
0x1139   : > { %7329 = vmatmul.mubr.msk.bf16.vlgmr.msra.gmra.mrb[168].mxu1 %vm3055_vm13, %v5023_v7  ;;  %7335 = vmatmul.mubr.msk.bf16.vlgmr.msra.gmra.mrb[156].mxu0 %vm1330_vm3, %v6187_v59  ;;  %v7319_v47 = vpop.f32.mrb[167].mxu1  ;;  %v7739_v59 = vld [vmem:[%s9253_s18 + $0xc0] sm:$0xff]   ;;  %v7740_v7 = vld [vmem:[%s9253_s18 + $0xc8] sm:$0xff]   ;;  %v7742_v31 = vld [vmem:[%s9253_s18 + $0xd8] sm:$0xff]  }
0x113a   : > { %7339 = vmatpush3.bf16.msra.mxu0 %v7711_v5  ;;  %7346 = vmatprep.mubr.msk.bf16.mxu0 %vm7760_vm4, %v7759_v29  ;;  %v7743_v47 = vld [vmem:[%s9253_s18 + $0xe0] sm:$0xff]  }
0x113b   : > { %7340 = vmatprep.subr.bf16.mxu0 %v7759_v29  ;;  %7366 = vmatprep.mubr.msk.bf16.mxu1 %vm7760_vm4, %v7759_v29 }
0x113c   : > { %7351 = vmatpush3.bf16.msra.mxu1 %v7715_v6 }
0x113d   : > { %7352 = vmatprep.subr.bf16.mxu1 %v7759_v29 }
0x113e   : > { %7341 = vmatpush3.bf16.msra.mxu0 %v7712_v38  ;;  %v7744_v38 = vld [vmem:[%s9253_s18 + $0xe8] sm:$0xff]  }
0x113f   : > { %7342 = vmatprep.subr.bf16.mxu0 %v7759_v29 }
0x1140   : > { %7353 = vmatpush3.bf16.msra.mxu1 %v7716_v11  ;;  %v5251_v11 = vld [vmem:[%s9254_s19] sm:$0x1] }
0x1141   : > { %7354 = vmatprep.subr.bf16.mxu1 %v7759_v29 }
0x1142   : > { %7343 = vmatpush3.bf16.msra.mxu0 %v7713_v40  ;;  %v7745_v40 = vld [vmem:[%s9253_s18 + $0xf0] sm:$0xff]  }
0x1143   : > { %7344 = vmatprep.subr.bf16.mxu0 %v7759_v29 }
0x1144   : > { %7355 = vmatpush3.bf16.msra.mxu1 %v7717_v52 }
0x1145   : > { %7356 = vmatprep.subr.bf16.mxu1 %v7759_v29 }
0x1146   : > { %7345 = vmatpush3.bf16.msra.mxu0 %v7714_v36  ;;  %v7746_v36 = vld [vmem:[%s9253_s18 + $0xf8] sm:$0xff]  }
0x1148   : > { %7357 = vmatpush3.bf16.msra.mxu1 %v7718_v60 }
0x1149   : > { %7358 = vmatprep.subr.bf16.mxu1 %v7759_v29 }
0x114c   : > { %7359 = vmatpush3.bf16.msra.mxu1 %v7719_v61 }
0x114d   : > { %7360 = vmatprep.subr.bf16.mxu1 %v7759_v29 }
0x1150   : > { %7361 = vmatpush3.bf16.msra.mxu1 %v7720_v39 }
0x1151   : > { %7362 = vmatprep.subr.bf16.mxu1 %v7759_v29 }
0x1154   : > { %7363 = vmatpush3.bf16.msra.mxu1 %v7721_v48 }
0x1155   : > { %7364 = vmatprep.subr.bf16.mxu1 %v7759_v29 }
0x1158   : > { %7365 = vmatpush3.bf16.msra.mxu1 %v7722_v26 }
0x1159   : > { %7370 = vmatprep.subr.bf16.mxu1 %v7759_v29 }
0x1204   : > { %v4971_v27 = vpop.f32.mrb[152].mxu0 }
0x1205   : > { %v4977_v10 = vadd.f32 %v4971_v27, %v4854_v15  ;;  %v7312_v13 = vpop.f32.mrb[153].mxu0  ;;  %v7731_v15 = vld [vmem:[%s9253_s18 + $0x80] sm:$0xff]  }
0x1206   : > { %v4974_v33 = vpop.f32.mrb[154].mxu0 }
0x1207   : > { %v7313_v34 = vpop.f32.mrb[155].mxu0 }
0x120c   : > { %v5094_v0 = vpop.f32.mrb[168].mxu1  ;;  %v5140_v44 = vpop.f32.mrb[156].mxu0 }
0x120d   : > { %v5100_v1 = vadd.f32 %v5094_v0, %v4977_v10  ;;  %v5146_v49 = vpack.c.bf16 %v5140_v44, %v5140_v44  ;;  %v7336_v2 = vpop.f32.mrb[157].mxu0  ;;  %v7330_v46 = vpop.f32.mrb[169].mxu1 }
0x120e   : > { %v5143_v4 = vpop.f32.mrb[158].mxu0  ;;  %v5097_v58 = vpop.f32.mrb[170].mxu1 }
0x120f   : > { %7347 = vmatmul.mubr.msk.bf16.vlgmr.msra.gmra.mrb[160].mxu0 %vm3055_vm13, %v5146_v49  ;;  %v7337_v22 = vpop.f32.mrb[159].mxu0  ;;  %v7331_v23 = vpop.f32.mrb[171].mxu1 }
0x12e2   : > { %v5217_v37 = vpop.f32.mrb[160].mxu0 }
0x12e3   : > { %v5223_v43 = vadd.f32 %v5217_v37, %v5100_v1  ;;  %v7348_v54 = vpop.f32.mrb[161].mxu0 }
0x12e4   : > { %v5220_v56 = vpop.f32.mrb[162].mxu0 }
0x12e5   : > { %v5231_v57 = vadd.f32 %v6202_v41, %v5223_v43  ;;  %v7349_v62 = vpop.f32.mrb[163].mxu0 }
0x12e7   : > { %vm5232_vm15 = vcmp.ge.f32.partialorder %v5231_v57, 0.0  ;;  %v5233_v17 = vmul.f32 0.2, %v5231_v57 }
0x12e9   : > { %v5234_v25 = vsel %vm5232_vm15, %v5231_v57, %v5233_v17 }
0x12ea   : > { %v5242_v55 = vmul.f32 %v6203_v35, %v5234_v25 }
0x12ec   : > { %v5250_v42 = vadd.f32 %v6204_v53, %v5242_v55 }
0x12ee   : > { %v9122_v45 = vpack.c.bf16 %v5250_v42, %v5250_v42 }
0x12f0   : > { %7367 = vmatmul.mubr.bf16.vlgmr.msra.gmra.mrb[172].mxu1 %v9122_v45  ;;  %v5376_v32 = vshrl.u32 %v9122_v45, 16  ;;  %v5486_v5 = vrot.slane %v9122_v45, 1 }
0x12f1   : > { %7371 = vmatpush3.bf16.msra.mxu1 %v7723_v12  ;;  %7386 = vmatprep.mubr.msk.bf16.mxu1 %vm7760_vm4, %v7759_v29 }
0x12f2   : > { %7372 = vmatprep.subr.bf16.mxu1 %v7759_v29  ;;  %v5594_v6 = vrot.slane %v5376_v32, 1 }
0x12f5   : > { %7373 = vmatpush3.bf16.msra.mxu1 %v7724_v14 }
0x12f6   : > { %7374 = vmatprep.subr.bf16.mxu1 %v7759_v29 }
0x12f9   : > { %7375 = vmatpush3.bf16.msra.mxu1 %v7725_v63 }
0x12fa   : > { %7376 = vmatprep.subr.bf16.mxu1 %v7759_v29 }
0x12fd   : > { %7377 = vmatpush3.bf16.msra.mxu1 %v7726_v9 }
0x12fe   : > { %7378 = vmatprep.subr.bf16.mxu1 %v7759_v29 }
0x1301   : > { %7379 = vmatpush3.bf16.msra.mxu1 %v7727_v51 }
0x1302   : > { %7380 = vmatprep.subr.bf16.mxu1 %v7759_v29 }
0x1305   : > { %7381 = vmatpush3.bf16.msra.mxu1 %v7728_v50 }
0x1306   : > { %7382 = vmatprep.subr.bf16.mxu1 %v7759_v29 }
0x1309   : > { %7383 = vmatpush3.bf16.msra.mxu1 %v7729_v19 }
0x130a   : > { %7384 = vmatprep.subr.bf16.mxu1 %v7759_v29 }
0x130d   : > { %7385 = vmatpush3.bf16.msra.mxu1 %v7730_v21 }
0x130e   : > { %7390 = vmatprep.subr.bf16.mxu1 %v7759_v29 }
0x1310   : > { %7387 = vmatmul.mubr.bf16.vlgmr.msra.gmra.mrb[172].mxu1 %v5376_v32 }
0x1311   : > { %7391 = vmatpush3.bf16.msra.mxu1 %v7731_v15  ;;  %7406 = vmatprep.mubr.msk.bf16.mxu1 %vm7760_vm4, %v7759_v29 }
0x1312   : > { %7392 = vmatprep.subr.bf16.mxu1 %v7759_v29 }
0x1315   : > { %7393 = vmatpush3.bf16.msra.mxu1 %v7732_v3 }
0x1316   : > { %7394 = vmatprep.subr.bf16.mxu1 %v7759_v29 }
0x1319   : > { %7395 = vmatpush3.bf16.msra.mxu1 %v7733_v20 }
0x131a   : > { %7396 = vmatprep.subr.bf16.mxu1 %v7759_v29 }
0x131d   : > { %7397 = vmatpush3.bf16.msra.mxu1 %v7734_v28 }
0x131e   : > { %7398 = vmatprep.subr.bf16.mxu1 %v7759_v29 }
0x1321   : > { %7399 = vmatpush3.bf16.msra.mxu1 %v7735_v16 }
0x1322   : > { %7400 = vmatprep.subr.bf16.mxu1 %v7759_v29 }
0x1325   : > { %7401 = vmatpush3.bf16.msra.mxu1 %v7736_v24 }
0x1326   : > { %7402 = vmatprep.subr.bf16.mxu1 %v7759_v29 }
0x1329   : > { %7403 = vmatpush3.bf16.msra.mxu1 %v7737_v8 }
0x132a   : > { %7404 = vmatprep.subr.bf16.mxu1 %v7759_v29 }
0x132d   : > { %7405 = vmatpush3.bf16.msra.mxu1 %v7738_v30 }
0x132e   : > { %7410 = vmatprep.subr.bf16.mxu1 %v7759_v29 }
0x1330   : > { %7407 = vmatmul.mubr.bf16.vlgmr.msra.gmra.mrb[172].mxu1 %v5486_v5 }
0x1331   : > { %7411 = vmatpush3.bf16.msra.mxu1 %v7739_v59  ;;  %7426 = vmatprep.mubr.msk.bf16.mxu1 %vm7760_vm4, %v7759_v29 }
0x1332   : > { %7412 = vmatprep.subr.bf16.mxu1 %v7759_v29 }
0x1335   : > { %7413 = vmatpush3.bf16.msra.mxu1 %v7740_v7 }
0x1336   : > { %7414 = vmatprep.subr.bf16.mxu1 %v7759_v29 }
0x1339   : > { %7415 = vmatpush3.bf16.msra.mxu1 %v7741_v18 }
0x133a   : > { %7416 = vmatprep.subr.bf16.mxu1 %v7759_v29 }
0x133d   : > { %7417 = vmatpush3.bf16.msra.mxu1 %v7742_v31 }
0x133e   : > { %7418 = vmatprep.subr.bf16.mxu1 %v7759_v29 }
0x1341   : > { %7419 = vmatpush3.bf16.msra.mxu1 %v7743_v47 }
0x1342   : > { %7420 = vmatprep.subr.bf16.mxu1 %v7759_v29 }
0x1345   : > { %7421 = vmatpush3.bf16.msra.mxu1 %v7744_v38 }
0x1346   : > { %7422 = vmatprep.subr.bf16.mxu1 %v7759_v29 }
0x1349   : > { %7423 = vmatpush3.bf16.msra.mxu1 %v7745_v40 }
0x134a   : > { %7424 = vmatprep.subr.bf16.mxu1 %v7759_v29 }
0x134d   : > { %7425 = vmatpush3.bf16.msra.mxu1 %v7746_v36 }
0x1350   : > { %7427 = vmatmul.mubr.bf16.vlgmr.msra.gmra.mrb[172].mxu1 %v5594_v6 }
0x1423   : > { %v5678_v52 = vpop.f32.mrb[172].mxu1 }
0x1424   : > { %v7438_v60 = vadd.f32 %v5678_v52, %v5251_v11  ;;  %v7428_v61 = vpop.f32.mrb[173].mxu1 }
0x1425   : > { %v5681_v27 = vpop.f32.mrb[174].mxu1 }
0x1426   : > { %v5685_v10 = vsub.f32 0.0, %v7438_v60  ;;  %v7429_v13 = vpop.f32.mrb[175].mxu1 }
0x1428   : > { %v5686_v33 = vmul.f32 1.442695, %v5685_v10 }
0x142a   : > { %7747 = vpow2.f32 %v5686_v33 }
0x1434   : > { %v7748_v34 = vpop.eup %7747 }
0x1435   : > { %v5688_v0 = vadd.f32 1.0, %v7748_v34 }
0x1437   : > { %7749 = vrcp.f32 %v5688_v0 }
0x1441   : > { %v7750_v29 = vpop.eup %7749 }
0x1442   : > { %5690 = vst [vmem:[%s625_s26] sm:$0x1] %v7750_v29 }
0x1443 PF: > { %s30_s1 = sadd.s32 1, %s7757_s1  }
0x1444   : > { %p27_p4 = scmp.ge.s32.totalorder %s30_s1, 4  }
0x1446   :  { %29 = sbr.rel (!%p27_p4) target bundleno = 6 (0x6), region = 181 }

</bundles_post_ra>
